<compile_context>
chip_gen: v7x
topology: tpu7x:2x2x1
jax: 0.10.0
libtpu: 0.0.40
codegen_flags: <defaults>
</compile_context>

<pallas_src>
import jax
import jax.numpy as jnp
from jax.experimental import pallas as pl
from jax.experimental.pallas import tpu as pltpu

IN_DIM = 32 * 32 * 3      # 3072 (hard-coded by the module)
HIDDEN = 512
NUM_CLASSES = 10
CLS_PAD = 128             # pad class dim to one full lane width
MAX_TB = 512              # batch-tile cap (fits comfortably in v7x's 64 MiB VMEM)


def _round_up(n, m):
    return (n + m - 1) // m * m


def mlp_kernel(x_ref, w1_ref, b1_ref, w2_ref, b2_ref, o_ref):
    # fc1: (TB, 3072) @ (3072, 512) — bf16 MXU operands, fp32 accumulation.
    x = x_ref[...].astype(w1_ref.dtype)
    h = jnp.dot(x, w1_ref[...], preferred_element_type=jnp.float32)
    h = h + b1_ref[...]
    h = jax.nn.sigmoid(h)                                  # fp32 elementwise (v5e-safe)
    # fc2: (TB, 512) @ (512, 128) — bf16 MXU operands, fp32 accumulation.
    out = jnp.dot(h.astype(w2_ref.dtype), w2_ref[...],
                  preferred_element_type=jnp.float32)
    out = out + b2_ref[...]
    o_ref[...] = out.astype(o_ref.dtype)


def prepare_params(w1, b1, w2, b2, param_dtype=jnp.bfloat16):
    """One-time prep (hoisted out of the forward path):
    transpose PyTorch (out,in) weights to (in,out), pad fc2 to 128 classes,
    and cast matmul operands to bf16. Biases stay fp32."""
    w1_t = w1.T.astype(param_dtype)                                   # (3072, 512)
    b1_2d = b1.reshape(1, HIDDEN).astype(jnp.float32)                 # (1, 512)
    w2_p = jnp.zeros((HIDDEN, CLS_PAD), param_dtype)
    w2_p = w2_p.at[:, :NUM_CLASSES].set(w2.T.astype(param_dtype))     # (512, 128)
    b2_p = jnp.zeros((1, CLS_PAD), jnp.float32)
    b2_p = b2_p.at[0, :NUM_CLASSES].set(b2.astype(jnp.float32))       # (1, 128)
    return w1_t, b1_2d, w2_p, b2_p


@jax.jit
def mlp_forward(x_nchw, w1_t, b1_2d, w2_p, b2_p):
    """x_nchw: (B, 3, 32, 32) float32. Returns logits (B, NUM_CLASSES) float32."""
    B = x_nchw.shape[0]
    x_flat = x_nchw.reshape(B, -1)                    # torch x.view(B, -1)

    # Batch tile: multiple of 8 sublanes, capped so double-buffered x/out tiles
    # plus resident bf16 weights fit v7x's 64 MiB VMEM.
    tb = min(MAX_TB, _round_up(B, 8))
    b_pad = _round_up(B, tb)
    if b_pad != B:
        x_flat = jnp.pad(x_flat, ((0, b_pad - B), (0, 0)))

    out_padded = pl.pallas_call(
        mlp_kernel,
        out_shape=jax.ShapeDtypeStruct((b_pad, CLS_PAD), jnp.float32),
        grid_spec=pltpu.PrefetchScalarGridSpec(
            num_scalar_prefetch=0,
            grid=(b_pad // tb,),
            in_specs=[
                # x tile streams across the batch grid.
                pl.BlockSpec((tb, IN_DIM),       lambda i: (i, 0)),
                # Constant index maps: weights/biases stay VMEM-resident across
                # batch-grid steps (fetched from HBM only once).
                pl.BlockSpec((IN_DIM, HIDDEN),   lambda i: (0, 0)),
                pl.BlockSpec((1, HIDDEN),        lambda i: (0, 0)),
                pl.BlockSpec((HIDDEN, CLS_PAD),  lambda i: (0, 0)),
                pl.BlockSpec((1, CLS_PAD),       lambda i: (0, 0)),
            ],
            out_specs=pl.BlockSpec((tb, CLS_PAD), lambda i: (i, 0)),
        ),
        compiler_params=pltpu.CompilerParams(
            dimension_semantics=("parallel",),   # v7x: shard batch over both TCs
            vmem_limit_bytes=32 << 20,           # actual footprint ~20 MiB at TB=512
        ),
    )(x_flat, w1_t, b1_2d, w2_p, b2_p)

    # Strip batch padding + padded class lanes for the caller.
    return out_padded[:B, :NUM_CLASSES]


def init_params(key):
    """Mimics PyTorch nn.Linear default init (uniform +/- 1/sqrt(fan_in))."""
    k1, k2, k3, k4 = jax.random.split(key, 4)
    bound1 = 1.0 / jnp.sqrt(IN_DIM)
    bound2 = 1.0 / jnp.sqrt(HIDDEN)
    w1 = jax.random.uniform(k1, (HIDDEN, IN_DIM), jnp.float32, -bound1, bound1)
    b1 = jax.random.uniform(k2, (HIDDEN,),        jnp.float32, -bound1, bound1)
    w2 = jax.random.uniform(k3, (NUM_CLASSES, HIDDEN), jnp.float32, -bound2, bound2)
    b2 = jax.random.uniform(k4, (NUM_CLASSES,),        jnp.float32, -bound2, bound2)
    return w1, b1, w2, b2


if __name__ == "__main__":
    key = jax.random.PRNGKey(0)
    kx, kp = jax.random.split(key)

    B = 8
    x = jax.random.normal(kx, (B, 3, 32, 32), jnp.float32)   # NCHW like PyTorch
    w1, b1, w2, b2 = init_params(kp)

    params = prepare_params(w1, b1, w2, b2)     # one-time weight prep
    out = mlp_forward(x, *params)
    out = jax.block_until_ready(out)
    assert out.shape == (B, NUM_CLASSES)

    # Tight check: reference that mimics the kernel's bf16-operand /
    # fp32-accumulate math.
    f32 = jnp.float32
    xb = x.reshape(B, -1).astype(jnp.bfloat16).astype(f32)
    w1b = w1.astype(jnp.bfloat16).astype(f32)
    w2b = w2.astype(jnp.bfloat16).astype(f32)
    h_ref = jax.nn.sigmoid(xb @ w1b.T + b1)
    ref_bf16 = h_ref.astype(jnp.bfloat16).astype(f32) @ w2b.T + b2
    assert jnp.allclose(out, ref_bf16, atol=5e-3, rtol=5e-3)

    # Loose check against the pure-fp32 PyTorch-equivalent math.
    ref_f32 = jax.nn.sigmoid(x.reshape(B, -1) @ w1.T + b1) @ w2.T + b2
    assert jnp.allclose(out, ref_f32, atol=5e-2, rtol=5e-2)

    print("KERNEL_OK")
</pallas_src>

<mosaic_0001>
module attributes {stable_mosaic.version = 11 : i64} {
  func.func @mlp_kernel(%arg0: i32, %arg1: memref<8x3072xf32, #tpu.memory_space<vmem>>, %arg2: memref<3072x512xbf16, #tpu.memory_space<vmem>>, %arg3: memref<1x512xf32, #tpu.memory_space<vmem>>, %arg4: memref<512x128xbf16, #tpu.memory_space<vmem>>, %arg5: memref<1x128xf32, #tpu.memory_space<vmem>>, %arg6: memref<8x128xf32, #tpu.memory_space<vmem>>) attributes {dimension_semantics = [#tpu.dimension_semantics<parallel>], iteration_bounds = array<i64: 1>, scalar_prefetch = 0 : i64, scratch_operands = 0 : i64, tpu.core_type = #tpu.core_type<tc>, window_params = [{transform_indices = @transform_0, window_bounds = array<i64: 8, 3072>}, {pipeline_mode = #tpu.pipeline_mode<synchronous>, transform_indices = @transform_1, window_bounds = array<i64: 3072, 512>}, {pipeline_mode = #tpu.pipeline_mode<synchronous>, transform_indices = @transform_2, window_bounds = array<i64: 1, 512>}, {pipeline_mode = #tpu.pipeline_mode<synchronous>, transform_indices = @transform_3, window_bounds = array<i64: 512, 128>}, {pipeline_mode = #tpu.pipeline_mode<synchronous>, transform_indices = @transform_4, window_bounds = array<i64: 1, 128>}, {transform_indices = @transform_5, window_bounds = array<i64: 8, 128>}]} {
    %c0 = arith.constant 0 : index
    %c0_0 = arith.constant 0 : index
    %0 = vector.load %arg1[%c0, %c0_0] : memref<8x3072xf32, #tpu.memory_space<vmem>>, vector<8x3072xf32>
    %1 = arith.truncf %0 : vector<8x3072xf32> to vector<8x3072xbf16>
    %c0_1 = arith.constant 0 : index
    %c0_2 = arith.constant 0 : index
    %2 = vector.load %arg2[%c0_1, %c0_2] : memref<3072x512xbf16, #tpu.memory_space<vmem>>, vector<3072x512xbf16>
    %cst = arith.constant dense<0.000000e+00> : vector<8x512xf32>
    %3 = tpu.matmul %1, %2, %cst {dimension_numbers = #tpu.dot_dimension_numbers<[1], [0], [0], [1], [0, 0, 1, 1], [], []>} : vector<8x3072xbf16>, vector<3072x512xbf16>, vector<8x512xf32> -> vector<8x512xf32>
    %c0_3 = arith.constant 0 : index
    %c0_4 = arith.constant 0 : index
    %4 = vector.load %arg3[%c0_3, %c0_4] : memref<1x512xf32, #tpu.memory_space<vmem>>, vector<1x512xf32>
    %5 = vector.broadcast %4 : vector<1x512xf32> to vector<8x512xf32>
    %6 = arith.addf %3, %5 : vector<8x512xf32>
    %7 = arith.negf %6 : vector<8x512xf32>
    %8 = math.exp %7 : vector<8x512xf32>
    %cst_5 = arith.constant 1.000000e+00 : f32
    %9 = vector.broadcast %cst_5 : f32 to vector<8x512xf32>
    %10 = arith.addf %9, %8 : vector<8x512xf32>
    %11 = arith.divf %9, %10 : vector<8x512xf32>
    %12 = arith.truncf %11 : vector<8x512xf32> to vector<8x512xbf16>
    %c0_6 = arith.constant 0 : index
    %c0_7 = arith.constant 0 : index
    %13 = vector.load %arg4[%c0_6, %c0_7] : memref<512x128xbf16, #tpu.memory_space<vmem>>, vector<512x128xbf16>
    %cst_8 = arith.constant dense<0.000000e+00> : vector<8x128xf32>
    %14 = tpu.matmul %12, %13, %cst_8 {dimension_numbers = #tpu.dot_dimension_numbers<[1], [0], [0], [1], [0, 0, 1, 1], [], []>} : vector<8x512xbf16>, vector<512x128xbf16>, vector<8x128xf32> -> vector<8x128xf32>
    %c0_9 = arith.constant 0 : index
    %c0_10 = arith.constant 0 : index
    %15 = vector.load %arg5[%c0_9, %c0_10] : memref<1x128xf32, #tpu.memory_space<vmem>>, vector<1x128xf32>
    %16 = vector.broadcast %15 : vector<1x128xf32> to vector<8x128xf32>
    %17 = arith.addf %14, %16 : vector<8x128xf32>
    %c0_11 = arith.constant 0 : index
    %c0_12 = arith.constant 0 : index
    %18 = vector.load %arg6[%c0_11, %c0_12] : memref<8x128xf32, #tpu.memory_space<vmem>>, vector<8x128xf32>
    tpu.vector_store %arg6[%c0_11, %c0_12], %17 {strides = array<i32>} : memref<8x128xf32, #tpu.memory_space<vmem>>, vector<8x128xf32>,
    return
  }
  func.func @transform_0(%arg0: i32) -> (i32, i32) {
    %c0_i32 = arith.constant 0 : i32
    %c0_i32_0 = arith.constant 0 : i32
    return %arg0, %c0_i32 : i32, i32
  }
  func.func @transform_1(%arg0: i32) -> (i32, i32) {
    %c0_i32 = arith.constant 0 : i32
    %c0_i32_0 = arith.constant 0 : i32
    %c0_i32_1 = arith.constant 0 : i32
    return %c0_i32, %c0_i32_0 : i32, i32
  }
  func.func @transform_2(%arg0: i32) -> (i32, i32) {
    %c0_i32 = arith.constant 0 : i32
    %c0_i32_0 = arith.constant 0 : i32
    %c0_i32_1 = arith.constant 0 : i32
    return %c0_i32, %c0_i32_0 : i32, i32
  }
  func.func @transform_3(%arg0: i32) -> (i32, i32) {
    %c0_i32 = arith.constant 0 : i32
    %c0_i32_0 = arith.constant 0 : i32
    %c0_i32_1 = arith.constant 0 : i32
    return %c0_i32, %c0_i32_0 : i32, i32
  }
  func.func @transform_4(%arg0: i32) -> (i32, i32) {
    %c0_i32 = arith.constant 0 : i32
    %c0_i32_0 = arith.constant 0 : i32
    %c0_i32_1 = arith.constant 0 : i32
    return %c0_i32, %c0_i32_0 : i32, i32
  }
  func.func @transform_5(%arg0: i32) -> (i32, i32) {
    %c0_i32 = arith.constant 0 : i32
    %c0_i32_0 = arith.constant 0 : i32
    return %arg0, %c0_i32 : i32, i32
  }
}

</mosaic_0001>

<bundles_post_ra>
// kernel: mlp_forward.1
= control target key start
LH: loop header
LB: loop body
LE: loop exit
PB: predicated region body
PF: predicated region fallthrough
CT: control target
= control target key end

     0   :  { %10 = vsyncpa [#allocation3], 0  ;;  %s8570_s0 = inlined_call_operand.vmem [shape: f32[8,3072], index: 0, kind: input, shape index: {}]   ;;  %s8571_s1 = inlined_call_operand.hbm [shape: bf16[3072,512], index: 1, kind: input, shape index: {}]   ;;  %s8572_s2 = inlined_call_operand.hbm [shape: f32[1,512], index: 2, kind: input, shape index: {}]   ;;  %s8573_s3 = inlined_call_operand.hbm [shape: bf16[512,128], index: 3, kind: input, shape index: {}]   ;;  %s8574_s4 = inlined_call_operand.hbm [shape: f32[1,128], index: 4, kind: input, shape index: {}]   ;;  %s8575_s5 = inlined_call_operand.hbm [shape: f32[8,128], index: 5, kind: output, shape index: {}]  }
   0x1   :  { %11 = vsyncpa [#allocation6], 0 }
   0x2   :  { %12 = vsyncpa [#allocation9], 0 }
   0x3   :  { %13 = vsyncpa [#allocation4], 0  ;;  %s8392_s18 = smov [#allocation5]   ;;  %s8393_s20 = smov [#allocation2]  }
   0x4   :  { %s34_s19 = sshll.u32 %s8392_s18, 4  ;;  %s21_s21 = sshll.u32 %s8393_s20, 4  ;;  %s35_s19 = int_to_ptr.vmem [resolvable:$true] %s34_s19  ;;  %s8431_s21 = int_to_ptr.vmem [resolvable:$true] %s21_s21 }
   0x5   :  { %s8274_s24 = scalar_lea.hbm %s8572_s2, 64 }
   0x6   :  { %p8275_p0 = scmp.ne.s32.totalorder %s8572_s2, %s8274_s24  ;;  %p8278_p1 = scmp.lt.u32.totalorder %s8274_s24, %s8572_s2 }
   0x8   :  { %p8280_p2 = pnand %p8278_p1, %p8275_p0 }
   0xa   :  { %8283 = shalt.err (!%p8280_p2)
}
   0xb   :  { %s8284_s29 = scalar_lea.vmem %s35_s19, 64  ;;  %p8289_p4 = scmp.lt.s32.totalorder %s35_s19, %s35_s19 }
   0xc   :  { %p8285_p3 = scmp.ne.s32.totalorder %s35_s19, %s8284_s29  ;;  %p8290_p5 = scmp.lt.s32.totalorder %s8284_s29, %s8284_s29 }
   0xe   :  { %p8291_p6 = por %p8290_p5, %p8289_p4 }
  0x10   :  { %p8292_p7 = pnand %p8291_p6, %p8285_p3 }
  0x12   :  { %8295 = shalt.err (!%p8292_p7)
}
  0x13   :  { %37 = dma.hbm_to_vmem [thread:$0]  %s8572_s2, 64, %s35_s19, [#allocation6]  }
  0x14   :  { %s8296_s9 = scalar_lea.hbm %s8571_s1, 98304 }
  0x15   :  { %p8297_p8 = scmp.ne.s32.totalorder %s8571_s1, %s8296_s9  ;;  %p8300_p9 = scmp.lt.u32.totalorder %s8296_s9, %s8571_s1 }
  0x17   :  { %p8302_p10 = pnand %p8300_p9, %p8297_p8 }
  0x19   :  { %8305 = shalt.err (!%p8302_p10)
}
  0x1a   :  { %s8306_s14 = scalar_lea.vmem %s8431_s21, 98304  ;;  %p8311_p12 = scmp.lt.s32.totalorder %s8431_s21, %s8431_s21 }
  0x1b   :  { %p8307_p11 = scmp.ne.s32.totalorder %s8431_s21, %s8306_s14  ;;  %p8312_p13 = scmp.lt.s32.totalorder %s8306_s14, %s8306_s14 }
  0x1d   :  { %p8313_p0 = por %p8312_p13, %p8311_p12 }
  0x1f   :  { %p8314_p1 = pnand %p8313_p0, %p8307_p11 }
  0x21   :  { %8317 = shalt.err (!%p8314_p1)
}
  0x22   :  { %s8394_s2 = smov 256   ;;  %s8395_s15 = smov 16  }
  0x23   :  { %27 = dma.hbm_to_vmem [thread:$0]  %s8571_s1, 98304, %s8431_s21, [#allocation3], %s8394_s2, %s8394_s2, %s8395_s15  }
  0x24   :  { %s8396_s18 = smov [#allocation7]   ;;  %s8318_s23 = scalar_lea.hbm %s8573_s3, 4096 }
  0x25   :  { %s43_s19 = sshll.u32 %s8396_s18, 4  ;;  %p8319_p2 = scmp.ne.s32.totalorder %s8573_s3, %s8318_s23  ;;  %s44_s19 = int_to_ptr.vmem [resolvable:$true] %s43_s19 }
  0x26   :  { %p8322_p3 = scmp.lt.u32.totalorder %s8318_s23, %s8573_s3 }
  0x28   :  { %p8324_p4 = pnand %p8322_p3, %p8319_p2 }
  0x2a   :  { %8327 = shalt.err (!%p8324_p4)
}
  0x2b   :  { %s8328_s28 = scalar_lea.vmem %s44_s19, 4096  ;;  %p8333_p6 = scmp.lt.s32.totalorder %s44_s19, %s44_s19 }
  0x2c   :  { %p8329_p5 = scmp.ne.s32.totalorder %s44_s19, %s8328_s28  ;;  %p8334_p7 = scmp.lt.s32.totalorder %s8328_s28, %s8328_s28 }
  0x2e   :  { %p8335_p8 = por %p8334_p7, %p8333_p6 }
  0x30   :  { %p8336_p9 = pnand %p8335_p8, %p8329_p5 }
  0x32   :  { %8339 = shalt.err (!%p8336_p9)
}
  0x33   :  { %s8397_s1 = smov 64   ;;  %s8398_s21 = smov 4  }
  0x34   :  { %49 = dma.hbm_to_vmem [thread:$0]  %s8573_s3, 4096, %s44_s19, [#allocation6], %s8397_s1, %s8397_s1, %s8398_s21  }
  0x35   :  { %s8399_s6 = smov [#allocation8]   ;;  %s8340_s10 = scalar_lea.hbm %s8574_s4, 16 }
  0x36   :  { %s56_s7 = sshll.u32 %s8399_s6, 4  ;;  %p8341_p10 = scmp.ne.s32.totalorder %s8574_s4, %s8340_s10  ;;  %s57_s7 = int_to_ptr.vmem [resolvable:$true] %s56_s7 }
  0x37   :  { %p8344_p11 = scmp.lt.u32.totalorder %s8340_s10, %s8574_s4 }
  0x39   :  { %p8346_p12 = pnand %p8344_p11, %p8341_p10 }
  0x3b   :  { %8349 = shalt.err (!%p8346_p12)
}
  0x3c   :  { %s8350_s2 = scalar_lea.vmem %s57_s7, 16  ;;  %s8354_s3 = scalar_lea.vmem %s57_s7, 32 }
  0x3d   :  { %p8351_p13 = scmp.ne.s32.totalorder %s57_s7, %s8350_s2  ;;  %p8355_p0 = scmp.lt.s32.totalorder %s57_s7, %s57_s7 }
  0x3e   :  { %p8356_p1 = scmp.lt.s32.totalorder %s8354_s3, %s8350_s2 }
  0x40   :  { %p8357_p2 = por %p8356_p1, %p8355_p0 }
  0x42   :  { %p8358_p3 = pnand %p8357_p2, %p8351_p13 }
  0x44   :  { %8361 = shalt.err (!%p8358_p3)
}
  0x45   :  { %59 = dma.hbm_to_vmem [thread:$0]  %s8574_s4, 16, %s57_s7, [#allocation9]  }
  0x46   :  { %8384 = dma.done.wait [#allocation3], 98304  }
  0x47   :  { %8385 = vsyncadd [#allocation3], 4294868992 }
  0x48   :  { %8386 = dma.done.wait [#allocation6], 4160  }
  0x49   :  { %8387 = vsyncadd [#allocation6], 4294963136 }
  0x4a   :  { %8388 = dma.done.wait [#allocation9], 16  }
  0x4b   :  { %8389 = vsyncadd [#allocation9], 4294967280  ;;  %v7074_v0 = vld [vmem:[#allocation2 + $0x4] ss:$16 sps:$4 sm:$0xff]   ;;  %v7076_v1 = vld [vmem:[#allocation2 + $0xc] ss:$16 sps:$4 sm:$0xff]  }
  0x4c   :  { %4751 = vmatprep.subr.bf16.mxu0 %v7074_v0  ;;  %v7078_v2 = vld [vmem:[#allocation2] ss:$16 sps:$4 sm:$0xff]   ;;  %v7079_v3 = vld [vmem:[#allocation2 + $0x8] ss:$16 sps:$4 sm:$0xff]   ;;  %5243 = vmatprep.subr.bf16.mxu1 %v7076_v1  ;;  %v7080_v4 = vld [vmem:[#allocation2 + $0x24] ss:$16 sps:$4 sm:$0xff]  }
  0x4d   :  { %4752 = vmatpush1.bf16.msra.mxu0 %v7078_v2  ;;  %5244 = vmatpush1.bf16.msra.mxu1 %v7079_v3  ;;  %v7082_v5 = vld [vmem:[#allocation2 + $0x2c] ss:$16 sps:$4 sm:$0xff]   ;;  %v7084_v6 = vld [vmem:[#allocation2 + $0x20] ss:$16 sps:$4 sm:$0xff]   ;;  %v7085_v7 = vld [vmem:[#allocation2 + $0x28] ss:$16 sps:$4 sm:$0xff]  }
  0x4e   :  { %4753 = vmatprep.subr.bf16.mxu0 %v7080_v4  ;;  %5245 = vmatprep.subr.bf16.mxu1 %v7082_v5  ;;  %v7086_v8 = vld [vmem:[#allocation2 + $0x44] ss:$16 sps:$4 sm:$0xff]   ;;  %v7088_v9 = vld [vmem:[#allocation2 + $0x4c] ss:$16 sps:$4 sm:$0xff]   ;;  %v7090_v10 = vld [vmem:[#allocation2 + $0x40] ss:$16 sps:$4 sm:$0xff]  }
  0x4f   :  { %v7091_v11 = vld [vmem:[#allocation2 + $0x48] ss:$16 sps:$4 sm:$0xff]   ;;  %v7092_v12 = vld [vmem:[#allocation2 + $0x64] ss:$16 sps:$4 sm:$0xff]   ;;  %v7094_v13 = vld [vmem:[#allocation2 + $0x6c] ss:$16 sps:$4 sm:$0xff]  }
  0x50   :  { %v7096_v14 = vld [vmem:[#allocation2 + $0x60] ss:$16 sps:$4 sm:$0xff]   ;;  %v7097_v15 = vld [vmem:[#allocation2 + $0x68] ss:$16 sps:$4 sm:$0xff]   ;;  %v7098_v16 = vld [vmem:[#allocation2 + $0x84] ss:$16 sps:$4 sm:$0xff]  }
  0x51   :  { %4754 = vmatpush1.bf16.msra.mxu0 %v7084_v6  ;;  %5246 = vmatpush1.bf16.msra.mxu1 %v7085_v7  ;;  %v7100_v17 = vld [vmem:[#allocation2 + $0x8c] ss:$16 sps:$4 sm:$0xff]   ;;  %v7102_v18 = vld [vmem:[#allocation2 + $0x80] ss:$16 sps:$4 sm:$0xff]   ;;  %v7103_v19 = vld [vmem:[#allocation2 + $0x88] ss:$16 sps:$4 sm:$0xff]  }
  0x52   :  { %4755 = vmatprep.subr.bf16.mxu0 %v7086_v8  ;;  %5247 = vmatprep.subr.bf16.mxu1 %v7088_v9  ;;  %v7104_v20 = vld [vmem:[#allocation2 + $0xa4] ss:$16 sps:$4 sm:$0xff]   ;;  %v7106_v21 = vld [vmem:[#allocation2 + $0xac] ss:$16 sps:$4 sm:$0xff]   ;;  %v7108_v22 = vld [vmem:[#allocation2 + $0xa0] ss:$16 sps:$4 sm:$0xff]  }
  0x53   :  { %v7109_v23 = vld [vmem:[#allocation2 + $0xa8] ss:$16 sps:$4 sm:$0xff]   ;;  %v7110_v24 = vld [vmem:[#allocation2 + $0xc4] ss:$16 sps:$4 sm:$0xff]   ;;  %v7112_v25 = vld [vmem:[#allocation2 + $0xcc] ss:$16 sps:$4 sm:$0xff]  }
  0x54   :  { %v7114_v26 = vld [vmem:[#allocation2 + $0xc0] ss:$16 sps:$4 sm:$0xff]   ;;  %v7115_v27 = vld [vmem:[#allocation2 + $0xc8] ss:$16 sps:$4 sm:$0xff]   ;;  %v7116_v28 = vld [vmem:[#allocation2 + $0xe4] ss:$16 sps:$4 sm:$0xff]  }
  0x55   :  { %4756 = vmatpush1.bf16.msra.mxu0 %v7090_v10  ;;  %5248 = vmatpush1.bf16.msra.mxu1 %v7091_v11  ;;  %v7118_v29 = vld [vmem:[#allocation2 + $0xec] ss:$16 sps:$4 sm:$0xff]   ;;  %v7120_v30 = vld [vmem:[#allocation2 + $0xe0] ss:$16 sps:$4 sm:$0xff]   ;;  %v7121_v31 = vld [vmem:[#allocation2 + $0xe8] ss:$16 sps:$4 sm:$0xff]  }
  0x56   :  { %4757 = vmatprep.subr.bf16.mxu0 %v7092_v12  ;;  %5249 = vmatprep.subr.bf16.mxu1 %v7094_v13  ;;  %v7122_v32 = vld [vmem:[#allocation2 + $0x104] ss:$16 sps:$4 sm:$0xff]   ;;  %v7124_v33 = vld [vmem:[#allocation2 + $0x10c] ss:$16 sps:$4 sm:$0xff]   ;;  %v7126_v34 = vld [vmem:[#allocation2 + $0x100] ss:$16 sps:$4 sm:$0xff]  }
  0x57   :  { %v7127_v35 = vld [vmem:[#allocation2 + $0x108] ss:$16 sps:$4 sm:$0xff]   ;;  %v7128_v36 = vld [vmem:[#allocation2 + $0x124] ss:$16 sps:$4 sm:$0xff]   ;;  %v7130_v37 = vld [vmem:[#allocation2 + $0x12c] ss:$16 sps:$4 sm:$0xff]  }
  0x58   :  { %v7132_v38 = vld [vmem:[#allocation2 + $0x120] ss:$16 sps:$4 sm:$0xff]   ;;  %v7133_v39 = vld [vmem:[#allocation2 + $0x128] ss:$16 sps:$4 sm:$0xff]   ;;  %v7134_v40 = vld [vmem:[#allocation2 + $0x144] ss:$16 sps:$4 sm:$0xff]  }
  0x59   :  { %4758 = vmatpush1.bf16.msra.mxu0 %v7096_v14  ;;  %5250 = vmatpush1.bf16.msra.mxu1 %v7097_v15  ;;  %v7136_v41 = vld [vmem:[#allocation2 + $0x14c] ss:$16 sps:$4 sm:$0xff]   ;;  %v7138_v42 = vld [vmem:[#allocation2 + $0x140] ss:$16 sps:$4 sm:$0xff]   ;;  %v7139_v43 = vld [vmem:[#allocation2 + $0x148] ss:$16 sps:$4 sm:$0xff]  }
  0x5a   :  { %4759 = vmatprep.subr.bf16.mxu0 %v7098_v16  ;;  %5251 = vmatprep.subr.bf16.mxu1 %v7100_v17  ;;  %v7140_v44 = vld [vmem:[#allocation2 + $0x164] ss:$16 sps:$4 sm:$0xff]   ;;  %v7142_v45 = vld [vmem:[#allocation2 + $0x16c] ss:$16 sps:$4 sm:$0xff]   ;;  %v7144_v47 = vld [vmem:[#allocation2 + $0x160] ss:$16 sps:$4 sm:$0xff]  }
  0x5b   :  { %v74_v46 = vld [vmem:[%s8570_s0 + $0x8] sm:$0xff]  ;;  %v7146_v50 = vld [vmem:[#allocation2 + $0x184] ss:$16 sps:$4 sm:$0xff]   ;;  %v7150_v52 = vld [vmem:[#allocation2 + $0x180] ss:$16 sps:$4 sm:$0xff]  }
  0x5c   :  { %v98_v48 = vpack.c.bf16 %v74_v46, %v74_v46  ;;  %v7145_v49 = vld [vmem:[#allocation2 + $0x168] ss:$16 sps:$4 sm:$0xff]   ;;  %v7148_v51 = vld [vmem:[#allocation2 + $0x18c] ss:$16 sps:$4 sm:$0xff]   ;;  %v7152_v54 = vld [vmem:[#allocation2 + $0x1a4] ss:$16 sps:$4 sm:$0xff]  }
  0x5d   :  { %4760 = vmatpush1.bf16.msra.mxu0 %v7102_v18  ;;  %5252 = vmatpush1.bf16.msra.mxu1 %v7103_v19  ;;  %v7151_v53 = vld [vmem:[#allocation2 + $0x188] ss:$16 sps:$4 sm:$0xff]   ;;  %v7154_v55 = vld [vmem:[#allocation2 + $0x1ac] ss:$16 sps:$4 sm:$0xff]   ;;  %v7156_v56 = vld [vmem:[#allocation2 + $0x1a0] ss:$16 sps:$4 sm:$0xff]  }
  0x5e   :  { %4761 = vmatprep.subr.bf16.mxu0 %v7104_v20  ;;  %5253 = vmatprep.subr.bf16.mxu1 %v7106_v21  ;;  %v7157_v57 = vld [vmem:[#allocation2 + $0x1a8] ss:$16 sps:$4 sm:$0xff]   ;;  %v7158_v58 = vld [vmem:[#allocation2 + $0x1c4] ss:$16 sps:$4 sm:$0xff]   ;;  %v7160_v59 = vld [vmem:[#allocation2 + $0x1cc] ss:$16 sps:$4 sm:$0xff]  }
  0x5f   :  { %4783 = vmatprep.mubr.bf16.mxu0 %v98_v48  ;;  %5275 = vmatprep.mubr.bf16.mxu1 %v98_v48  ;;  %v7162_v60 = vld [vmem:[#allocation2 + $0x1c0] ss:$16 sps:$4 sm:$0xff]   ;;  %v7163_v61 = vld [vmem:[#allocation2 + $0x1c8] ss:$16 sps:$4 sm:$0xff]   ;;  %v7164_v62 = vld [vmem:[#allocation2 + $0x1e4] ss:$16 sps:$4 sm:$0xff]  }
  0x60   :  { %v7166_v63 = vld [vmem:[#allocation2 + $0x1ec] ss:$16 sps:$4 sm:$0xff]   ;;  %v7168_v0 = vld [vmem:[#allocation2 + $0x1e0] ss:$16 sps:$4 sm:$0xff]   ;;  %v7169_v1 = vld [vmem:[#allocation2 + $0x1e8] ss:$16 sps:$4 sm:$0xff]  }
  0x61   :  { %4762 = vmatpush1.bf16.msra.mxu0 %v7108_v22  ;;  %5254 = vmatpush1.bf16.msra.mxu1 %v7109_v23  ;;  %v73_v2 = vld [vmem:[%s8570_s0] sm:$0xff]  ;;  %v7175_v4 = vld [vmem:[#allocation2 + $0x20c] ss:$16 sps:$4 sm:$0xff]   ;;  %v7173_v7 = vld [vmem:[#allocation2 + $0x208] ss:$16 sps:$4 sm:$0xff]  }
  0x62   :  { %4763 = vmatprep.subr.bf16.mxu0 %v7110_v24  ;;  %5255 = vmatprep.subr.bf16.mxu1 %v7112_v25  ;;  %v7172_v3 = vld [vmem:[#allocation2 + $0x204] ss:$16 sps:$4 sm:$0xff]   ;;  %v97_v5 = vpack.c.bf16 %v73_v2, %v73_v2  ;;  %v7170_v6 = vld [vmem:[#allocation2 + $0x200] ss:$16 sps:$4 sm:$0xff]   ;;  %v7181_v9 = vld [vmem:[#allocation2 + $0x22c] ss:$16 sps:$4 sm:$0xff]  }
  0x63   :  { %v7178_v8 = vld [vmem:[#allocation2 + $0x224] ss:$16 sps:$4 sm:$0xff]   ;;  %v7176_v10 = vld [vmem:[#allocation2 + $0x220] ss:$16 sps:$4 sm:$0xff]   ;;  %v7179_v11 = vld [vmem:[#allocation2 + $0x228] ss:$16 sps:$4 sm:$0xff]  }
  0x64   :  { %v7184_v12 = vld [vmem:[#allocation2 + $0x244] ss:$16 sps:$4 sm:$0xff]   ;;  %v7187_v13 = vld [vmem:[#allocation2 + $0x24c] ss:$16 sps:$4 sm:$0xff]   ;;  %v7182_v14 = vld [vmem:[#allocation2 + $0x240] ss:$16 sps:$4 sm:$0xff]  }
  0x65   :  { %4764 = vmatpush1.bf16.msra.mxu0 %v7114_v26  ;;  %5256 = vmatpush1.bf16.msra.mxu1 %v7115_v27  ;;  %v7185_v15 = vld [vmem:[#allocation2 + $0x248] ss:$16 sps:$4 sm:$0xff]   ;;  %v7190_v16 = vld [vmem:[#allocation2 + $0x264] ss:$16 sps:$4 sm:$0xff]   ;;  %v7193_v17 = vld [vmem:[#allocation2 + $0x26c] ss:$16 sps:$4 sm:$0xff]  }
  0x66   :  { %4765 = vmatprep.subr.bf16.mxu0 %v7116_v28  ;;  %5257 = vmatprep.subr.bf16.mxu1 %v7118_v29  ;;  %v7188_v18 = vld [vmem:[#allocation2 + $0x260] ss:$16 sps:$4 sm:$0xff]   ;;  %v7191_v19 = vld [vmem:[#allocation2 + $0x268] ss:$16 sps:$4 sm:$0xff]   ;;  %v7196_v20 = vld [vmem:[#allocation2 + $0x284] ss:$16 sps:$4 sm:$0xff]  }
  0x67   :  { %v7199_v21 = vld [vmem:[#allocation2 + $0x28c] ss:$16 sps:$4 sm:$0xff]   ;;  %v7194_v22 = vld [vmem:[#allocation2 + $0x280] ss:$16 sps:$4 sm:$0xff]   ;;  %v7197_v23 = vld [vmem:[#allocation2 + $0x288] ss:$16 sps:$4 sm:$0xff]  }
  0x68   :  { %v7202_v24 = vld [vmem:[#allocation2 + $0x2a4] ss:$16 sps:$4 sm:$0xff]   ;;  %v7205_v25 = vld [vmem:[#allocation2 + $0x2ac] ss:$16 sps:$4 sm:$0xff]   ;;  %v7200_v26 = vld [vmem:[#allocation2 + $0x2a0] ss:$16 sps:$4 sm:$0xff]  }
  0x69   :  { %4766 = vmatpush1.bf16.msra.mxu0 %v7120_v30  ;;  %5258 = vmatpush1.bf16.msra.mxu1 %v7121_v31  ;;  %v7203_v27 = vld [vmem:[#allocation2 + $0x2a8] ss:$16 sps:$4 sm:$0xff]   ;;  %v7208_v28 = vld [vmem:[#allocation2 + $0x2c4] ss:$16 sps:$4 sm:$0xff]   ;;  %v7211_v29 = vld [vmem:[#allocation2 + $0x2cc] ss:$16 sps:$4 sm:$0xff]  }
  0x6a   :  { %4767 = vmatprep.subr.bf16.mxu0 %v7122_v32  ;;  %5259 = vmatprep.subr.bf16.mxu1 %v7124_v33  ;;  %v76_v30 = vld [vmem:[%s8570_s0 + $0x18] sm:$0xff]  ;;  %v7206_v31 = vld [vmem:[#allocation2 + $0x2c0] ss:$16 sps:$4 sm:$0xff]   ;;  %v7232_v46 = vld [vmem:[#allocation2 + $0x344] ss:$16 sps:$4 sm:$0xff]  }
  0x6b   :  { %v100_v32 = vpack.c.bf16 %v76_v30, %v76_v30  ;;  %v7209_v33 = vld [vmem:[#allocation2 + $0x2c8] ss:$16 sps:$4 sm:$0xff]   ;;  %v7230_v48 = vld [vmem:[#allocation2 + $0x340] ss:$16 sps:$4 sm:$0xff]   ;;  %v7262_v2 = vld [vmem:[#allocation2 + $0x3e4] ss:$16 sps:$4 sm:$0xff]  }
  0x6c   :  { %v7298_v30 = vld [vmem:[#allocation2 + $0x4a4] ss:$16 sps:$4 sm:$0xff]  }
  0x6d   :  { %4768 = vmatpush1.bf16.msra.mxu0 %v7126_v34  ;;  %5260 = vmatpush1.bf16.msra.mxu1 %v7127_v35  ;;  %v7214_v34 = vld [vmem:[#allocation2 + $0x2e4] ss:$16 sps:$4 sm:$0xff]   ;;  %v7217_v35 = vld [vmem:[#allocation2 + $0x2ec] ss:$16 sps:$4 sm:$0xff]  }
  0x6e   :  { %4769 = vmatprep.subr.bf16.mxu0 %v7128_v36  ;;  %5261 = vmatprep.subr.bf16.mxu1 %v7130_v37  ;;  %v7212_v36 = vld [vmem:[#allocation2 + $0x2e0] ss:$16 sps:$4 sm:$0xff]   ;;  %v7215_v37 = vld [vmem:[#allocation2 + $0x2e8] ss:$16 sps:$4 sm:$0xff]  }
  0x71   :  { %4770 = vmatpush1.bf16.msra.mxu0 %v7132_v38  ;;  %5262 = vmatpush1.bf16.msra.mxu1 %v7133_v39  ;;  %v7220_v38 = vld [vmem:[#allocation2 + $0x304] ss:$16 sps:$4 sm:$0xff]   ;;  %v7223_v39 = vld [vmem:[#allocation2 + $0x30c] ss:$16 sps:$4 sm:$0xff]  }
  0x72   :  { %4771 = vmatprep.subr.bf16.mxu0 %v7134_v40  ;;  %5263 = vmatprep.subr.bf16.mxu1 %v7136_v41  ;;  %v7218_v40 = vld [vmem:[#allocation2 + $0x300] ss:$16 sps:$4 sm:$0xff]   ;;  %v7221_v41 = vld [vmem:[#allocation2 + $0x308] ss:$16 sps:$4 sm:$0xff]  }
  0x75   :  { %4772 = vmatpush1.bf16.msra.mxu0 %v7138_v42  ;;  %5264 = vmatpush1.bf16.msra.mxu1 %v7139_v43  ;;  %v7226_v42 = vld [vmem:[#allocation2 + $0x324] ss:$16 sps:$4 sm:$0xff]   ;;  %v7229_v43 = vld [vmem:[#allocation2 + $0x32c] ss:$16 sps:$4 sm:$0xff]  }
  0x76   :  { %4773 = vmatprep.subr.bf16.mxu0 %v7140_v44  ;;  %5265 = vmatprep.subr.bf16.mxu1 %v7142_v45  ;;  %v7224_v44 = vld [vmem:[#allocation2 + $0x320] ss:$16 sps:$4 sm:$0xff]   ;;  %v7227_v45 = vld [vmem:[#allocation2 + $0x328] ss:$16 sps:$4 sm:$0xff]  }
  0x79   :  { %4774 = vmatpush1.bf16.msra.mxu0 %v7144_v47  ;;  %5266 = vmatpush1.bf16.msra.mxu1 %v7145_v49  ;;  %v7235_v47 = vld [vmem:[#allocation2 + $0x34c] ss:$16 sps:$4 sm:$0xff]   ;;  %v7233_v49 = vld [vmem:[#allocation2 + $0x348] ss:$16 sps:$4 sm:$0xff]  }
  0x7a   :  { %4775 = vmatprep.subr.bf16.mxu0 %v7146_v50  ;;  %5267 = vmatprep.subr.bf16.mxu1 %v7148_v51  ;;  %v7238_v50 = vld [vmem:[#allocation2 + $0x364] ss:$16 sps:$4 sm:$0xff]   ;;  %v7241_v51 = vld [vmem:[#allocation2 + $0x36c] ss:$16 sps:$4 sm:$0xff]  }
  0x7d   :  { %4776 = vmatpush1.bf16.msra.mxu0 %v7150_v52  ;;  %5268 = vmatpush1.bf16.msra.mxu1 %v7151_v53  ;;  %v7236_v52 = vld [vmem:[#allocation2 + $0x360] ss:$16 sps:$4 sm:$0xff]   ;;  %v7239_v53 = vld [vmem:[#allocation2 + $0x368] ss:$16 sps:$4 sm:$0xff]  }
  0x7e   :  { %4777 = vmatprep.subr.bf16.mxu0 %v7152_v54  ;;  %5269 = vmatprep.subr.bf16.mxu1 %v7154_v55  ;;  %v7244_v54 = vld [vmem:[#allocation2 + $0x384] ss:$16 sps:$4 sm:$0xff]   ;;  %v7247_v55 = vld [vmem:[#allocation2 + $0x38c] ss:$16 sps:$4 sm:$0xff]  }
  0x81   :  { %4778 = vmatpush1.bf16.msra.mxu0 %v7156_v56  ;;  %5270 = vmatpush1.bf16.msra.mxu1 %v7157_v57  ;;  %v7242_v56 = vld [vmem:[#allocation2 + $0x380] ss:$16 sps:$4 sm:$0xff]   ;;  %v7245_v57 = vld [vmem:[#allocation2 + $0x388] ss:$16 sps:$4 sm:$0xff]  }
  0x82   :  { %4779 = vmatprep.subr.bf16.mxu0 %v7158_v58  ;;  %5271 = vmatprep.subr.bf16.mxu1 %v7160_v59  ;;  %v7250_v58 = vld [vmem:[#allocation2 + $0x3a4] ss:$16 sps:$4 sm:$0xff]   ;;  %v7253_v59 = vld [vmem:[#allocation2 + $0x3ac] ss:$16 sps:$4 sm:$0xff]  }
  0x85   :  { %4780 = vmatpush1.bf16.msra.mxu0 %v7162_v60  ;;  %5272 = vmatpush1.bf16.msra.mxu1 %v7163_v61  ;;  %v7248_v60 = vld [vmem:[#allocation2 + $0x3a0] ss:$16 sps:$4 sm:$0xff]   ;;  %v7251_v61 = vld [vmem:[#allocation2 + $0x3a8] ss:$16 sps:$4 sm:$0xff]  }
  0x86   :  { %4781 = vmatprep.subr.bf16.mxu0 %v7164_v62  ;;  %5273 = vmatprep.subr.bf16.mxu1 %v7166_v63  ;;  %v7256_v62 = vld [vmem:[#allocation2 + $0x3c4] ss:$16 sps:$4 sm:$0xff]   ;;  %v7259_v63 = vld [vmem:[#allocation2 + $0x3cc] ss:$16 sps:$4 sm:$0xff]  }
  0x89   :  { %4782 = vmatpush1.bf16.msra.mxu0 %v7168_v0  ;;  %5274 = vmatpush1.bf16.msra.mxu1 %v7169_v1  ;;  %v7254_v0 = vld [vmem:[#allocation2 + $0x3c0] ss:$16 sps:$4 sm:$0xff]   ;;  %v7257_v1 = vld [vmem:[#allocation2 + $0x3c8] ss:$16 sps:$4 sm:$0xff]  }
  0x8a   :  { %4792 = vmatprep.subr.bf16.mxu0 %v7172_v3  ;;  %5284 = vmatprep.subr.bf16.mxu1 %v7175_v4  ;;  %v7265_v3 = vld [vmem:[#allocation2 + $0x3ec] ss:$16 sps:$4 sm:$0xff]   ;;  %v7260_v4 = vld [vmem:[#allocation2 + $0x3e0] ss:$16 sps:$4 sm:$0xff]  }
  0x8c   :  { %4784 = vmatmul.mubr.bf16.vlgmr.msra.gmra.mrb[0].mxu0 %v97_v5  ;;  %5276 = vmatmul.mubr.bf16.vlgmr.msra.gmra.mrb[0].mxu1 %v97_v5  ;;  %v7263_v5 = vld [vmem:[#allocation2 + $0x3e8] ss:$16 sps:$4 sm:$0xff]  }
  0x8d   :  { %4793 = vmatpush1.bf16.msra.mxu0 %v7170_v6  ;;  %5285 = vmatpush1.bf16.msra.mxu1 %v7173_v7  ;;  %v7268_v6 = vld [vmem:[#allocation2 + $0x404] ss:$16 sps:$4 sm:$0xff]  }
  0x8e   :  { %4794 = vmatprep.subr.bf16.mxu0 %v7178_v8  ;;  %5286 = vmatprep.subr.bf16.mxu1 %v7181_v9  ;;  %v75_v7 = vld [vmem:[%s8570_s0 + $0x10] sm:$0xff]  ;;  %v7271_v8 = vld [vmem:[#allocation2 + $0x40c] ss:$16 sps:$4 sm:$0xff]  }
  0x8f   :  { %4824 = vmatprep.mubr.bf16.mxu0 %v100_v32  ;;  %5316 = vmatprep.mubr.bf16.mxu1 %v100_v32  ;;  %v7266_v9 = vld [vmem:[#allocation2 + $0x400] ss:$16 sps:$4 sm:$0xff]  }
  0x90   :  { %v7296_v32 = vld [vmem:[#allocation2 + $0x4a0] ss:$16 sps:$4 sm:$0xff]  }
  0x91   :  { %4795 = vmatpush1.bf16.msra.mxu0 %v7176_v10  ;;  %5287 = vmatpush1.bf16.msra.mxu1 %v7179_v11  ;;  %v7269_v10 = vld [vmem:[#allocation2 + $0x408] ss:$16 sps:$4 sm:$0xff]   ;;  %v99_v11 = vpack.c.bf16 %v75_v7, %v75_v7  ;;  %v7361_v7 = vld [vmem:[#allocation2 + $0x5ec] ss:$16 sps:$4 sm:$0xff]  }
  0x92   :  { %4796 = vmatprep.subr.bf16.mxu0 %v7184_v12  ;;  %5288 = vmatprep.subr.bf16.mxu1 %v7187_v13  ;;  %v7274_v12 = vld [vmem:[#allocation2 + $0x424] ss:$16 sps:$4 sm:$0xff]   ;;  %v7277_v13 = vld [vmem:[#allocation2 + $0x42c] ss:$16 sps:$4 sm:$0xff]  }
  0x95   :  { %4797 = vmatpush1.bf16.msra.mxu0 %v7182_v14  ;;  %5289 = vmatpush1.bf16.msra.mxu1 %v7185_v15  ;;  %v78_v14 = vld [vmem:[%s8570_s0 + $0x28] sm:$0xff] }
  0x96   :  { %4798 = vmatprep.subr.bf16.mxu0 %v7190_v16  ;;  %5290 = vmatprep.subr.bf16.mxu1 %v7193_v17  ;;  %v102_v15 = vpack.c.bf16 %v78_v14, %v78_v14  ;;  %v7272_v16 = vld [vmem:[#allocation2 + $0x420] ss:$16 sps:$4 sm:$0xff]   ;;  %v7275_v17 = vld [vmem:[#allocation2 + $0x428] ss:$16 sps:$4 sm:$0xff]  }
  0x97   :  { %v7365_v14 = vld [vmem:[#allocation2 + $0x608] ss:$16 sps:$4 sm:$0xff]  }
  0x99   :  { %4799 = vmatpush1.bf16.msra.mxu0 %v7188_v18  ;;  %5291 = vmatpush1.bf16.msra.mxu1 %v7191_v19  ;;  %v7280_v18 = vld [vmem:[#allocation2 + $0x444] ss:$16 sps:$4 sm:$0xff]   ;;  %v7283_v19 = vld [vmem:[#allocation2 + $0x44c] ss:$16 sps:$4 sm:$0xff]  }
  0x9a   :  { %4800 = vmatprep.subr.bf16.mxu0 %v7196_v20  ;;  %5292 = vmatprep.subr.bf16.mxu1 %v7199_v21  ;;  %v7278_v20 = vld [vmem:[#allocation2 + $0x440] ss:$16 sps:$4 sm:$0xff]   ;;  %v7281_v21 = vld [vmem:[#allocation2 + $0x448] ss:$16 sps:$4 sm:$0xff]  }
  0x9d   :  { %4801 = vmatpush1.bf16.msra.mxu0 %v7194_v22  ;;  %5293 = vmatpush1.bf16.msra.mxu1 %v7197_v23  ;;  %v7286_v22 = vld [vmem:[#allocation2 + $0x464] ss:$16 sps:$4 sm:$0xff]   ;;  %v7289_v23 = vld [vmem:[#allocation2 + $0x46c] ss:$16 sps:$4 sm:$0xff]  }
  0x9e   :  { %4802 = vmatprep.subr.bf16.mxu0 %v7202_v24  ;;  %5294 = vmatprep.subr.bf16.mxu1 %v7205_v25  ;;  %v7284_v24 = vld [vmem:[#allocation2 + $0x460] ss:$16 sps:$4 sm:$0xff]   ;;  %v7287_v25 = vld [vmem:[#allocation2 + $0x468] ss:$16 sps:$4 sm:$0xff]  }
  0xa1   :  { %4803 = vmatpush1.bf16.msra.mxu0 %v7200_v26  ;;  %5295 = vmatpush1.bf16.msra.mxu1 %v7203_v27  ;;  %v7292_v26 = vld [vmem:[#allocation2 + $0x484] ss:$16 sps:$4 sm:$0xff]   ;;  %v7295_v27 = vld [vmem:[#allocation2 + $0x48c] ss:$16 sps:$4 sm:$0xff]  }
  0xa2   :  { %4804 = vmatprep.subr.bf16.mxu0 %v7208_v28  ;;  %5296 = vmatprep.subr.bf16.mxu1 %v7211_v29  ;;  %v7290_v28 = vld [vmem:[#allocation2 + $0x480] ss:$16 sps:$4 sm:$0xff]   ;;  %v7293_v29 = vld [vmem:[#allocation2 + $0x488] ss:$16 sps:$4 sm:$0xff]  }
  0xa5   :  { %4805 = vmatpush1.bf16.msra.mxu0 %v7206_v31  ;;  %5297 = vmatpush1.bf16.msra.mxu1 %v7209_v33  ;;  %v7301_v31 = vld [vmem:[#allocation2 + $0x4ac] ss:$16 sps:$4 sm:$0xff]   ;;  %v7299_v33 = vld [vmem:[#allocation2 + $0x4a8] ss:$16 sps:$4 sm:$0xff]  }
  0xa6   :  { %4806 = vmatprep.subr.bf16.mxu0 %v7214_v34  ;;  %5298 = vmatprep.subr.bf16.mxu1 %v7217_v35  ;;  %v7304_v34 = vld [vmem:[#allocation2 + $0x4c4] ss:$16 sps:$4 sm:$0xff]   ;;  %v7307_v35 = vld [vmem:[#allocation2 + $0x4cc] ss:$16 sps:$4 sm:$0xff]  }
  0xa9   :  { %4807 = vmatpush1.bf16.msra.mxu0 %v7212_v36  ;;  %5299 = vmatpush1.bf16.msra.mxu1 %v7215_v37  ;;  %v7302_v36 = vld [vmem:[#allocation2 + $0x4c0] ss:$16 sps:$4 sm:$0xff]   ;;  %v7305_v37 = vld [vmem:[#allocation2 + $0x4c8] ss:$16 sps:$4 sm:$0xff]  }
  0xaa   :  { %4808 = vmatprep.subr.bf16.mxu0 %v7220_v38  ;;  %5300 = vmatprep.subr.bf16.mxu1 %v7223_v39  ;;  %v7310_v38 = vld [vmem:[#allocation2 + $0x4e4] ss:$16 sps:$4 sm:$0xff]   ;;  %v7313_v39 = vld [vmem:[#allocation2 + $0x4ec] ss:$16 sps:$4 sm:$0xff]  }
  0xad   :  { %4809 = vmatpush1.bf16.msra.mxu0 %v7218_v40  ;;  %5301 = vmatpush1.bf16.msra.mxu1 %v7221_v41  ;;  %v7308_v40 = vld [vmem:[#allocation2 + $0x4e0] ss:$16 sps:$4 sm:$0xff]   ;;  %v7311_v41 = vld [vmem:[#allocation2 + $0x4e8] ss:$16 sps:$4 sm:$0xff]  }
  0xae   :  { %4810 = vmatprep.subr.bf16.mxu0 %v7226_v42  ;;  %5302 = vmatprep.subr.bf16.mxu1 %v7229_v43  ;;  %v7316_v42 = vld [vmem:[#allocation2 + $0x504] ss:$16 sps:$4 sm:$0xff]   ;;  %v7319_v43 = vld [vmem:[#allocation2 + $0x50c] ss:$16 sps:$4 sm:$0xff]  }
  0xb1   :  { %4811 = vmatpush1.bf16.msra.mxu0 %v7224_v44  ;;  %5303 = vmatpush1.bf16.msra.mxu1 %v7227_v45  ;;  %v7314_v44 = vld [vmem:[#allocation2 + $0x500] ss:$16 sps:$4 sm:$0xff]   ;;  %v7317_v45 = vld [vmem:[#allocation2 + $0x508] ss:$16 sps:$4 sm:$0xff]  }
  0xb2   :  { %4812 = vmatprep.subr.bf16.mxu0 %v7232_v46  ;;  %5304 = vmatprep.subr.bf16.mxu1 %v7235_v47  ;;  %v7322_v46 = vld [vmem:[#allocation2 + $0x524] ss:$16 sps:$4 sm:$0xff]   ;;  %v7325_v47 = vld [vmem:[#allocation2 + $0x52c] ss:$16 sps:$4 sm:$0xff]  }
  0xb5   :  { %4813 = vmatpush1.bf16.msra.mxu0 %v7230_v48  ;;  %5305 = vmatpush1.bf16.msra.mxu1 %v7233_v49  ;;  %v7320_v48 = vld [vmem:[#allocation2 + $0x520] ss:$16 sps:$4 sm:$0xff]   ;;  %v7323_v49 = vld [vmem:[#allocation2 + $0x528] ss:$16 sps:$4 sm:$0xff]  }
  0xb6   :  { %4814 = vmatprep.subr.bf16.mxu0 %v7238_v50  ;;  %5306 = vmatprep.subr.bf16.mxu1 %v7241_v51  ;;  %v7328_v50 = vld [vmem:[#allocation2 + $0x544] ss:$16 sps:$4 sm:$0xff]   ;;  %v7331_v51 = vld [vmem:[#allocation2 + $0x54c] ss:$16 sps:$4 sm:$0xff]  }
  0xb9   :  { %4815 = vmatpush1.bf16.msra.mxu0 %v7236_v52  ;;  %5307 = vmatpush1.bf16.msra.mxu1 %v7239_v53  ;;  %v7326_v52 = vld [vmem:[#allocation2 + $0x540] ss:$16 sps:$4 sm:$0xff]   ;;  %v7329_v53 = vld [vmem:[#allocation2 + $0x548] ss:$16 sps:$4 sm:$0xff]  }
  0xba   :  { %4816 = vmatprep.subr.bf16.mxu0 %v7244_v54  ;;  %5308 = vmatprep.subr.bf16.mxu1 %v7247_v55  ;;  %v7334_v54 = vld [vmem:[#allocation2 + $0x564] ss:$16 sps:$4 sm:$0xff]   ;;  %v7337_v55 = vld [vmem:[#allocation2 + $0x56c] ss:$16 sps:$4 sm:$0xff]  }
  0xbd   :  { %4817 = vmatpush1.bf16.msra.mxu0 %v7242_v56  ;;  %5309 = vmatpush1.bf16.msra.mxu1 %v7245_v57  ;;  %v7332_v56 = vld [vmem:[#allocation2 + $0x560] ss:$16 sps:$4 sm:$0xff]   ;;  %v7335_v57 = vld [vmem:[#allocation2 + $0x568] ss:$16 sps:$4 sm:$0xff]  }
  0xbe   :  { %4818 = vmatprep.subr.bf16.mxu0 %v7250_v58  ;;  %5310 = vmatprep.subr.bf16.mxu1 %v7253_v59  ;;  %v7340_v58 = vld [vmem:[#allocation2 + $0x584] ss:$16 sps:$4 sm:$0xff]   ;;  %v7343_v59 = vld [vmem:[#allocation2 + $0x58c] ss:$16 sps:$4 sm:$0xff]  }
  0xc1   :  { %4819 = vmatpush1.bf16.msra.mxu0 %v7248_v60  ;;  %5311 = vmatpush1.bf16.msra.mxu1 %v7251_v61  ;;  %v7338_v60 = vld [vmem:[#allocation2 + $0x580] ss:$16 sps:$4 sm:$0xff]   ;;  %v7341_v61 = vld [vmem:[#allocation2 + $0x588] ss:$16 sps:$4 sm:$0xff]  }
  0xc2   :  { %4820 = vmatprep.subr.bf16.mxu0 %v7256_v62  ;;  %5312 = vmatprep.subr.bf16.mxu1 %v7259_v63  ;;  %v7346_v62 = vld [vmem:[#allocation2 + $0x5a4] ss:$16 sps:$4 sm:$0xff]   ;;  %v7349_v63 = vld [vmem:[#allocation2 + $0x5ac] ss:$16 sps:$4 sm:$0xff]  }
  0xc5   :  { %4821 = vmatpush1.bf16.msra.mxu0 %v7254_v0  ;;  %5313 = vmatpush1.bf16.msra.mxu1 %v7257_v1  ;;  %v7344_v0 = vld [vmem:[#allocation2 + $0x5a0] ss:$16 sps:$4 sm:$0xff]   ;;  %v7347_v1 = vld [vmem:[#allocation2 + $0x5a8] ss:$16 sps:$4 sm:$0xff]  }
  0xc6   :  { %4822 = vmatprep.subr.bf16.mxu0 %v7262_v2  ;;  %5314 = vmatprep.subr.bf16.mxu1 %v7265_v3  ;;  %v7352_v2 = vld [vmem:[#allocation2 + $0x5c4] ss:$16 sps:$4 sm:$0xff]   ;;  %v7355_v3 = vld [vmem:[#allocation2 + $0x5cc] ss:$16 sps:$4 sm:$0xff]  }
  0xc9   :  { %4823 = vmatpush1.bf16.msra.mxu0 %v7260_v4  ;;  %5315 = vmatpush1.bf16.msra.mxu1 %v7263_v5  ;;  %v7350_v4 = vld [vmem:[#allocation2 + $0x5c0] ss:$16 sps:$4 sm:$0xff]   ;;  %v7353_v5 = vld [vmem:[#allocation2 + $0x5c8] ss:$16 sps:$4 sm:$0xff]  }
  0xca   :  { %4833 = vmatprep.subr.bf16.mxu0 %v7268_v6  ;;  %5325 = vmatprep.subr.bf16.mxu1 %v7271_v8  ;;  %v7358_v6 = vld [vmem:[#allocation2 + $0x5e4] ss:$16 sps:$4 sm:$0xff]   ;;  %v7356_v8 = vld [vmem:[#allocation2 + $0x5e0] ss:$16 sps:$4 sm:$0xff]  }
  0xcc   :  { %4825 = vmatmul.mubr.bf16.vlgmr.msra.gmra.mrb[0].mxu0 %v99_v11  ;;  %5317 = vmatmul.mubr.bf16.vlgmr.msra.gmra.mrb[0].mxu1 %v99_v11  ;;  %v77_v11 = vld [vmem:[%s8570_s0 + $0x20] sm:$0xff] }
  0xcd   :  { %4834 = vmatpush1.bf16.msra.mxu0 %v7266_v9  ;;  %5326 = vmatpush1.bf16.msra.mxu1 %v7269_v10  ;;  %v7359_v9 = vld [vmem:[#allocation2 + $0x5e8] ss:$16 sps:$4 sm:$0xff]   ;;  %v7364_v10 = vld [vmem:[#allocation2 + $0x604] ss:$16 sps:$4 sm:$0xff]  }
  0xce   :  { %4835 = vmatprep.subr.bf16.mxu0 %v7274_v12  ;;  %5327 = vmatprep.subr.bf16.mxu1 %v7277_v13  ;;  %v7367_v12 = vld [vmem:[#allocation2 + $0x60c] ss:$16 sps:$4 sm:$0xff]   ;;  %v7362_v13 = vld [vmem:[#allocation2 + $0x600] ss:$16 sps:$4 sm:$0xff]  }
  0xcf   :  { %4865 = vmatprep.mubr.bf16.mxu0 %v102_v15  ;;  %5357 = vmatprep.mubr.bf16.mxu1 %v102_v15  ;;  %v101_v15 = vpack.c.bf16 %v77_v11, %v77_v11  ;;  %v7457_v11 = vld [vmem:[#allocation2 + $0x7ec] ss:$16 sps:$4 sm:$0xff]  }
  0xd1   :  { %4836 = vmatpush1.bf16.msra.mxu0 %v7272_v16  ;;  %5328 = vmatpush1.bf16.msra.mxu1 %v7275_v17  ;;  %v80_v16 = vld [vmem:[%s8570_s0 + $0x38] sm:$0xff]  ;;  %v7370_v17 = vld [vmem:[#allocation2 + $0x624] ss:$16 sps:$4 sm:$0xff]  }
  0xd2   :  { %4837 = vmatprep.subr.bf16.mxu0 %v7280_v18  ;;  %5329 = vmatprep.subr.bf16.mxu1 %v7283_v19  ;;  %v7373_v18 = vld [vmem:[#allocation2 + $0x62c] ss:$16 sps:$4 sm:$0xff]   ;;  %v104_v19 = vpack.c.bf16 %v80_v16, %v80_v16 }
  0xd3   :  { %v7463_v16 = vld [vmem:[#allocation2 + $0x80c] ss:$16 sps:$4 sm:$0xff]  }
  0xd5   :  { %4838 = vmatpush1.bf16.msra.mxu0 %v7278_v20  ;;  %5330 = vmatpush1.bf16.msra.mxu1 %v7281_v21  ;;  %v7368_v20 = vld [vmem:[#allocation2 + $0x620] ss:$16 sps:$4 sm:$0xff]   ;;  %v7371_v21 = vld [vmem:[#allocation2 + $0x628] ss:$16 sps:$4 sm:$0xff]  }
  0xd6   :  { %4839 = vmatprep.subr.bf16.mxu0 %v7286_v22  ;;  %5331 = vmatprep.subr.bf16.mxu1 %v7289_v23  ;;  %v7376_v22 = vld [vmem:[#allocation2 + $0x644] ss:$16 sps:$4 sm:$0xff]   ;;  %v7379_v23 = vld [vmem:[#allocation2 + $0x64c] ss:$16 sps:$4 sm:$0xff]  }
  0xd9   :  { %4840 = vmatpush1.bf16.msra.mxu0 %v7284_v24  ;;  %5332 = vmatpush1.bf16.msra.mxu1 %v7287_v25  ;;  %v7374_v24 = vld [vmem:[#allocation2 + $0x640] ss:$16 sps:$4 sm:$0xff]   ;;  %v7377_v25 = vld [vmem:[#allocation2 + $0x648] ss:$16 sps:$4 sm:$0xff]  }
  0xda   :  { %4841 = vmatprep.subr.bf16.mxu0 %v7292_v26  ;;  %5333 = vmatprep.subr.bf16.mxu1 %v7295_v27  ;;  %v7382_v26 = vld [vmem:[#allocation2 + $0x664] ss:$16 sps:$4 sm:$0xff]   ;;  %v7385_v27 = vld [vmem:[#allocation2 + $0x66c] ss:$16 sps:$4 sm:$0xff]  }
  0xdd   :  { %4842 = vmatpush1.bf16.msra.mxu0 %v7290_v28  ;;  %5334 = vmatpush1.bf16.msra.mxu1 %v7293_v29  ;;  %v7380_v28 = vld [vmem:[#allocation2 + $0x660] ss:$16 sps:$4 sm:$0xff]   ;;  %v7383_v29 = vld [vmem:[#allocation2 + $0x668] ss:$16 sps:$4 sm:$0xff]  }
  0xde   :  { %4843 = vmatprep.subr.bf16.mxu0 %v7298_v30  ;;  %5335 = vmatprep.subr.bf16.mxu1 %v7301_v31  ;;  %v7388_v30 = vld [vmem:[#allocation2 + $0x684] ss:$16 sps:$4 sm:$0xff]   ;;  %v7391_v31 = vld [vmem:[#allocation2 + $0x68c] ss:$16 sps:$4 sm:$0xff]  }
  0xe1   :  { %4844 = vmatpush1.bf16.msra.mxu0 %v7296_v32  ;;  %5336 = vmatpush1.bf16.msra.mxu1 %v7299_v33  ;;  %v7386_v32 = vld [vmem:[#allocation2 + $0x680] ss:$16 sps:$4 sm:$0xff]   ;;  %v7389_v33 = vld [vmem:[#allocation2 + $0x688] ss:$16 sps:$4 sm:$0xff]  }
  0xe2   :  { %4845 = vmatprep.subr.bf16.mxu0 %v7304_v34  ;;  %5337 = vmatprep.subr.bf16.mxu1 %v7307_v35  ;;  %v7394_v34 = vld [vmem:[#allocation2 + $0x6a4] ss:$16 sps:$4 sm:$0xff]   ;;  %v7397_v35 = vld [vmem:[#allocation2 + $0x6ac] ss:$16 sps:$4 sm:$0xff]  }
  0xe5   :  { %4846 = vmatpush1.bf16.msra.mxu0 %v7302_v36  ;;  %5338 = vmatpush1.bf16.msra.mxu1 %v7305_v37  ;;  %v7392_v36 = vld [vmem:[#allocation2 + $0x6a0] ss:$16 sps:$4 sm:$0xff]   ;;  %v7395_v37 = vld [vmem:[#allocation2 + $0x6a8] ss:$16 sps:$4 sm:$0xff]  }
  0xe6   :  { %4847 = vmatprep.subr.bf16.mxu0 %v7310_v38  ;;  %5339 = vmatprep.subr.bf16.mxu1 %v7313_v39  ;;  %v7400_v38 = vld [vmem:[#allocation2 + $0x6c4] ss:$16 sps:$4 sm:$0xff]   ;;  %v7403_v39 = vld [vmem:[#allocation2 + $0x6cc] ss:$16 sps:$4 sm:$0xff]  }
  0xe9   :  { %4848 = vmatpush1.bf16.msra.mxu0 %v7308_v40  ;;  %5340 = vmatpush1.bf16.msra.mxu1 %v7311_v41  ;;  %v7398_v40 = vld [vmem:[#allocation2 + $0x6c0] ss:$16 sps:$4 sm:$0xff]   ;;  %v7401_v41 = vld [vmem:[#allocation2 + $0x6c8] ss:$16 sps:$4 sm:$0xff]  }
  0xea   :  { %4849 = vmatprep.subr.bf16.mxu0 %v7316_v42  ;;  %5341 = vmatprep.subr.bf16.mxu1 %v7319_v43  ;;  %v7406_v42 = vld [vmem:[#allocation2 + $0x6e4] ss:$16 sps:$4 sm:$0xff]   ;;  %v7409_v43 = vld [vmem:[#allocation2 + $0x6ec] ss:$16 sps:$4 sm:$0xff]  }
  0xed   :  { %4850 = vmatpush1.bf16.msra.mxu0 %v7314_v44  ;;  %5342 = vmatpush1.bf16.msra.mxu1 %v7317_v45  ;;  %v7404_v44 = vld [vmem:[#allocation2 + $0x6e0] ss:$16 sps:$4 sm:$0xff]   ;;  %v7407_v45 = vld [vmem:[#allocation2 + $0x6e8] ss:$16 sps:$4 sm:$0xff]  }
  0xee   :  { %4851 = vmatprep.subr.bf16.mxu0 %v7322_v46  ;;  %5343 = vmatprep.subr.bf16.mxu1 %v7325_v47  ;;  %v7412_v46 = vld [vmem:[#allocation2 + $0x704] ss:$16 sps:$4 sm:$0xff]   ;;  %v7415_v47 = vld [vmem:[#allocation2 + $0x70c] ss:$16 sps:$4 sm:$0xff]  }
  0xf1   :  { %4852 = vmatpush1.bf16.msra.mxu0 %v7320_v48  ;;  %5344 = vmatpush1.bf16.msra.mxu1 %v7323_v49  ;;  %v7410_v48 = vld [vmem:[#allocation2 + $0x700] ss:$16 sps:$4 sm:$0xff]   ;;  %v7413_v49 = vld [vmem:[#allocation2 + $0x708] ss:$16 sps:$4 sm:$0xff]  }
  0xf2   :  { %4853 = vmatprep.subr.bf16.mxu0 %v7328_v50  ;;  %5345 = vmatprep.subr.bf16.mxu1 %v7331_v51  ;;  %v7418_v50 = vld [vmem:[#allocation2 + $0x724] ss:$16 sps:$4 sm:$0xff]   ;;  %v7421_v51 = vld [vmem:[#allocation2 + $0x72c] ss:$16 sps:$4 sm:$0xff]  }
  0xf5   :  { %4854 = vmatpush1.bf16.msra.mxu0 %v7326_v52  ;;  %5346 = vmatpush1.bf16.msra.mxu1 %v7329_v53  ;;  %v7416_v52 = vld [vmem:[#allocation2 + $0x720] ss:$16 sps:$4 sm:$0xff]   ;;  %v7419_v53 = vld [vmem:[#allocation2 + $0x728] ss:$16 sps:$4 sm:$0xff]  }
  0xf6   :  { %4855 = vmatprep.subr.bf16.mxu0 %v7334_v54  ;;  %5347 = vmatprep.subr.bf16.mxu1 %v7337_v55  ;;  %v7424_v54 = vld [vmem:[#allocation2 + $0x744] ss:$16 sps:$4 sm:$0xff]   ;;  %v7427_v55 = vld [vmem:[#allocation2 + $0x74c] ss:$16 sps:$4 sm:$0xff]  }
  0xf9   :  { %4856 = vmatpush1.bf16.msra.mxu0 %v7332_v56  ;;  %5348 = vmatpush1.bf16.msra.mxu1 %v7335_v57  ;;  %v7422_v56 = vld [vmem:[#allocation2 + $0x740] ss:$16 sps:$4 sm:$0xff]   ;;  %v7425_v57 = vld [vmem:[#allocation2 + $0x748] ss:$16 sps:$4 sm:$0xff]  }
  0xfa   :  { %4857 = vmatprep.subr.bf16.mxu0 %v7340_v58  ;;  %5349 = vmatprep.subr.bf16.mxu1 %v7343_v59  ;;  %v7430_v58 = vld [vmem:[#allocation2 + $0x764] ss:$16 sps:$4 sm:$0xff]   ;;  %v7433_v59 = vld [vmem:[#allocation2 + $0x76c] ss:$16 sps:$4 sm:$0xff]  }
  0xfd   :  { %4858 = vmatpush1.bf16.msra.mxu0 %v7338_v60  ;;  %5350 = vmatpush1.bf16.msra.mxu1 %v7341_v61  ;;  %v7428_v60 = vld [vmem:[#allocation2 + $0x760] ss:$16 sps:$4 sm:$0xff]   ;;  %v7431_v61 = vld [vmem:[#allocation2 + $0x768] ss:$16 sps:$4 sm:$0xff]  }
  0xfe   :  { %4859 = vmatprep.subr.bf16.mxu0 %v7346_v62  ;;  %5351 = vmatprep.subr.bf16.mxu1 %v7349_v63  ;;  %v7436_v62 = vld [vmem:[#allocation2 + $0x784] ss:$16 sps:$4 sm:$0xff]   ;;  %v7439_v63 = vld [vmem:[#allocation2 + $0x78c] ss:$16 sps:$4 sm:$0xff]  }
 0x101   :  { %4860 = vmatpush1.bf16.msra.mxu0 %v7344_v0  ;;  %5352 = vmatpush1.bf16.msra.mxu1 %v7347_v1  ;;  %v7434_v0 = vld [vmem:[#allocation2 + $0x780] ss:$16 sps:$4 sm:$0xff]   ;;  %v7437_v1 = vld [vmem:[#allocation2 + $0x788] ss:$16 sps:$4 sm:$0xff]  }
 0x102   :  { %4861 = vmatprep.subr.bf16.mxu0 %v7352_v2  ;;  %5353 = vmatprep.subr.bf16.mxu1 %v7355_v3  ;;  %v7442_v2 = vld [vmem:[#allocation2 + $0x7a4] ss:$16 sps:$4 sm:$0xff]   ;;  %v7445_v3 = vld [vmem:[#allocation2 + $0x7ac] ss:$16 sps:$4 sm:$0xff]  }
 0x105   :  { %4862 = vmatpush1.bf16.msra.mxu0 %v7350_v4  ;;  %5354 = vmatpush1.bf16.msra.mxu1 %v7353_v5  ;;  %v7440_v4 = vld [vmem:[#allocation2 + $0x7a0] ss:$16 sps:$4 sm:$0xff]   ;;  %v7443_v5 = vld [vmem:[#allocation2 + $0x7a8] ss:$16 sps:$4 sm:$0xff]  }
 0x106   :  { %4863 = vmatprep.subr.bf16.mxu0 %v7358_v6  ;;  %5355 = vmatprep.subr.bf16.mxu1 %v7361_v7  ;;  %v7448_v6 = vld [vmem:[#allocation2 + $0x7c4] ss:$16 sps:$4 sm:$0xff]   ;;  %v7451_v7 = vld [vmem:[#allocation2 + $0x7cc] ss:$16 sps:$4 sm:$0xff]  }
 0x109   :  { %4864 = vmatpush1.bf16.msra.mxu0 %v7356_v8  ;;  %5356 = vmatpush1.bf16.msra.mxu1 %v7359_v9  ;;  %v7446_v8 = vld [vmem:[#allocation2 + $0x7c0] ss:$16 sps:$4 sm:$0xff]   ;;  %v7449_v9 = vld [vmem:[#allocation2 + $0x7c8] ss:$16 sps:$4 sm:$0xff]  }
 0x10a   :  { %4874 = vmatprep.subr.bf16.mxu0 %v7364_v10  ;;  %5366 = vmatprep.subr.bf16.mxu1 %v7367_v12  ;;  %v7454_v10 = vld [vmem:[#allocation2 + $0x7e4] ss:$16 sps:$4 sm:$0xff]   ;;  %v7452_v12 = vld [vmem:[#allocation2 + $0x7e0] ss:$16 sps:$4 sm:$0xff]  }
 0x10c   :  { %4866 = vmatmul.mubr.bf16.vlgmr.msra.gmra.mrb[0].mxu0 %v101_v15  ;;  %5358 = vmatmul.mubr.bf16.vlgmr.msra.gmra.mrb[0].mxu1 %v101_v15  ;;  %v7460_v15 = vld [vmem:[#allocation2 + $0x804] ss:$16 sps:$4 sm:$0xff]  }
 0x10d   :  { %4875 = vmatpush1.bf16.msra.mxu0 %v7362_v13  ;;  %5367 = vmatpush1.bf16.msra.mxu1 %v7365_v14  ;;  %v7455_v13 = vld [vmem:[#allocation2 + $0x7e8] ss:$16 sps:$4 sm:$0xff]   ;;  %v79_v14 = vld [vmem:[%s8570_s0 + $0x30] sm:$0xff] }
 0x10e   :  { %4876 = vmatprep.subr.bf16.mxu0 %v7370_v17  ;;  %5368 = vmatprep.subr.bf16.mxu1 %v7373_v18  ;;  %v103_v17 = vpack.c.bf16 %v79_v14, %v79_v14  ;;  %v82_v18 = vld [vmem:[%s8570_s0 + $0x48] sm:$0xff]  ;;  %v7550_v14 = vld [vmem:[#allocation2 + $0x9e4] ss:$16 sps:$4 sm:$0xff]  }
 0x10f   :  { %4906 = vmatprep.mubr.bf16.mxu0 %v104_v19  ;;  %5398 = vmatprep.mubr.bf16.mxu1 %v104_v19  ;;  %v7458_v19 = vld [vmem:[#allocation2 + $0x800] ss:$16 sps:$4 sm:$0xff]  }
 0x111   :  { %4877 = vmatpush1.bf16.msra.mxu0 %v7368_v20  ;;  %5369 = vmatpush1.bf16.msra.mxu1 %v7371_v21  ;;  %v7461_v20 = vld [vmem:[#allocation2 + $0x808] ss:$16 sps:$4 sm:$0xff]   ;;  %v7466_v21 = vld [vmem:[#allocation2 + $0x824] ss:$16 sps:$4 sm:$0xff]  }
 0x112   :  { %4878 = vmatprep.subr.bf16.mxu0 %v7376_v22  ;;  %5370 = vmatprep.subr.bf16.mxu1 %v7379_v23  ;;  %v7469_v22 = vld [vmem:[#allocation2 + $0x82c] ss:$16 sps:$4 sm:$0xff]   ;;  %v106_v23 = vpack.c.bf16 %v82_v18, %v82_v18  ;;  %v7556_v18 = vld [vmem:[#allocation2 + $0xa04] ss:$16 sps:$4 sm:$0xff]  }
 0x115   :  { %4879 = vmatpush1.bf16.msra.mxu0 %v7374_v24  ;;  %5371 = vmatpush1.bf16.msra.mxu1 %v7377_v25  ;;  %v7464_v24 = vld [vmem:[#allocation2 + $0x820] ss:$16 sps:$4 sm:$0xff]   ;;  %v7467_v25 = vld [vmem:[#allocation2 + $0x828] ss:$16 sps:$4 sm:$0xff]  }
 0x116   :  { %4880 = vmatprep.subr.bf16.mxu0 %v7382_v26  ;;  %5372 = vmatprep.subr.bf16.mxu1 %v7385_v27  ;;  %v7472_v26 = vld [vmem:[#allocation2 + $0x844] ss:$16 sps:$4 sm:$0xff]   ;;  %v7475_v27 = vld [vmem:[#allocation2 + $0x84c] ss:$16 sps:$4 sm:$0xff]  }
 0x119   :  { %4881 = vmatpush1.bf16.msra.mxu0 %v7380_v28  ;;  %5373 = vmatpush1.bf16.msra.mxu1 %v7383_v29  ;;  %v7470_v28 = vld [vmem:[#allocation2 + $0x840] ss:$16 sps:$4 sm:$0xff]   ;;  %v7473_v29 = vld [vmem:[#allocation2 + $0x848] ss:$16 sps:$4 sm:$0xff]  }
 0x11a   :  { %4882 = vmatprep.subr.bf16.mxu0 %v7388_v30  ;;  %5374 = vmatprep.subr.bf16.mxu1 %v7391_v31  ;;  %v7478_v30 = vld [vmem:[#allocation2 + $0x864] ss:$16 sps:$4 sm:$0xff]   ;;  %v7481_v31 = vld [vmem:[#allocation2 + $0x86c] ss:$16 sps:$4 sm:$0xff]  }
 0x11d   :  { %4883 = vmatpush1.bf16.msra.mxu0 %v7386_v32  ;;  %5375 = vmatpush1.bf16.msra.mxu1 %v7389_v33  ;;  %v7476_v32 = vld [vmem:[#allocation2 + $0x860] ss:$16 sps:$4 sm:$0xff]   ;;  %v7479_v33 = vld [vmem:[#allocation2 + $0x868] ss:$16 sps:$4 sm:$0xff]  }
 0x11e   :  { %4884 = vmatprep.subr.bf16.mxu0 %v7394_v34  ;;  %5376 = vmatprep.subr.bf16.mxu1 %v7397_v35  ;;  %v7484_v34 = vld [vmem:[#allocation2 + $0x884] ss:$16 sps:$4 sm:$0xff]   ;;  %v7487_v35 = vld [vmem:[#allocation2 + $0x88c] ss:$16 sps:$4 sm:$0xff]  }
 0x121   :  { %4885 = vmatpush1.bf16.msra.mxu0 %v7392_v36  ;;  %5377 = vmatpush1.bf16.msra.mxu1 %v7395_v37  ;;  %v7482_v36 = vld [vmem:[#allocation2 + $0x880] ss:$16 sps:$4 sm:$0xff]   ;;  %v7485_v37 = vld [vmem:[#allocation2 + $0x888] ss:$16 sps:$4 sm:$0xff]  }
 0x122   :  { %4886 = vmatprep.subr.bf16.mxu0 %v7400_v38  ;;  %5378 = vmatprep.subr.bf16.mxu1 %v7403_v39  ;;  %v7490_v38 = vld [vmem:[#allocation2 + $0x8a4] ss:$16 sps:$4 sm:$0xff]   ;;  %v7493_v39 = vld [vmem:[#allocation2 + $0x8ac] ss:$16 sps:$4 sm:$0xff]  }
 0x125   :  { %4887 = vmatpush1.bf16.msra.mxu0 %v7398_v40  ;;  %5379 = vmatpush1.bf16.msra.mxu1 %v7401_v41  ;;  %v7488_v40 = vld [vmem:[#allocation2 + $0x8a0] ss:$16 sps:$4 sm:$0xff]   ;;  %v7491_v41 = vld [vmem:[#allocation2 + $0x8a8] ss:$16 sps:$4 sm:$0xff]  }
 0x126   :  { %4888 = vmatprep.subr.bf16.mxu0 %v7406_v42  ;;  %5380 = vmatprep.subr.bf16.mxu1 %v7409_v43  ;;  %v7496_v42 = vld [vmem:[#allocation2 + $0x8c4] ss:$16 sps:$4 sm:$0xff]   ;;  %v7499_v43 = vld [vmem:[#allocation2 + $0x8cc] ss:$16 sps:$4 sm:$0xff]  }
 0x129   :  { %4889 = vmatpush1.bf16.msra.mxu0 %v7404_v44  ;;  %5381 = vmatpush1.bf16.msra.mxu1 %v7407_v45  ;;  %v7494_v44 = vld [vmem:[#allocation2 + $0x8c0] ss:$16 sps:$4 sm:$0xff]   ;;  %v7497_v45 = vld [vmem:[#allocation2 + $0x8c8] ss:$16 sps:$4 sm:$0xff]  }
 0x12a   :  { %4890 = vmatprep.subr.bf16.mxu0 %v7412_v46  ;;  %5382 = vmatprep.subr.bf16.mxu1 %v7415_v47  ;;  %v7502_v46 = vld [vmem:[#allocation2 + $0x8e4] ss:$16 sps:$4 sm:$0xff]   ;;  %v7505_v47 = vld [vmem:[#allocation2 + $0x8ec] ss:$16 sps:$4 sm:$0xff]  }
 0x12d   :  { %4891 = vmatpush1.bf16.msra.mxu0 %v7410_v48  ;;  %5383 = vmatpush1.bf16.msra.mxu1 %v7413_v49  ;;  %v7500_v48 = vld [vmem:[#allocation2 + $0x8e0] ss:$16 sps:$4 sm:$0xff]   ;;  %v7503_v49 = vld [vmem:[#allocation2 + $0x8e8] ss:$16 sps:$4 sm:$0xff]  }
 0x12e   :  { %4892 = vmatprep.subr.bf16.mxu0 %v7418_v50  ;;  %5384 = vmatprep.subr.bf16.mxu1 %v7421_v51  ;;  %v7508_v50 = vld [vmem:[#allocation2 + $0x904] ss:$16 sps:$4 sm:$0xff]   ;;  %v7511_v51 = vld [vmem:[#allocation2 + $0x90c] ss:$16 sps:$4 sm:$0xff]  }
 0x131   :  { %4893 = vmatpush1.bf16.msra.mxu0 %v7416_v52  ;;  %5385 = vmatpush1.bf16.msra.mxu1 %v7419_v53  ;;  %v7506_v52 = vld [vmem:[#allocation2 + $0x900] ss:$16 sps:$4 sm:$0xff]   ;;  %v7509_v53 = vld [vmem:[#allocation2 + $0x908] ss:$16 sps:$4 sm:$0xff]  }
 0x132   :  { %4894 = vmatprep.subr.bf16.mxu0 %v7424_v54  ;;  %5386 = vmatprep.subr.bf16.mxu1 %v7427_v55  ;;  %v7514_v54 = vld [vmem:[#allocation2 + $0x924] ss:$16 sps:$4 sm:$0xff]   ;;  %v7517_v55 = vld [vmem:[#allocation2 + $0x92c] ss:$16 sps:$4 sm:$0xff]  }
 0x135   :  { %4895 = vmatpush1.bf16.msra.mxu0 %v7422_v56  ;;  %5387 = vmatpush1.bf16.msra.mxu1 %v7425_v57  ;;  %v7512_v56 = vld [vmem:[#allocation2 + $0x920] ss:$16 sps:$4 sm:$0xff]   ;;  %v7515_v57 = vld [vmem:[#allocation2 + $0x928] ss:$16 sps:$4 sm:$0xff]  }
 0x136   :  { %4896 = vmatprep.subr.bf16.mxu0 %v7430_v58  ;;  %5388 = vmatprep.subr.bf16.mxu1 %v7433_v59  ;;  %v7520_v58 = vld [vmem:[#allocation2 + $0x944] ss:$16 sps:$4 sm:$0xff]   ;;  %v7523_v59 = vld [vmem:[#allocation2 + $0x94c] ss:$16 sps:$4 sm:$0xff]  }
 0x139   :  { %4897 = vmatpush1.bf16.msra.mxu0 %v7428_v60  ;;  %5389 = vmatpush1.bf16.msra.mxu1 %v7431_v61  ;;  %v7518_v60 = vld [vmem:[#allocation2 + $0x940] ss:$16 sps:$4 sm:$0xff]   ;;  %v7521_v61 = vld [vmem:[#allocation2 + $0x948] ss:$16 sps:$4 sm:$0xff]  }
 0x13a   :  { %4898 = vmatprep.subr.bf16.mxu0 %v7436_v62  ;;  %5390 = vmatprep.subr.bf16.mxu1 %v7439_v63  ;;  %v7526_v62 = vld [vmem:[#allocation2 + $0x964] ss:$16 sps:$4 sm:$0xff]   ;;  %v7529_v63 = vld [vmem:[#allocation2 + $0x96c] ss:$16 sps:$4 sm:$0xff]  }
 0x13d   :  { %4899 = vmatpush1.bf16.msra.mxu0 %v7434_v0  ;;  %5391 = vmatpush1.bf16.msra.mxu1 %v7437_v1  ;;  %v7524_v0 = vld [vmem:[#allocation2 + $0x960] ss:$16 sps:$4 sm:$0xff]   ;;  %v7527_v1 = vld [vmem:[#allocation2 + $0x968] ss:$16 sps:$4 sm:$0xff]  }
 0x13e   :  { %4900 = vmatprep.subr.bf16.mxu0 %v7442_v2  ;;  %5392 = vmatprep.subr.bf16.mxu1 %v7445_v3  ;;  %v7532_v2 = vld [vmem:[#allocation2 + $0x984] ss:$16 sps:$4 sm:$0xff]   ;;  %v7535_v3 = vld [vmem:[#allocation2 + $0x98c] ss:$16 sps:$4 sm:$0xff]  }
 0x141   :  { %4901 = vmatpush1.bf16.msra.mxu0 %v7440_v4  ;;  %5393 = vmatpush1.bf16.msra.mxu1 %v7443_v5  ;;  %v7530_v4 = vld [vmem:[#allocation2 + $0x980] ss:$16 sps:$4 sm:$0xff]   ;;  %v7533_v5 = vld [vmem:[#allocation2 + $0x988] ss:$16 sps:$4 sm:$0xff]  }
 0x142   :  { %4902 = vmatprep.subr.bf16.mxu0 %v7448_v6  ;;  %5394 = vmatprep.subr.bf16.mxu1 %v7451_v7  ;;  %v7538_v6 = vld [vmem:[#allocation2 + $0x9a4] ss:$16 sps:$4 sm:$0xff]   ;;  %v7541_v7 = vld [vmem:[#allocation2 + $0x9ac] ss:$16 sps:$4 sm:$0xff]  }
 0x145   :  { %4903 = vmatpush1.bf16.msra.mxu0 %v7446_v8  ;;  %5395 = vmatpush1.bf16.msra.mxu1 %v7449_v9  ;;  %v7536_v8 = vld [vmem:[#allocation2 + $0x9a0] ss:$16 sps:$4 sm:$0xff]   ;;  %v7539_v9 = vld [vmem:[#allocation2 + $0x9a8] ss:$16 sps:$4 sm:$0xff]  }
 0x146   :  { %4904 = vmatprep.subr.bf16.mxu0 %v7454_v10  ;;  %5396 = vmatprep.subr.bf16.mxu1 %v7457_v11  ;;  %v7544_v10 = vld [vmem:[#allocation2 + $0x9c4] ss:$16 sps:$4 sm:$0xff]   ;;  %v7547_v11 = vld [vmem:[#allocation2 + $0x9cc] ss:$16 sps:$4 sm:$0xff]  }
 0x149   :  { %4905 = vmatpush1.bf16.msra.mxu0 %v7452_v12  ;;  %5397 = vmatpush1.bf16.msra.mxu1 %v7455_v13  ;;  %v7542_v12 = vld [vmem:[#allocation2 + $0x9c0] ss:$16 sps:$4 sm:$0xff]   ;;  %v7545_v13 = vld [vmem:[#allocation2 + $0x9c8] ss:$16 sps:$4 sm:$0xff]  }
 0x14a   :  { %4915 = vmatprep.subr.bf16.mxu0 %v7460_v15  ;;  %5407 = vmatprep.subr.bf16.mxu1 %v7463_v16  ;;  %v7553_v15 = vld [vmem:[#allocation2 + $0x9ec] ss:$16 sps:$4 sm:$0xff]   ;;  %v7548_v16 = vld [vmem:[#allocation2 + $0x9e0] ss:$16 sps:$4 sm:$0xff]  }
 0x14c   :  { %4907 = vmatmul.mubr.bf16.vlgmr.msra.gmra.mrb[0].mxu0 %v103_v17  ;;  %5399 = vmatmul.mubr.bf16.vlgmr.msra.gmra.mrb[0].mxu1 %v103_v17  ;;  %v7551_v17 = vld [vmem:[#allocation2 + $0x9e8] ss:$16 sps:$4 sm:$0xff]  }
 0x14d   :  { %4916 = vmatpush1.bf16.msra.mxu0 %v7458_v19  ;;  %5408 = vmatpush1.bf16.msra.mxu1 %v7461_v20  ;;  %v81_v19 = vld [vmem:[%s8570_s0 + $0x40] sm:$0xff]  ;;  %v7559_v20 = vld [vmem:[#allocation2 + $0xa0c] ss:$16 sps:$4 sm:$0xff]  }
 0x14e   :  { %4917 = vmatprep.subr.bf16.mxu0 %v7466_v21  ;;  %5409 = vmatprep.subr.bf16.mxu1 %v7469_v22  ;;  %v84_v21 = vld [vmem:[%s8570_s0 + $0x58] sm:$0xff]  ;;  %v105_v22 = vpack.c.bf16 %v81_v19, %v81_v19 }
 0x14f   :  { %4947 = vmatprep.mubr.bf16.mxu0 %v106_v23  ;;  %5439 = vmatprep.mubr.bf16.mxu1 %v106_v23  ;;  %v7554_v23 = vld [vmem:[#allocation2 + $0xa00] ss:$16 sps:$4 sm:$0xff]   ;;  %v7649_v19 = vld [vmem:[#allocation2 + $0xbec] ss:$16 sps:$4 sm:$0xff]  }
 0x151   :  { %4918 = vmatpush1.bf16.msra.mxu0 %v7464_v24  ;;  %5410 = vmatpush1.bf16.msra.mxu1 %v7467_v25  ;;  %v7557_v24 = vld [vmem:[#allocation2 + $0xa08] ss:$16 sps:$4 sm:$0xff]   ;;  %v7562_v25 = vld [vmem:[#allocation2 + $0xa24] ss:$16 sps:$4 sm:$0xff]  }
 0x152   :  { %4919 = vmatprep.subr.bf16.mxu0 %v7472_v26  ;;  %5411 = vmatprep.subr.bf16.mxu1 %v7475_v27  ;;  %v7565_v26 = vld [vmem:[#allocation2 + $0xa2c] ss:$16 sps:$4 sm:$0xff]   ;;  %v108_v27 = vpack.c.bf16 %v84_v21, %v84_v21  ;;  %v7647_v21 = vld [vmem:[#allocation2 + $0xbe8] ss:$16 sps:$4 sm:$0xff]  }
 0x155   :  { %4920 = vmatpush1.bf16.msra.mxu0 %v7470_v28  ;;  %5412 = vmatpush1.bf16.msra.mxu1 %v7473_v29  ;;  %v7560_v28 = vld [vmem:[#allocation2 + $0xa20] ss:$16 sps:$4 sm:$0xff]   ;;  %v7563_v29 = vld [vmem:[#allocation2 + $0xa28] ss:$16 sps:$4 sm:$0xff]  }
 0x156   :  { %4921 = vmatprep.subr.bf16.mxu0 %v7478_v30  ;;  %5413 = vmatprep.subr.bf16.mxu1 %v7481_v31  ;;  %v7568_v30 = vld [vmem:[#allocation2 + $0xa44] ss:$16 sps:$4 sm:$0xff]   ;;  %v7571_v31 = vld [vmem:[#allocation2 + $0xa4c] ss:$16 sps:$4 sm:$0xff]  }
 0x159   :  { %4922 = vmatpush1.bf16.msra.mxu0 %v7476_v32  ;;  %5414 = vmatpush1.bf16.msra.mxu1 %v7479_v33  ;;  %v7566_v32 = vld [vmem:[#allocation2 + $0xa40] ss:$16 sps:$4 sm:$0xff]   ;;  %v7569_v33 = vld [vmem:[#allocation2 + $0xa48] ss:$16 sps:$4 sm:$0xff]  }
 0x15a   :  { %4923 = vmatprep.subr.bf16.mxu0 %v7484_v34  ;;  %5415 = vmatprep.subr.bf16.mxu1 %v7487_v35  ;;  %v7574_v34 = vld [vmem:[#allocation2 + $0xa64] ss:$16 sps:$4 sm:$0xff]   ;;  %v7577_v35 = vld [vmem:[#allocation2 + $0xa6c] ss:$16 sps:$4 sm:$0xff]  }
 0x15d   :  { %4924 = vmatpush1.bf16.msra.mxu0 %v7482_v36  ;;  %5416 = vmatpush1.bf16.msra.mxu1 %v7485_v37  ;;  %v7572_v36 = vld [vmem:[#allocation2 + $0xa60] ss:$16 sps:$4 sm:$0xff]   ;;  %v7575_v37 = vld [vmem:[#allocation2 + $0xa68] ss:$16 sps:$4 sm:$0xff]  }
 0x15e   :  { %4925 = vmatprep.subr.bf16.mxu0 %v7490_v38  ;;  %5417 = vmatprep.subr.bf16.mxu1 %v7493_v39  ;;  %v7580_v38 = vld [vmem:[#allocation2 + $0xa84] ss:$16 sps:$4 sm:$0xff]   ;;  %v7583_v39 = vld [vmem:[#allocation2 + $0xa8c] ss:$16 sps:$4 sm:$0xff]  }
 0x161   :  { %4926 = vmatpush1.bf16.msra.mxu0 %v7488_v40  ;;  %5418 = vmatpush1.bf16.msra.mxu1 %v7491_v41  ;;  %v7578_v40 = vld [vmem:[#allocation2 + $0xa80] ss:$16 sps:$4 sm:$0xff]   ;;  %v7581_v41 = vld [vmem:[#allocation2 + $0xa88] ss:$16 sps:$4 sm:$0xff]  }
 0x162   :  { %4927 = vmatprep.subr.bf16.mxu0 %v7496_v42  ;;  %5419 = vmatprep.subr.bf16.mxu1 %v7499_v43  ;;  %v7586_v42 = vld [vmem:[#allocation2 + $0xaa4] ss:$16 sps:$4 sm:$0xff]   ;;  %v7589_v43 = vld [vmem:[#allocation2 + $0xaac] ss:$16 sps:$4 sm:$0xff]  }
 0x165   :  { %4928 = vmatpush1.bf16.msra.mxu0 %v7494_v44  ;;  %5420 = vmatpush1.bf16.msra.mxu1 %v7497_v45  ;;  %v7584_v44 = vld [vmem:[#allocation2 + $0xaa0] ss:$16 sps:$4 sm:$0xff]   ;;  %v7587_v45 = vld [vmem:[#allocation2 + $0xaa8] ss:$16 sps:$4 sm:$0xff]  }
 0x166   :  { %4929 = vmatprep.subr.bf16.mxu0 %v7502_v46  ;;  %5421 = vmatprep.subr.bf16.mxu1 %v7505_v47  ;;  %v7592_v46 = vld [vmem:[#allocation2 + $0xac4] ss:$16 sps:$4 sm:$0xff]   ;;  %v7595_v47 = vld [vmem:[#allocation2 + $0xacc] ss:$16 sps:$4 sm:$0xff]  }
 0x169   :  { %4930 = vmatpush1.bf16.msra.mxu0 %v7500_v48  ;;  %5422 = vmatpush1.bf16.msra.mxu1 %v7503_v49  ;;  %v7590_v48 = vld [vmem:[#allocation2 + $0xac0] ss:$16 sps:$4 sm:$0xff]   ;;  %v7593_v49 = vld [vmem:[#allocation2 + $0xac8] ss:$16 sps:$4 sm:$0xff]  }
 0x16a   :  { %4931 = vmatprep.subr.bf16.mxu0 %v7508_v50  ;;  %5423 = vmatprep.subr.bf16.mxu1 %v7511_v51  ;;  %v7598_v50 = vld [vmem:[#allocation2 + $0xae4] ss:$16 sps:$4 sm:$0xff]   ;;  %v7601_v51 = vld [vmem:[#allocation2 + $0xaec] ss:$16 sps:$4 sm:$0xff]  }
 0x16d   :  { %4932 = vmatpush1.bf16.msra.mxu0 %v7506_v52  ;;  %5424 = vmatpush1.bf16.msra.mxu1 %v7509_v53  ;;  %v7596_v52 = vld [vmem:[#allocation2 + $0xae0] ss:$16 sps:$4 sm:$0xff]   ;;  %v7599_v53 = vld [vmem:[#allocation2 + $0xae8] ss:$16 sps:$4 sm:$0xff]  }
 0x16e   :  { %4933 = vmatprep.subr.bf16.mxu0 %v7514_v54  ;;  %5425 = vmatprep.subr.bf16.mxu1 %v7517_v55  ;;  %v7604_v54 = vld [vmem:[#allocation2 + $0xb04] ss:$16 sps:$4 sm:$0xff]   ;;  %v7607_v55 = vld [vmem:[#allocation2 + $0xb0c] ss:$16 sps:$4 sm:$0xff]  }
 0x171   :  { %4934 = vmatpush1.bf16.msra.mxu0 %v7512_v56  ;;  %5426 = vmatpush1.bf16.msra.mxu1 %v7515_v57  ;;  %v7602_v56 = vld [vmem:[#allocation2 + $0xb00] ss:$16 sps:$4 sm:$0xff]   ;;  %v7605_v57 = vld [vmem:[#allocation2 + $0xb08] ss:$16 sps:$4 sm:$0xff]  }
 0x172   :  { %4935 = vmatprep.subr.bf16.mxu0 %v7520_v58  ;;  %5427 = vmatprep.subr.bf16.mxu1 %v7523_v59  ;;  %v7610_v58 = vld [vmem:[#allocation2 + $0xb24] ss:$16 sps:$4 sm:$0xff]   ;;  %v7613_v59 = vld [vmem:[#allocation2 + $0xb2c] ss:$16 sps:$4 sm:$0xff]  }
 0x175   :  { %4936 = vmatpush1.bf16.msra.mxu0 %v7518_v60  ;;  %5428 = vmatpush1.bf16.msra.mxu1 %v7521_v61  ;;  %v7608_v60 = vld [vmem:[#allocation2 + $0xb20] ss:$16 sps:$4 sm:$0xff]   ;;  %v7611_v61 = vld [vmem:[#allocation2 + $0xb28] ss:$16 sps:$4 sm:$0xff]  }
 0x176   :  { %4937 = vmatprep.subr.bf16.mxu0 %v7526_v62  ;;  %5429 = vmatprep.subr.bf16.mxu1 %v7529_v63  ;;  %v7616_v62 = vld [vmem:[#allocation2 + $0xb44] ss:$16 sps:$4 sm:$0xff]   ;;  %v7619_v63 = vld [vmem:[#allocation2 + $0xb4c] ss:$16 sps:$4 sm:$0xff]  }
 0x179   :  { %4938 = vmatpush1.bf16.msra.mxu0 %v7524_v0  ;;  %5430 = vmatpush1.bf16.msra.mxu1 %v7527_v1  ;;  %v7614_v0 = vld [vmem:[#allocation2 + $0xb40] ss:$16 sps:$4 sm:$0xff]   ;;  %v7617_v1 = vld [vmem:[#allocation2 + $0xb48] ss:$16 sps:$4 sm:$0xff]  }
 0x17a   :  { %4939 = vmatprep.subr.bf16.mxu0 %v7532_v2  ;;  %5431 = vmatprep.subr.bf16.mxu1 %v7535_v3  ;;  %v7622_v2 = vld [vmem:[#allocation2 + $0xb64] ss:$16 sps:$4 sm:$0xff]   ;;  %v7625_v3 = vld [vmem:[#allocation2 + $0xb6c] ss:$16 sps:$4 sm:$0xff]  }
 0x17d   :  { %4940 = vmatpush1.bf16.msra.mxu0 %v7530_v4  ;;  %5432 = vmatpush1.bf16.msra.mxu1 %v7533_v5  ;;  %v7620_v4 = vld [vmem:[#allocation2 + $0xb60] ss:$16 sps:$4 sm:$0xff]   ;;  %v7623_v5 = vld [vmem:[#allocation2 + $0xb68] ss:$16 sps:$4 sm:$0xff]  }
 0x17e   :  { %4941 = vmatprep.subr.bf16.mxu0 %v7538_v6  ;;  %5433 = vmatprep.subr.bf16.mxu1 %v7541_v7  ;;  %v7628_v6 = vld [vmem:[#allocation2 + $0xb84] ss:$16 sps:$4 sm:$0xff]   ;;  %v7631_v7 = vld [vmem:[#allocation2 + $0xb8c] ss:$16 sps:$4 sm:$0xff]  }
 0x181   :  { %4942 = vmatpush1.bf16.msra.mxu0 %v7536_v8  ;;  %5434 = vmatpush1.bf16.msra.mxu1 %v7539_v9  ;;  %v7626_v8 = vld [vmem:[#allocation2 + $0xb80] ss:$16 sps:$4 sm:$0xff]   ;;  %v7629_v9 = vld [vmem:[#allocation2 + $0xb88] ss:$16 sps:$4 sm:$0xff]  }
 0x182   :  { %4943 = vmatprep.subr.bf16.mxu0 %v7544_v10  ;;  %5435 = vmatprep.subr.bf16.mxu1 %v7547_v11  ;;  %v7634_v10 = vld [vmem:[#allocation2 + $0xba4] ss:$16 sps:$4 sm:$0xff]   ;;  %v7637_v11 = vld [vmem:[#allocation2 + $0xbac] ss:$16 sps:$4 sm:$0xff]  }
 0x185   :  { %4944 = vmatpush1.bf16.msra.mxu0 %v7542_v12  ;;  %5436 = vmatpush1.bf16.msra.mxu1 %v7545_v13  ;;  %v7632_v12 = vld [vmem:[#allocation2 + $0xba0] ss:$16 sps:$4 sm:$0xff]   ;;  %v7635_v13 = vld [vmem:[#allocation2 + $0xba8] ss:$16 sps:$4 sm:$0xff]  }
 0x186   :  { %4945 = vmatprep.subr.bf16.mxu0 %v7550_v14  ;;  %5437 = vmatprep.subr.bf16.mxu1 %v7553_v15  ;;  %v7640_v14 = vld [vmem:[#allocation2 + $0xbc4] ss:$16 sps:$4 sm:$0xff]   ;;  %v7643_v15 = vld [vmem:[#allocation2 + $0xbcc] ss:$16 sps:$4 sm:$0xff]  }
 0x189   :  { %4946 = vmatpush1.bf16.msra.mxu0 %v7548_v16  ;;  %5438 = vmatpush1.bf16.msra.mxu1 %v7551_v17  ;;  %v7638_v16 = vld [vmem:[#allocation2 + $0xbc0] ss:$16 sps:$4 sm:$0xff]   ;;  %v7641_v17 = vld [vmem:[#allocation2 + $0xbc8] ss:$16 sps:$4 sm:$0xff]  }
 0x18a   :  { %4956 = vmatprep.subr.bf16.mxu0 %v7556_v18  ;;  %5448 = vmatprep.subr.bf16.mxu1 %v7559_v20  ;;  %v7646_v18 = vld [vmem:[#allocation2 + $0xbe4] ss:$16 sps:$4 sm:$0xff]   ;;  %v7644_v20 = vld [vmem:[#allocation2 + $0xbe0] ss:$16 sps:$4 sm:$0xff]  }
 0x18c   :  { %4948 = vmatmul.mubr.bf16.vlgmr.msra.gmra.mrb[0].mxu0 %v105_v22  ;;  %5440 = vmatmul.mubr.bf16.vlgmr.msra.gmra.mrb[0].mxu1 %v105_v22  ;;  %v7652_v22 = vld [vmem:[#allocation2 + $0xc04] ss:$16 sps:$4 sm:$0xff]  }
 0x18d   :  { %4957 = vmatpush1.bf16.msra.mxu0 %v7554_v23  ;;  %5449 = vmatpush1.bf16.msra.mxu1 %v7557_v24  ;;  %v83_v23 = vld [vmem:[%s8570_s0 + $0x50] sm:$0xff]  ;;  %v7655_v24 = vld [vmem:[#allocation2 + $0xc0c] ss:$16 sps:$4 sm:$0xff]  }
 0x18e   :  { %4958 = vmatprep.subr.bf16.mxu0 %v7562_v25  ;;  %5450 = vmatprep.subr.bf16.mxu1 %v7565_v26  ;;  %v86_v25 = vld [vmem:[%s8570_s0 + $0x68] sm:$0xff]  ;;  %v107_v26 = vpack.c.bf16 %v83_v23, %v83_v23 }
 0x18f   :  { %4988 = vmatprep.mubr.bf16.mxu0 %v108_v27  ;;  %5480 = vmatprep.mubr.bf16.mxu1 %v108_v27  ;;  %v7650_v27 = vld [vmem:[#allocation2 + $0xc00] ss:$16 sps:$4 sm:$0xff]   ;;  %v7745_v23 = vld [vmem:[#allocation2 + $0xdec] ss:$16 sps:$4 sm:$0xff]  }
 0x191   :  { %4959 = vmatpush1.bf16.msra.mxu0 %v7560_v28  ;;  %5451 = vmatpush1.bf16.msra.mxu1 %v7563_v29  ;;  %v7653_v28 = vld [vmem:[#allocation2 + $0xc08] ss:$16 sps:$4 sm:$0xff]   ;;  %v7658_v29 = vld [vmem:[#allocation2 + $0xc24] ss:$16 sps:$4 sm:$0xff]  }
 0x192   :  { %4960 = vmatprep.subr.bf16.mxu0 %v7568_v30  ;;  %5452 = vmatprep.subr.bf16.mxu1 %v7571_v31  ;;  %v7661_v30 = vld [vmem:[#allocation2 + $0xc2c] ss:$16 sps:$4 sm:$0xff]   ;;  %v110_v31 = vpack.c.bf16 %v86_v25, %v86_v25  ;;  %v7743_v25 = vld [vmem:[#allocation2 + $0xde8] ss:$16 sps:$4 sm:$0xff]  }
 0x195   :  { %4961 = vmatpush1.bf16.msra.mxu0 %v7566_v32  ;;  %5453 = vmatpush1.bf16.msra.mxu1 %v7569_v33  ;;  %v7656_v32 = vld [vmem:[#allocation2 + $0xc20] ss:$16 sps:$4 sm:$0xff]   ;;  %v7659_v33 = vld [vmem:[#allocation2 + $0xc28] ss:$16 sps:$4 sm:$0xff]  }
 0x196   :  { %4962 = vmatprep.subr.bf16.mxu0 %v7574_v34  ;;  %5454 = vmatprep.subr.bf16.mxu1 %v7577_v35  ;;  %v7664_v34 = vld [vmem:[#allocation2 + $0xc44] ss:$16 sps:$4 sm:$0xff]   ;;  %v7667_v35 = vld [vmem:[#allocation2 + $0xc4c] ss:$16 sps:$4 sm:$0xff]  }
 0x199   :  { %4963 = vmatpush1.bf16.msra.mxu0 %v7572_v36  ;;  %5455 = vmatpush1.bf16.msra.mxu1 %v7575_v37  ;;  %v7662_v36 = vld [vmem:[#allocation2 + $0xc40] ss:$16 sps:$4 sm:$0xff]   ;;  %v7665_v37 = vld [vmem:[#allocation2 + $0xc48] ss:$16 sps:$4 sm:$0xff]  }
 0x19a   :  { %4964 = vmatprep.subr.bf16.mxu0 %v7580_v38  ;;  %5456 = vmatprep.subr.bf16.mxu1 %v7583_v39  ;;  %v7670_v38 = vld [vmem:[#allocation2 + $0xc64] ss:$16 sps:$4 sm:$0xff]   ;;  %v7673_v39 = vld [vmem:[#allocation2 + $0xc6c] ss:$16 sps:$4 sm:$0xff]  }
 0x19d   :  { %4965 = vmatpush1.bf16.msra.mxu0 %v7578_v40  ;;  %5457 = vmatpush1.bf16.msra.mxu1 %v7581_v41  ;;  %v7668_v40 = vld [vmem:[#allocation2 + $0xc60] ss:$16 sps:$4 sm:$0xff]   ;;  %v7671_v41 = vld [vmem:[#allocation2 + $0xc68] ss:$16 sps:$4 sm:$0xff]  }
 0x19e   :  { %4966 = vmatprep.subr.bf16.mxu0 %v7586_v42  ;;  %5458 = vmatprep.subr.bf16.mxu1 %v7589_v43  ;;  %v7676_v42 = vld [vmem:[#allocation2 + $0xc84] ss:$16 sps:$4 sm:$0xff]   ;;  %v7679_v43 = vld [vmem:[#allocation2 + $0xc8c] ss:$16 sps:$4 sm:$0xff]  }
 0x1a1   :  { %4967 = vmatpush1.bf16.msra.mxu0 %v7584_v44  ;;  %5459 = vmatpush1.bf16.msra.mxu1 %v7587_v45  ;;  %v7674_v44 = vld [vmem:[#allocation2 + $0xc80] ss:$16 sps:$4 sm:$0xff]   ;;  %v7677_v45 = vld [vmem:[#allocation2 + $0xc88] ss:$16 sps:$4 sm:$0xff]  }
 0x1a2   :  { %4968 = vmatprep.subr.bf16.mxu0 %v7592_v46  ;;  %5460 = vmatprep.subr.bf16.mxu1 %v7595_v47  ;;  %v7682_v46 = vld [vmem:[#allocation2 + $0xca4] ss:$16 sps:$4 sm:$0xff]   ;;  %v7685_v47 = vld [vmem:[#allocation2 + $0xcac] ss:$16 sps:$4 sm:$0xff]  }
 0x1a5   :  { %4969 = vmatpush1.bf16.msra.mxu0 %v7590_v48  ;;  %5461 = vmatpush1.bf16.msra.mxu1 %v7593_v49  ;;  %v7680_v48 = vld [vmem:[#allocation2 + $0xca0] ss:$16 sps:$4 sm:$0xff]   ;;  %v7683_v49 = vld [vmem:[#allocation2 + $0xca8] ss:$16 sps:$4 sm:$0xff]  }
 0x1a6   :  { %4970 = vmatprep.subr.bf16.mxu0 %v7598_v50  ;;  %5462 = vmatprep.subr.bf16.mxu1 %v7601_v51  ;;  %v7688_v50 = vld [vmem:[#allocation2 + $0xcc4] ss:$16 sps:$4 sm:$0xff]   ;;  %v7691_v51 = vld [vmem:[#allocation2 + $0xccc] ss:$16 sps:$4 sm:$0xff]  }
 0x1a9   :  { %4971 = vmatpush1.bf16.msra.mxu0 %v7596_v52  ;;  %5463 = vmatpush1.bf16.msra.mxu1 %v7599_v53  ;;  %v7686_v52 = vld [vmem:[#allocation2 + $0xcc0] ss:$16 sps:$4 sm:$0xff]   ;;  %v7689_v53 = vld [vmem:[#allocation2 + $0xcc8] ss:$16 sps:$4 sm:$0xff]  }
 0x1aa   :  { %4972 = vmatprep.subr.bf16.mxu0 %v7604_v54  ;;  %5464 = vmatprep.subr.bf16.mxu1 %v7607_v55  ;;  %v7694_v54 = vld [vmem:[#allocation2 + $0xce4] ss:$16 sps:$4 sm:$0xff]   ;;  %v7697_v55 = vld [vmem:[#allocation2 + $0xcec] ss:$16 sps:$4 sm:$0xff]  }
 0x1ad   :  { %4973 = vmatpush1.bf16.msra.mxu0 %v7602_v56  ;;  %5465 = vmatpush1.bf16.msra.mxu1 %v7605_v57  ;;  %v7692_v56 = vld [vmem:[#allocation2 + $0xce0] ss:$16 sps:$4 sm:$0xff]   ;;  %v7695_v57 = vld [vmem:[#allocation2 + $0xce8] ss:$16 sps:$4 sm:$0xff]  }
 0x1ae   :  { %4974 = vmatprep.subr.bf16.mxu0 %v7610_v58  ;;  %5466 = vmatprep.subr.bf16.mxu1 %v7613_v59  ;;  %v7700_v58 = vld [vmem:[#allocation2 + $0xd04] ss:$16 sps:$4 sm:$0xff]   ;;  %v7703_v59 = vld [vmem:[#allocation2 + $0xd0c] ss:$16 sps:$4 sm:$0xff]  }
 0x1b1   :  { %4975 = vmatpush1.bf16.msra.mxu0 %v7608_v60  ;;  %5467 = vmatpush1.bf16.msra.mxu1 %v7611_v61  ;;  %v7698_v60 = vld [vmem:[#allocation2 + $0xd00] ss:$16 sps:$4 sm:$0xff]   ;;  %v7701_v61 = vld [vmem:[#allocation2 + $0xd08] ss:$16 sps:$4 sm:$0xff]  }
 0x1b2   :  { %4976 = vmatprep.subr.bf16.mxu0 %v7616_v62  ;;  %5468 = vmatprep.subr.bf16.mxu1 %v7619_v63  ;;  %v7706_v62 = vld [vmem:[#allocation2 + $0xd24] ss:$16 sps:$4 sm:$0xff]   ;;  %v7709_v63 = vld [vmem:[#allocation2 + $0xd2c] ss:$16 sps:$4 sm:$0xff]  }
 0x1b5   :  { %4977 = vmatpush1.bf16.msra.mxu0 %v7614_v0  ;;  %5469 = vmatpush1.bf16.msra.mxu1 %v7617_v1  ;;  %v7704_v0 = vld [vmem:[#allocation2 + $0xd20] ss:$16 sps:$4 sm:$0xff]   ;;  %v7707_v1 = vld [vmem:[#allocation2 + $0xd28] ss:$16 sps:$4 sm:$0xff]  }
 0x1b6   :  { %4978 = vmatprep.subr.bf16.mxu0 %v7622_v2  ;;  %5470 = vmatprep.subr.bf16.mxu1 %v7625_v3  ;;  %v7712_v2 = vld [vmem:[#allocation2 + $0xd44] ss:$16 sps:$4 sm:$0xff]   ;;  %v7715_v3 = vld [vmem:[#allocation2 + $0xd4c] ss:$16 sps:$4 sm:$0xff]  }
 0x1b9   :  { %4979 = vmatpush1.bf16.msra.mxu0 %v7620_v4  ;;  %5471 = vmatpush1.bf16.msra.mxu1 %v7623_v5  ;;  %v7710_v4 = vld [vmem:[#allocation2 + $0xd40] ss:$16 sps:$4 sm:$0xff]   ;;  %v7713_v5 = vld [vmem:[#allocation2 + $0xd48] ss:$16 sps:$4 sm:$0xff]  }
 0x1ba   :  { %4980 = vmatprep.subr.bf16.mxu0 %v7628_v6  ;;  %5472 = vmatprep.subr.bf16.mxu1 %v7631_v7  ;;  %v7718_v6 = vld [vmem:[#allocation2 + $0xd64] ss:$16 sps:$4 sm:$0xff]   ;;  %v7721_v7 = vld [vmem:[#allocation2 + $0xd6c] ss:$16 sps:$4 sm:$0xff]  }
 0x1bd   :  { %4981 = vmatpush1.bf16.msra.mxu0 %v7626_v8  ;;  %5473 = vmatpush1.bf16.msra.mxu1 %v7629_v9  ;;  %v7716_v8 = vld [vmem:[#allocation2 + $0xd60] ss:$16 sps:$4 sm:$0xff]   ;;  %v7719_v9 = vld [vmem:[#allocation2 + $0xd68] ss:$16 sps:$4 sm:$0xff]  }
 0x1be   :  { %4982 = vmatprep.subr.bf16.mxu0 %v7634_v10  ;;  %5474 = vmatprep.subr.bf16.mxu1 %v7637_v11  ;;  %v7724_v10 = vld [vmem:[#allocation2 + $0xd84] ss:$16 sps:$4 sm:$0xff]   ;;  %v7727_v11 = vld [vmem:[#allocation2 + $0xd8c] ss:$16 sps:$4 sm:$0xff]  }
 0x1c1   :  { %4983 = vmatpush1.bf16.msra.mxu0 %v7632_v12  ;;  %5475 = vmatpush1.bf16.msra.mxu1 %v7635_v13  ;;  %v7722_v12 = vld [vmem:[#allocation2 + $0xd80] ss:$16 sps:$4 sm:$0xff]   ;;  %v7725_v13 = vld [vmem:[#allocation2 + $0xd88] ss:$16 sps:$4 sm:$0xff]  }
 0x1c2   :  { %4984 = vmatprep.subr.bf16.mxu0 %v7640_v14  ;;  %5476 = vmatprep.subr.bf16.mxu1 %v7643_v15  ;;  %v7730_v14 = vld [vmem:[#allocation2 + $0xda4] ss:$16 sps:$4 sm:$0xff]   ;;  %v7733_v15 = vld [vmem:[#allocation2 + $0xdac] ss:$16 sps:$4 sm:$0xff]  }
 0x1c5   :  { %4985 = vmatpush1.bf16.msra.mxu0 %v7638_v16  ;;  %5477 = vmatpush1.bf16.msra.mxu1 %v7641_v17  ;;  %v7728_v16 = vld [vmem:[#allocation2 + $0xda0] ss:$16 sps:$4 sm:$0xff]   ;;  %v7731_v17 = vld [vmem:[#allocation2 + $0xda8] ss:$16 sps:$4 sm:$0xff]  }
 0x1c6   :  { %4986 = vmatprep.subr.bf16.mxu0 %v7646_v18  ;;  %5478 = vmatprep.subr.bf16.mxu1 %v7649_v19  ;;  %v7736_v18 = vld [vmem:[#allocation2 + $0xdc4] ss:$16 sps:$4 sm:$0xff]   ;;  %v7739_v19 = vld [vmem:[#allocation2 + $0xdcc] ss:$16 sps:$4 sm:$0xff]  }
 0x1c9   :  { %4987 = vmatpush1.bf16.msra.mxu0 %v7644_v20  ;;  %5479 = vmatpush1.bf16.msra.mxu1 %v7647_v21  ;;  %v7734_v20 = vld [vmem:[#allocation2 + $0xdc0] ss:$16 sps:$4 sm:$0xff]   ;;  %v7737_v21 = vld [vmem:[#allocation2 + $0xdc8] ss:$16 sps:$4 sm:$0xff]  }
 0x1ca   :  { %4997 = vmatprep.subr.bf16.mxu0 %v7652_v22  ;;  %5489 = vmatprep.subr.bf16.mxu1 %v7655_v24  ;;  %v7742_v22 = vld [vmem:[#allocation2 + $0xde4] ss:$16 sps:$4 sm:$0xff]   ;;  %v7740_v24 = vld [vmem:[#allocation2 + $0xde0] ss:$16 sps:$4 sm:$0xff]  }
 0x1cc   :  { %4989 = vmatmul.mubr.bf16.vlgmr.msra.gmra.mrb[0].mxu0 %v107_v26  ;;  %5481 = vmatmul.mubr.bf16.vlgmr.msra.gmra.mrb[0].mxu1 %v107_v26  ;;  %v7748_v26 = vld [vmem:[#allocation2 + $0xe04] ss:$16 sps:$4 sm:$0xff]  }
 0x1cd   :  { %4998 = vmatpush1.bf16.msra.mxu0 %v7650_v27  ;;  %5490 = vmatpush1.bf16.msra.mxu1 %v7653_v28  ;;  %v85_v27 = vld [vmem:[%s8570_s0 + $0x60] sm:$0xff]  ;;  %v7751_v28 = vld [vmem:[#allocation2 + $0xe0c] ss:$16 sps:$4 sm:$0xff]  }
 0x1ce   :  { %4999 = vmatprep.subr.bf16.mxu0 %v7658_v29  ;;  %5491 = vmatprep.subr.bf16.mxu1 %v7661_v30  ;;  %v88_v29 = vld [vmem:[%s8570_s0 + $0x78] sm:$0xff]  ;;  %v109_v30 = vpack.c.bf16 %v85_v27, %v85_v27 }
 0x1cf   :  { %5029 = vmatprep.mubr.bf16.mxu0 %v110_v31  ;;  %5521 = vmatprep.mubr.bf16.mxu1 %v110_v31  ;;  %v7746_v31 = vld [vmem:[#allocation2 + $0xe00] ss:$16 sps:$4 sm:$0xff]   ;;  %v7841_v27 = vld [vmem:[#allocation2 + $0xfec] ss:$16 sps:$4 sm:$0xff]  }
 0x1d1   :  { %5000 = vmatpush1.bf16.msra.mxu0 %v7656_v32  ;;  %5492 = vmatpush1.bf16.msra.mxu1 %v7659_v33  ;;  %v7749_v32 = vld [vmem:[#allocation2 + $0xe08] ss:$16 sps:$4 sm:$0xff]   ;;  %v7754_v33 = vld [vmem:[#allocation2 + $0xe24] ss:$16 sps:$4 sm:$0xff]  }
 0x1d2   :  { %5001 = vmatprep.subr.bf16.mxu0 %v7664_v34  ;;  %5493 = vmatprep.subr.bf16.mxu1 %v7667_v35  ;;  %v7757_v34 = vld [vmem:[#allocation2 + $0xe2c] ss:$16 sps:$4 sm:$0xff]   ;;  %v112_v35 = vpack.c.bf16 %v88_v29, %v88_v29  ;;  %v7839_v29 = vld [vmem:[#allocation2 + $0xfe8] ss:$16 sps:$4 sm:$0xff]  }
 0x1d5   :  { %5002 = vmatpush1.bf16.msra.mxu0 %v7662_v36  ;;  %5494 = vmatpush1.bf16.msra.mxu1 %v7665_v37  ;;  %v7752_v36 = vld [vmem:[#allocation2 + $0xe20] ss:$16 sps:$4 sm:$0xff]   ;;  %v7755_v37 = vld [vmem:[#allocation2 + $0xe28] ss:$16 sps:$4 sm:$0xff]  }
 0x1d6   :  { %5003 = vmatprep.subr.bf16.mxu0 %v7670_v38  ;;  %5495 = vmatprep.subr.bf16.mxu1 %v7673_v39  ;;  %v7760_v38 = vld [vmem:[#allocation2 + $0xe44] ss:$16 sps:$4 sm:$0xff]   ;;  %v7763_v39 = vld [vmem:[#allocation2 + $0xe4c] ss:$16 sps:$4 sm:$0xff]  }
 0x1d9   :  { %5004 = vmatpush1.bf16.msra.mxu0 %v7668_v40  ;;  %5496 = vmatpush1.bf16.msra.mxu1 %v7671_v41  ;;  %v7758_v40 = vld [vmem:[#allocation2 + $0xe40] ss:$16 sps:$4 sm:$0xff]   ;;  %v7761_v41 = vld [vmem:[#allocation2 + $0xe48] ss:$16 sps:$4 sm:$0xff]  }
 0x1da   :  { %5005 = vmatprep.subr.bf16.mxu0 %v7676_v42  ;;  %5497 = vmatprep.subr.bf16.mxu1 %v7679_v43  ;;  %v7766_v42 = vld [vmem:[#allocation2 + $0xe64] ss:$16 sps:$4 sm:$0xff]   ;;  %v7769_v43 = vld [vmem:[#allocation2 + $0xe6c] ss:$16 sps:$4 sm:$0xff]  }
 0x1dd   :  { %5006 = vmatpush1.bf16.msra.mxu0 %v7674_v44  ;;  %5498 = vmatpush1.bf16.msra.mxu1 %v7677_v45  ;;  %v7764_v44 = vld [vmem:[#allocation2 + $0xe60] ss:$16 sps:$4 sm:$0xff]   ;;  %v7767_v45 = vld [vmem:[#allocation2 + $0xe68] ss:$16 sps:$4 sm:$0xff]  }
 0x1de   :  { %5007 = vmatprep.subr.bf16.mxu0 %v7682_v46  ;;  %5499 = vmatprep.subr.bf16.mxu1 %v7685_v47  ;;  %v7772_v46 = vld [vmem:[#allocation2 + $0xe84] ss:$16 sps:$4 sm:$0xff]   ;;  %v7775_v47 = vld [vmem:[#allocation2 + $0xe8c] ss:$16 sps:$4 sm:$0xff]  }
 0x1e1   :  { %5008 = vmatpush1.bf16.msra.mxu0 %v7680_v48  ;;  %5500 = vmatpush1.bf16.msra.mxu1 %v7683_v49  ;;  %v7770_v48 = vld [vmem:[#allocation2 + $0xe80] ss:$16 sps:$4 sm:$0xff]   ;;  %v7773_v49 = vld [vmem:[#allocation2 + $0xe88] ss:$16 sps:$4 sm:$0xff]  }
 0x1e2   :  { %5009 = vmatprep.subr.bf16.mxu0 %v7688_v50  ;;  %5501 = vmatprep.subr.bf16.mxu1 %v7691_v51  ;;  %v7778_v50 = vld [vmem:[#allocation2 + $0xea4] ss:$16 sps:$4 sm:$0xff]   ;;  %v7781_v51 = vld [vmem:[#allocation2 + $0xeac] ss:$16 sps:$4 sm:$0xff]  }
 0x1e5   :  { %5010 = vmatpush1.bf16.msra.mxu0 %v7686_v52  ;;  %5502 = vmatpush1.bf16.msra.mxu1 %v7689_v53  ;;  %v7776_v52 = vld [vmem:[#allocation2 + $0xea0] ss:$16 sps:$4 sm:$0xff]   ;;  %v7779_v53 = vld [vmem:[#allocation2 + $0xea8] ss:$16 sps:$4 sm:$0xff]  }
 0x1e6   :  { %5011 = vmatprep.subr.bf16.mxu0 %v7694_v54  ;;  %5503 = vmatprep.subr.bf16.mxu1 %v7697_v55  ;;  %v7784_v54 = vld [vmem:[#allocation2 + $0xec4] ss:$16 sps:$4 sm:$0xff]   ;;  %v7787_v55 = vld [vmem:[#allocation2 + $0xecc] ss:$16 sps:$4 sm:$0xff]  }
 0x1e9   :  { %5012 = vmatpush1.bf16.msra.mxu0 %v7692_v56  ;;  %5504 = vmatpush1.bf16.msra.mxu1 %v7695_v57  ;;  %v7782_v56 = vld [vmem:[#allocation2 + $0xec0] ss:$16 sps:$4 sm:$0xff]   ;;  %v7785_v57 = vld [vmem:[#allocation2 + $0xec8] ss:$16 sps:$4 sm:$0xff]  }
 0x1ea   :  { %5013 = vmatprep.subr.bf16.mxu0 %v7700_v58  ;;  %5505 = vmatprep.subr.bf16.mxu1 %v7703_v59  ;;  %v7790_v58 = vld [vmem:[#allocation2 + $0xee4] ss:$16 sps:$4 sm:$0xff]   ;;  %v7793_v59 = vld [vmem:[#allocation2 + $0xeec] ss:$16 sps:$4 sm:$0xff]  }
 0x1ed   :  { %5014 = vmatpush1.bf16.msra.mxu0 %v7698_v60  ;;  %5506 = vmatpush1.bf16.msra.mxu1 %v7701_v61  ;;  %v7788_v60 = vld [vmem:[#allocation2 + $0xee0] ss:$16 sps:$4 sm:$0xff]   ;;  %v7791_v61 = vld [vmem:[#allocation2 + $0xee8] ss:$16 sps:$4 sm:$0xff]  }
 0x1ee   :  { %5015 = vmatprep.subr.bf16.mxu0 %v7706_v62  ;;  %5507 = vmatprep.subr.bf16.mxu1 %v7709_v63  ;;  %v7796_v62 = vld [vmem:[#allocation2 + $0xf04] ss:$16 sps:$4 sm:$0xff]   ;;  %v7799_v63 = vld [vmem:[#allocation2 + $0xf0c] ss:$16 sps:$4 sm:$0xff]  }
 0x1f1   :  { %5016 = vmatpush1.bf16.msra.mxu0 %v7704_v0  ;;  %5508 = vmatpush1.bf16.msra.mxu1 %v7707_v1  ;;  %v7794_v0 = vld [vmem:[#allocation2 + $0xf00] ss:$16 sps:$4 sm:$0xff]   ;;  %v7797_v1 = vld [vmem:[#allocation2 + $0xf08] ss:$16 sps:$4 sm:$0xff]  }
 0x1f2   :  { %5017 = vmatprep.subr.bf16.mxu0 %v7712_v2  ;;  %5509 = vmatprep.subr.bf16.mxu1 %v7715_v3  ;;  %v7802_v2 = vld [vmem:[#allocation2 + $0xf24] ss:$16 sps:$4 sm:$0xff]   ;;  %v7805_v3 = vld [vmem:[#allocation2 + $0xf2c] ss:$16 sps:$4 sm:$0xff]  }
 0x1f5   :  { %5018 = vmatpush1.bf16.msra.mxu0 %v7710_v4  ;;  %5510 = vmatpush1.bf16.msra.mxu1 %v7713_v5  ;;  %v7800_v4 = vld [vmem:[#allocation2 + $0xf20] ss:$16 sps:$4 sm:$0xff]   ;;  %v7803_v5 = vld [vmem:[#allocation2 + $0xf28] ss:$16 sps:$4 sm:$0xff]  }
 0x1f6   :  { %5019 = vmatprep.subr.bf16.mxu0 %v7718_v6  ;;  %5511 = vmatprep.subr.bf16.mxu1 %v7721_v7  ;;  %v7808_v6 = vld [vmem:[#allocation2 + $0xf44] ss:$16 sps:$4 sm:$0xff]   ;;  %v7811_v7 = vld [vmem:[#allocation2 + $0xf4c] ss:$16 sps:$4 sm:$0xff]  }
 0x1f9   :  { %5020 = vmatpush1.bf16.msra.mxu0 %v7716_v8  ;;  %5512 = vmatpush1.bf16.msra.mxu1 %v7719_v9  ;;  %v7806_v8 = vld [vmem:[#allocation2 + $0xf40] ss:$16 sps:$4 sm:$0xff]   ;;  %v7809_v9 = vld [vmem:[#allocation2 + $0xf48] ss:$16 sps:$4 sm:$0xff]  }
 0x1fa   :  { %5021 = vmatprep.subr.bf16.mxu0 %v7724_v10  ;;  %5513 = vmatprep.subr.bf16.mxu1 %v7727_v11  ;;  %v7814_v10 = vld [vmem:[#allocation2 + $0xf64] ss:$16 sps:$4 sm:$0xff]   ;;  %v7817_v11 = vld [vmem:[#allocation2 + $0xf6c] ss:$16 sps:$4 sm:$0xff]  }
 0x1fd   :  { %5022 = vmatpush1.bf16.msra.mxu0 %v7722_v12  ;;  %5514 = vmatpush1.bf16.msra.mxu1 %v7725_v13  ;;  %v7812_v12 = vld [vmem:[#allocation2 + $0xf60] ss:$16 sps:$4 sm:$0xff]   ;;  %v7815_v13 = vld [vmem:[#allocation2 + $0xf68] ss:$16 sps:$4 sm:$0xff]  }
 0x1fe   :  { %5023 = vmatprep.subr.bf16.mxu0 %v7730_v14  ;;  %5515 = vmatprep.subr.bf16.mxu1 %v7733_v15  ;;  %v7820_v14 = vld [vmem:[#allocation2 + $0xf84] ss:$16 sps:$4 sm:$0xff]   ;;  %v7823_v15 = vld [vmem:[#allocation2 + $0xf8c] ss:$16 sps:$4 sm:$0xff]  }
 0x201   :  { %5024 = vmatpush1.bf16.msra.mxu0 %v7728_v16  ;;  %5516 = vmatpush1.bf16.msra.mxu1 %v7731_v17  ;;  %v7818_v16 = vld [vmem:[#allocation2 + $0xf80] ss:$16 sps:$4 sm:$0xff]   ;;  %v7821_v17 = vld [vmem:[#allocation2 + $0xf88] ss:$16 sps:$4 sm:$0xff]  }
 0x202   :  { %5025 = vmatprep.subr.bf16.mxu0 %v7736_v18  ;;  %5517 = vmatprep.subr.bf16.mxu1 %v7739_v19  ;;  %v7826_v18 = vld [vmem:[#allocation2 + $0xfa4] ss:$16 sps:$4 sm:$0xff]   ;;  %v7829_v19 = vld [vmem:[#allocation2 + $0xfac] ss:$16 sps:$4 sm:$0xff]  }
 0x205   :  { %5026 = vmatpush1.bf16.msra.mxu0 %v7734_v20  ;;  %5518 = vmatpush1.bf16.msra.mxu1 %v7737_v21  ;;  %v7824_v20 = vld [vmem:[#allocation2 + $0xfa0] ss:$16 sps:$4 sm:$0xff]   ;;  %v7827_v21 = vld [vmem:[#allocation2 + $0xfa8] ss:$16 sps:$4 sm:$0xff]  }
 0x206   :  { %5027 = vmatprep.subr.bf16.mxu0 %v7742_v22  ;;  %5519 = vmatprep.subr.bf16.mxu1 %v7745_v23  ;;  %v7832_v22 = vld [vmem:[#allocation2 + $0xfc4] ss:$16 sps:$4 sm:$0xff]   ;;  %v7835_v23 = vld [vmem:[#allocation2 + $0xfcc] ss:$16 sps:$4 sm:$0xff]  }
 0x209   :  { %5028 = vmatpush1.bf16.msra.mxu0 %v7740_v24  ;;  %5520 = vmatpush1.bf16.msra.mxu1 %v7743_v25  ;;  %v7830_v24 = vld [vmem:[#allocation2 + $0xfc0] ss:$16 sps:$4 sm:$0xff]   ;;  %v7833_v25 = vld [vmem:[#allocation2 + $0xfc8] ss:$16 sps:$4 sm:$0xff]  }
 0x20a   :  { %5038 = vmatprep.subr.bf16.mxu0 %v7748_v26  ;;  %5530 = vmatprep.subr.bf16.mxu1 %v7751_v28  ;;  %v7838_v26 = vld [vmem:[#allocation2 + $0xfe4] ss:$16 sps:$4 sm:$0xff]   ;;  %v7836_v28 = vld [vmem:[#allocation2 + $0xfe0] ss:$16 sps:$4 sm:$0xff]  }
 0x20c   :  { %5030 = vmatmul.mubr.bf16.vlgmr.msra.gmra.mrb[0].mxu0 %v109_v30  ;;  %5522 = vmatmul.mubr.bf16.vlgmr.msra.gmra.mrb[0].mxu1 %v109_v30  ;;  %v87_v30 = vld [vmem:[%s8570_s0 + $0x70] sm:$0xff] }
 0x20d   :  { %5039 = vmatpush1.bf16.msra.mxu0 %v7746_v31  ;;  %5531 = vmatpush1.bf16.msra.mxu1 %v7749_v32  ;;  %v7844_v31 = vld [vmem:[#allocation2 + $0x1004] ss:$16 sps:$4 sm:$0xff]   ;;  %v7847_v32 = vld [vmem:[#allocation2 + $0x100c] ss:$16 sps:$4 sm:$0xff]  }
 0x20e   :  { %5040 = vmatprep.subr.bf16.mxu0 %v7754_v33  ;;  %5532 = vmatprep.subr.bf16.mxu1 %v7757_v34  ;;  %v111_v33 = vpack.c.bf16 %v87_v30, %v87_v30  ;;  %v90_v34 = vld [vmem:[%s8570_s0 + $0x88] sm:$0xff]  ;;  %v7934_v30 = vld [vmem:[#allocation2 + $0x11e4] ss:$16 sps:$4 sm:$0xff]  }
 0x20f   :  { %5070 = vmatprep.mubr.bf16.mxu0 %v112_v35  ;;  %5562 = vmatprep.mubr.bf16.mxu1 %v112_v35  ;;  %v7842_v35 = vld [vmem:[#allocation2 + $0x1000] ss:$16 sps:$4 sm:$0xff]  }
 0x211   :  { %5041 = vmatpush1.bf16.msra.mxu0 %v7752_v36  ;;  %5533 = vmatpush1.bf16.msra.mxu1 %v7755_v37  ;;  %v7845_v36 = vld [vmem:[#allocation2 + $0x1008] ss:$16 sps:$4 sm:$0xff]   ;;  %v7850_v37 = vld [vmem:[#allocation2 + $0x1024] ss:$16 sps:$4 sm:$0xff]  }
 0x212   :  { %5042 = vmatprep.subr.bf16.mxu0 %v7760_v38  ;;  %5534 = vmatprep.subr.bf16.mxu1 %v7763_v39  ;;  %v7853_v38 = vld [vmem:[#allocation2 + $0x102c] ss:$16 sps:$4 sm:$0xff]   ;;  %v114_v39 = vpack.c.bf16 %v90_v34, %v90_v34  ;;  %v89_v34 = vld [vmem:[%s8570_s0 + $0x80] sm:$0xff] }
 0x215   :  { %5043 = vmatpush1.bf16.msra.mxu0 %v7758_v40  ;;  %5535 = vmatpush1.bf16.msra.mxu1 %v7761_v41  ;;  %v7848_v40 = vld [vmem:[#allocation2 + $0x1020] ss:$16 sps:$4 sm:$0xff]   ;;  %v7851_v41 = vld [vmem:[#allocation2 + $0x1028] ss:$16 sps:$4 sm:$0xff]  }
 0x216   :  { %5044 = vmatprep.subr.bf16.mxu0 %v7766_v42  ;;  %5536 = vmatprep.subr.bf16.mxu1 %v7769_v43  ;;  %v7856_v42 = vld [vmem:[#allocation2 + $0x1044] ss:$16 sps:$4 sm:$0xff]   ;;  %v7859_v43 = vld [vmem:[#allocation2 + $0x104c] ss:$16 sps:$4 sm:$0xff]  }
 0x219   :  { %5045 = vmatpush1.bf16.msra.mxu0 %v7764_v44  ;;  %5537 = vmatpush1.bf16.msra.mxu1 %v7767_v45  ;;  %v7854_v44 = vld [vmem:[#allocation2 + $0x1040] ss:$16 sps:$4 sm:$0xff]   ;;  %v7857_v45 = vld [vmem:[#allocation2 + $0x1048] ss:$16 sps:$4 sm:$0xff]  }
 0x21a   :  { %5046 = vmatprep.subr.bf16.mxu0 %v7772_v46  ;;  %5538 = vmatprep.subr.bf16.mxu1 %v7775_v47  ;;  %v7862_v46 = vld [vmem:[#allocation2 + $0x1064] ss:$16 sps:$4 sm:$0xff]   ;;  %v7865_v47 = vld [vmem:[#allocation2 + $0x106c] ss:$16 sps:$4 sm:$0xff]  }
 0x21d   :  { %5047 = vmatpush1.bf16.msra.mxu0 %v7770_v48  ;;  %5539 = vmatpush1.bf16.msra.mxu1 %v7773_v49  ;;  %v7860_v48 = vld [vmem:[#allocation2 + $0x1060] ss:$16 sps:$4 sm:$0xff]   ;;  %v7863_v49 = vld [vmem:[#allocation2 + $0x1068] ss:$16 sps:$4 sm:$0xff]  }
 0x21e   :  { %5048 = vmatprep.subr.bf16.mxu0 %v7778_v50  ;;  %5540 = vmatprep.subr.bf16.mxu1 %v7781_v51  ;;  %v7868_v50 = vld [vmem:[#allocation2 + $0x1084] ss:$16 sps:$4 sm:$0xff]   ;;  %v7871_v51 = vld [vmem:[#allocation2 + $0x108c] ss:$16 sps:$4 sm:$0xff]  }
 0x221   :  { %5049 = vmatpush1.bf16.msra.mxu0 %v7776_v52  ;;  %5541 = vmatpush1.bf16.msra.mxu1 %v7779_v53  ;;  %v7866_v52 = vld [vmem:[#allocation2 + $0x1080] ss:$16 sps:$4 sm:$0xff]   ;;  %v7869_v53 = vld [vmem:[#allocation2 + $0x1088] ss:$16 sps:$4 sm:$0xff]  }
 0x222   :  { %5050 = vmatprep.subr.bf16.mxu0 %v7784_v54  ;;  %5542 = vmatprep.subr.bf16.mxu1 %v7787_v55  ;;  %v7874_v54 = vld [vmem:[#allocation2 + $0x10a4] ss:$16 sps:$4 sm:$0xff]   ;;  %v7877_v55 = vld [vmem:[#allocation2 + $0x10ac] ss:$16 sps:$4 sm:$0xff]  }
 0x225   :  { %5051 = vmatpush1.bf16.msra.mxu0 %v7782_v56  ;;  %5543 = vmatpush1.bf16.msra.mxu1 %v7785_v57  ;;  %v7872_v56 = vld [vmem:[#allocation2 + $0x10a0] ss:$16 sps:$4 sm:$0xff]   ;;  %v7875_v57 = vld [vmem:[#allocation2 + $0x10a8] ss:$16 sps:$4 sm:$0xff]  }
 0x226   :  { %5052 = vmatprep.subr.bf16.mxu0 %v7790_v58  ;;  %5544 = vmatprep.subr.bf16.mxu1 %v7793_v59  ;;  %v7880_v58 = vld [vmem:[#allocation2 + $0x10c4] ss:$16 sps:$4 sm:$0xff]   ;;  %v7883_v59 = vld [vmem:[#allocation2 + $0x10cc] ss:$16 sps:$4 sm:$0xff]  }
 0x229   :  { %5053 = vmatpush1.bf16.msra.mxu0 %v7788_v60  ;;  %5545 = vmatpush1.bf16.msra.mxu1 %v7791_v61  ;;  %v7878_v60 = vld [vmem:[#allocation2 + $0x10c0] ss:$16 sps:$4 sm:$0xff]   ;;  %v7881_v61 = vld [vmem:[#allocation2 + $0x10c8] ss:$16 sps:$4 sm:$0xff]  }
 0x22a   :  { %5054 = vmatprep.subr.bf16.mxu0 %v7796_v62  ;;  %5546 = vmatprep.subr.bf16.mxu1 %v7799_v63  ;;  %v7886_v62 = vld [vmem:[#allocation2 + $0x10e4] ss:$16 sps:$4 sm:$0xff]   ;;  %v7889_v63 = vld [vmem:[#allocation2 + $0x10ec] ss:$16 sps:$4 sm:$0xff]  }
 0x22d   :  { %5055 = vmatpush1.bf16.msra.mxu0 %v7794_v0  ;;  %5547 = vmatpush1.bf16.msra.mxu1 %v7797_v1  ;;  %v7884_v0 = vld [vmem:[#allocation2 + $0x10e0] ss:$16 sps:$4 sm:$0xff]   ;;  %v7887_v1 = vld [vmem:[#allocation2 + $0x10e8] ss:$16 sps:$4 sm:$0xff]  }
 0x22e   :  { %5056 = vmatprep.subr.bf16.mxu0 %v7802_v2  ;;  %5548 = vmatprep.subr.bf16.mxu1 %v7805_v3  ;;  %v7892_v2 = vld [vmem:[#allocation2 + $0x1104] ss:$16 sps:$4 sm:$0xff]   ;;  %v7895_v3 = vld [vmem:[#allocation2 + $0x110c] ss:$16 sps:$4 sm:$0xff]  }
 0x231   :  { %5057 = vmatpush1.bf16.msra.mxu0 %v7800_v4  ;;  %5549 = vmatpush1.bf16.msra.mxu1 %v7803_v5  ;;  %v7890_v4 = vld [vmem:[#allocation2 + $0x1100] ss:$16 sps:$4 sm:$0xff]   ;;  %v7893_v5 = vld [vmem:[#allocation2 + $0x1108] ss:$16 sps:$4 sm:$0xff]  }
 0x232   :  { %5058 = vmatprep.subr.bf16.mxu0 %v7808_v6  ;;  %5550 = vmatprep.subr.bf16.mxu1 %v7811_v7  ;;  %v7898_v6 = vld [vmem:[#allocation2 + $0x1124] ss:$16 sps:$4 sm:$0xff]   ;;  %v7901_v7 = vld [vmem:[#allocation2 + $0x112c] ss:$16 sps:$4 sm:$0xff]  }
 0x235   :  { %5059 = vmatpush1.bf16.msra.mxu0 %v7806_v8  ;;  %5551 = vmatpush1.bf16.msra.mxu1 %v7809_v9  ;;  %v7896_v8 = vld [vmem:[#allocation2 + $0x1120] ss:$16 sps:$4 sm:$0xff]   ;;  %v7899_v9 = vld [vmem:[#allocation2 + $0x1128] ss:$16 sps:$4 sm:$0xff]  }
 0x236   :  { %5060 = vmatprep.subr.bf16.mxu0 %v7814_v10  ;;  %5552 = vmatprep.subr.bf16.mxu1 %v7817_v11  ;;  %v7904_v10 = vld [vmem:[#allocation2 + $0x1144] ss:$16 sps:$4 sm:$0xff]   ;;  %v7907_v11 = vld [vmem:[#allocation2 + $0x114c] ss:$16 sps:$4 sm:$0xff]  }
 0x239   :  { %5061 = vmatpush1.bf16.msra.mxu0 %v7812_v12  ;;  %5553 = vmatpush1.bf16.msra.mxu1 %v7815_v13  ;;  %v7902_v12 = vld [vmem:[#allocation2 + $0x1140] ss:$16 sps:$4 sm:$0xff]   ;;  %v7905_v13 = vld [vmem:[#allocation2 + $0x1148] ss:$16 sps:$4 sm:$0xff]  }
 0x23a   :  { %5062 = vmatprep.subr.bf16.mxu0 %v7820_v14  ;;  %5554 = vmatprep.subr.bf16.mxu1 %v7823_v15  ;;  %v7910_v14 = vld [vmem:[#allocation2 + $0x1164] ss:$16 sps:$4 sm:$0xff]   ;;  %v7913_v15 = vld [vmem:[#allocation2 + $0x116c] ss:$16 sps:$4 sm:$0xff]  }
 0x23d   :  { %5063 = vmatpush1.bf16.msra.mxu0 %v7818_v16  ;;  %5555 = vmatpush1.bf16.msra.mxu1 %v7821_v17  ;;  %v7908_v16 = vld [vmem:[#allocation2 + $0x1160] ss:$16 sps:$4 sm:$0xff]   ;;  %v7911_v17 = vld [vmem:[#allocation2 + $0x1168] ss:$16 sps:$4 sm:$0xff]  }
 0x23e   :  { %5064 = vmatprep.subr.bf16.mxu0 %v7826_v18  ;;  %5556 = vmatprep.subr.bf16.mxu1 %v7829_v19  ;;  %v7916_v18 = vld [vmem:[#allocation2 + $0x1184] ss:$16 sps:$4 sm:$0xff]   ;;  %v7919_v19 = vld [vmem:[#allocation2 + $0x118c] ss:$16 sps:$4 sm:$0xff]  }
 0x241   :  { %5065 = vmatpush1.bf16.msra.mxu0 %v7824_v20  ;;  %5557 = vmatpush1.bf16.msra.mxu1 %v7827_v21  ;;  %v7914_v20 = vld [vmem:[#allocation2 + $0x1180] ss:$16 sps:$4 sm:$0xff]   ;;  %v7917_v21 = vld [vmem:[#allocation2 + $0x1188] ss:$16 sps:$4 sm:$0xff]  }
 0x242   :  { %5066 = vmatprep.subr.bf16.mxu0 %v7832_v22  ;;  %5558 = vmatprep.subr.bf16.mxu1 %v7835_v23  ;;  %v7922_v22 = vld [vmem:[#allocation2 + $0x11a4] ss:$16 sps:$4 sm:$0xff]   ;;  %v7925_v23 = vld [vmem:[#allocation2 + $0x11ac] ss:$16 sps:$4 sm:$0xff]  }
 0x245   :  { %5067 = vmatpush1.bf16.msra.mxu0 %v7830_v24  ;;  %5559 = vmatpush1.bf16.msra.mxu1 %v7833_v25  ;;  %v7920_v24 = vld [vmem:[#allocation2 + $0x11a0] ss:$16 sps:$4 sm:$0xff]   ;;  %v7923_v25 = vld [vmem:[#allocation2 + $0x11a8] ss:$16 sps:$4 sm:$0xff]  }
 0x246   :  { %5068 = vmatprep.subr.bf16.mxu0 %v7838_v26  ;;  %5560 = vmatprep.subr.bf16.mxu1 %v7841_v27  ;;  %v7928_v26 = vld [vmem:[#allocation2 + $0x11c4] ss:$16 sps:$4 sm:$0xff]   ;;  %v7931_v27 = vld [vmem:[#allocation2 + $0x11cc] ss:$16 sps:$4 sm:$0xff]  }
 0x249   :  { %5069 = vmatpush1.bf16.msra.mxu0 %v7836_v28  ;;  %5561 = vmatpush1.bf16.msra.mxu1 %v7839_v29  ;;  %v7926_v28 = vld [vmem:[#allocation2 + $0x11c0] ss:$16 sps:$4 sm:$0xff]   ;;  %v7929_v29 = vld [vmem:[#allocation2 + $0x11c8] ss:$16 sps:$4 sm:$0xff]  }
 0x24a   :  { %5079 = vmatprep.subr.bf16.mxu0 %v7844_v31  ;;  %5571 = vmatprep.subr.bf16.mxu1 %v7847_v32  ;;  %v7937_v31 = vld [vmem:[#allocation2 + $0x11ec] ss:$16 sps:$4 sm:$0xff]   ;;  %v7932_v32 = vld [vmem:[#allocation2 + $0x11e0] ss:$16 sps:$4 sm:$0xff]  }
 0x24c   :  { %5071 = vmatmul.mubr.bf16.vlgmr.msra.gmra.mrb[0].mxu0 %v111_v33  ;;  %5563 = vmatmul.mubr.bf16.vlgmr.msra.gmra.mrb[0].mxu1 %v111_v33  ;;  %v7935_v33 = vld [vmem:[#allocation2 + $0x11e8] ss:$16 sps:$4 sm:$0xff]  }
 0x24d   :  { %5080 = vmatpush1.bf16.msra.mxu0 %v7842_v35  ;;  %5572 = vmatpush1.bf16.msra.mxu1 %v7845_v36  ;;  %v7940_v35 = vld [vmem:[#allocation2 + $0x1204] ss:$16 sps:$4 sm:$0xff]   ;;  %v7943_v36 = vld [vmem:[#allocation2 + $0x120c] ss:$16 sps:$4 sm:$0xff]  }
 0x24e   :  { %5081 = vmatprep.subr.bf16.mxu0 %v7850_v37  ;;  %5573 = vmatprep.subr.bf16.mxu1 %v7853_v38  ;;  %v113_v37 = vpack.c.bf16 %v89_v34, %v89_v34  ;;  %v92_v38 = vld [vmem:[%s8570_s0 + $0x98] sm:$0xff]  ;;  %v8030_v34 = vld [vmem:[#allocation2 + $0x13e4] ss:$16 sps:$4 sm:$0xff]  }
 0x24f   :  { %5111 = vmatprep.mubr.bf16.mxu0 %v114_v39  ;;  %5603 = vmatprep.mubr.bf16.mxu1 %v114_v39  ;;  %v7938_v39 = vld [vmem:[#allocation2 + $0x1200] ss:$16 sps:$4 sm:$0xff]  }
 0x251   :  { %5082 = vmatpush1.bf16.msra.mxu0 %v7848_v40  ;;  %5574 = vmatpush1.bf16.msra.mxu1 %v7851_v41  ;;  %v7941_v40 = vld [vmem:[#allocation2 + $0x1208] ss:$16 sps:$4 sm:$0xff]   ;;  %v7946_v41 = vld [vmem:[#allocation2 + $0x1224] ss:$16 sps:$4 sm:$0xff]  }
 0x252   :  { %5083 = vmatprep.subr.bf16.mxu0 %v7856_v42  ;;  %5575 = vmatprep.subr.bf16.mxu1 %v7859_v43  ;;  %v7949_v42 = vld [vmem:[#allocation2 + $0x122c] ss:$16 sps:$4 sm:$0xff]   ;;  %v116_v43 = vpack.c.bf16 %v92_v38, %v92_v38  ;;  %v91_v38 = vld [vmem:[%s8570_s0 + $0x90] sm:$0xff] }
 0x255   :  { %5084 = vmatpush1.bf16.msra.mxu0 %v7854_v44  ;;  %5576 = vmatpush1.bf16.msra.mxu1 %v7857_v45  ;;  %v7944_v44 = vld [vmem:[#allocation2 + $0x1220] ss:$16 sps:$4 sm:$0xff]   ;;  %v7947_v45 = vld [vmem:[#allocation2 + $0x1228] ss:$16 sps:$4 sm:$0xff]  }
 0x256   :  { %5085 = vmatprep.subr.bf16.mxu0 %v7862_v46  ;;  %5577 = vmatprep.subr.bf16.mxu1 %v7865_v47  ;;  %v7952_v46 = vld [vmem:[#allocation2 + $0x1244] ss:$16 sps:$4 sm:$0xff]   ;;  %v7955_v47 = vld [vmem:[#allocation2 + $0x124c] ss:$16 sps:$4 sm:$0xff]  }
 0x259   :  { %5086 = vmatpush1.bf16.msra.mxu0 %v7860_v48  ;;  %5578 = vmatpush1.bf16.msra.mxu1 %v7863_v49  ;;  %v7950_v48 = vld [vmem:[#allocation2 + $0x1240] ss:$16 sps:$4 sm:$0xff]   ;;  %v7953_v49 = vld [vmem:[#allocation2 + $0x1248] ss:$16 sps:$4 sm:$0xff]  }
 0x25a   :  { %5087 = vmatprep.subr.bf16.mxu0 %v7868_v50  ;;  %5579 = vmatprep.subr.bf16.mxu1 %v7871_v51  ;;  %v7958_v50 = vld [vmem:[#allocation2 + $0x1264] ss:$16 sps:$4 sm:$0xff]   ;;  %v7961_v51 = vld [vmem:[#allocation2 + $0x126c] ss:$16 sps:$4 sm:$0xff]  }
 0x25d   :  { %5088 = vmatpush1.bf16.msra.mxu0 %v7866_v52  ;;  %5580 = vmatpush1.bf16.msra.mxu1 %v7869_v53  ;;  %v7956_v52 = vld [vmem:[#allocation2 + $0x1260] ss:$16 sps:$4 sm:$0xff]   ;;  %v7959_v53 = vld [vmem:[#allocation2 + $0x1268] ss:$16 sps:$4 sm:$0xff]  }
 0x25e   :  { %5089 = vmatprep.subr.bf16.mxu0 %v7874_v54  ;;  %5581 = vmatprep.subr.bf16.mxu1 %v7877_v55  ;;  %v7964_v54 = vld [vmem:[#allocation2 + $0x1284] ss:$16 sps:$4 sm:$0xff]   ;;  %v7967_v55 = vld [vmem:[#allocation2 + $0x128c] ss:$16 sps:$4 sm:$0xff]  }
 0x261   :  { %5090 = vmatpush1.bf16.msra.mxu0 %v7872_v56  ;;  %5582 = vmatpush1.bf16.msra.mxu1 %v7875_v57  ;;  %v7962_v56 = vld [vmem:[#allocation2 + $0x1280] ss:$16 sps:$4 sm:$0xff]   ;;  %v7965_v57 = vld [vmem:[#allocation2 + $0x1288] ss:$16 sps:$4 sm:$0xff]  }
 0x262   :  { %5091 = vmatprep.subr.bf16.mxu0 %v7880_v58  ;;  %5583 = vmatprep.subr.bf16.mxu1 %v7883_v59  ;;  %v7970_v58 = vld [vmem:[#allocation2 + $0x12a4] ss:$16 sps:$4 sm:$0xff]   ;;  %v7973_v59 = vld [vmem:[#allocation2 + $0x12ac] ss:$16 sps:$4 sm:$0xff]  }
 0x265   :  { %5092 = vmatpush1.bf16.msra.mxu0 %v7878_v60  ;;  %5584 = vmatpush1.bf16.msra.mxu1 %v7881_v61  ;;  %v7968_v60 = vld [vmem:[#allocation2 + $0x12a0] ss:$16 sps:$4 sm:$0xff]   ;;  %v7971_v61 = vld [vmem:[#allocation2 + $0x12a8] ss:$16 sps:$4 sm:$0xff]  }
 0x266   :  { %5093 = vmatprep.subr.bf16.mxu0 %v7886_v62  ;;  %5585 = vmatprep.subr.bf16.mxu1 %v7889_v63  ;;  %v7976_v62 = vld [vmem:[#allocation2 + $0x12c4] ss:$16 sps:$4 sm:$0xff]   ;;  %v7979_v63 = vld [vmem:[#allocation2 + $0x12cc] ss:$16 sps:$4 sm:$0xff]  }
 0x269   :  { %5094 = vmatpush1.bf16.msra.mxu0 %v7884_v0  ;;  %5586 = vmatpush1.bf16.msra.mxu1 %v7887_v1  ;;  %v7974_v0 = vld [vmem:[#allocation2 + $0x12c0] ss:$16 sps:$4 sm:$0xff]   ;;  %v7977_v1 = vld [vmem:[#allocation2 + $0x12c8] ss:$16 sps:$4 sm:$0xff]  }
 0x26a   :  { %5095 = vmatprep.subr.bf16.mxu0 %v7892_v2  ;;  %5587 = vmatprep.subr.bf16.mxu1 %v7895_v3  ;;  %v7982_v2 = vld [vmem:[#allocation2 + $0x12e4] ss:$16 sps:$4 sm:$0xff]   ;;  %v7985_v3 = vld [vmem:[#allocation2 + $0x12ec] ss:$16 sps:$4 sm:$0xff]  }
 0x26d   :  { %5096 = vmatpush1.bf16.msra.mxu0 %v7890_v4  ;;  %5588 = vmatpush1.bf16.msra.mxu1 %v7893_v5  ;;  %v7980_v4 = vld [vmem:[#allocation2 + $0x12e0] ss:$16 sps:$4 sm:$0xff]   ;;  %v7983_v5 = vld [vmem:[#allocation2 + $0x12e8] ss:$16 sps:$4 sm:$0xff]  }
 0x26e   :  { %5097 = vmatprep.subr.bf16.mxu0 %v7898_v6  ;;  %5589 = vmatprep.subr.bf16.mxu1 %v7901_v7  ;;  %v7988_v6 = vld [vmem:[#allocation2 + $0x1304] ss:$16 sps:$4 sm:$0xff]   ;;  %v7991_v7 = vld [vmem:[#allocation2 + $0x130c] ss:$16 sps:$4 sm:$0xff]  }
 0x271   :  { %5098 = vmatpush1.bf16.msra.mxu0 %v7896_v8  ;;  %5590 = vmatpush1.bf16.msra.mxu1 %v7899_v9  ;;  %v7986_v8 = vld [vmem:[#allocation2 + $0x1300] ss:$16 sps:$4 sm:$0xff]   ;;  %v7989_v9 = vld [vmem:[#allocation2 + $0x1308] ss:$16 sps:$4 sm:$0xff]  }
 0x272   :  { %5099 = vmatprep.subr.bf16.mxu0 %v7904_v10  ;;  %5591 = vmatprep.subr.bf16.mxu1 %v7907_v11  ;;  %v7994_v10 = vld [vmem:[#allocation2 + $0x1324] ss:$16 sps:$4 sm:$0xff]   ;;  %v7997_v11 = vld [vmem:[#allocation2 + $0x132c] ss:$16 sps:$4 sm:$0xff]  }
 0x275   :  { %5100 = vmatpush1.bf16.msra.mxu0 %v7902_v12  ;;  %5592 = vmatpush1.bf16.msra.mxu1 %v7905_v13  ;;  %v7992_v12 = vld [vmem:[#allocation2 + $0x1320] ss:$16 sps:$4 sm:$0xff]   ;;  %v7995_v13 = vld [vmem:[#allocation2 + $0x1328] ss:$16 sps:$4 sm:$0xff]  }
 0x276   :  { %5101 = vmatprep.subr.bf16.mxu0 %v7910_v14  ;;  %5593 = vmatprep.subr.bf16.mxu1 %v7913_v15  ;;  %v8000_v14 = vld [vmem:[#allocation2 + $0x1344] ss:$16 sps:$4 sm:$0xff]   ;;  %v8003_v15 = vld [vmem:[#allocation2 + $0x134c] ss:$16 sps:$4 sm:$0xff]  }
 0x279   :  { %5102 = vmatpush1.bf16.msra.mxu0 %v7908_v16  ;;  %5594 = vmatpush1.bf16.msra.mxu1 %v7911_v17  ;;  %v7998_v16 = vld [vmem:[#allocation2 + $0x1340] ss:$16 sps:$4 sm:$0xff]   ;;  %v8001_v17 = vld [vmem:[#allocation2 + $0x1348] ss:$16 sps:$4 sm:$0xff]  }
 0x27a   :  { %5103 = vmatprep.subr.bf16.mxu0 %v7916_v18  ;;  %5595 = vmatprep.subr.bf16.mxu1 %v7919_v19  ;;  %v8006_v18 = vld [vmem:[#allocation2 + $0x1364] ss:$16 sps:$4 sm:$0xff]   ;;  %v8009_v19 = vld [vmem:[#allocation2 + $0x136c] ss:$16 sps:$4 sm:$0xff]  }
 0x27d   :  { %5104 = vmatpush1.bf16.msra.mxu0 %v7914_v20  ;;  %5596 = vmatpush1.bf16.msra.mxu1 %v7917_v21  ;;  %v8004_v20 = vld [vmem:[#allocation2 + $0x1360] ss:$16 sps:$4 sm:$0xff]   ;;  %v8007_v21 = vld [vmem:[#allocation2 + $0x1368] ss:$16 sps:$4 sm:$0xff]  }
 0x27e   :  { %5105 = vmatprep.subr.bf16.mxu0 %v7922_v22  ;;  %5597 = vmatprep.subr.bf16.mxu1 %v7925_v23  ;;  %v8012_v22 = vld [vmem:[#allocation2 + $0x1384] ss:$16 sps:$4 sm:$0xff]   ;;  %v8015_v23 = vld [vmem:[#allocation2 + $0x138c] ss:$16 sps:$4 sm:$0xff]  }
 0x281   :  { %5106 = vmatpush1.bf16.msra.mxu0 %v7920_v24  ;;  %5598 = vmatpush1.bf16.msra.mxu1 %v7923_v25  ;;  %v8010_v24 = vld [vmem:[#allocation2 + $0x1380] ss:$16 sps:$4 sm:$0xff]   ;;  %v8013_v25 = vld [vmem:[#allocation2 + $0x1388] ss:$16 sps:$4 sm:$0xff]  }
 0x282   :  { %5107 = vmatprep.subr.bf16.mxu0 %v7928_v26  ;;  %5599 = vmatprep.subr.bf16.mxu1 %v7931_v27  ;;  %v8018_v26 = vld [vmem:[#allocation2 + $0x13a4] ss:$16 sps:$4 sm:$0xff]   ;;  %v8021_v27 = vld [vmem:[#allocation2 + $0x13ac] ss:$16 sps:$4 sm:$0xff]  }
 0x285   :  { %5108 = vmatpush1.bf16.msra.mxu0 %v7926_v28  ;;  %5600 = vmatpush1.bf16.msra.mxu1 %v7929_v29  ;;  %v8016_v28 = vld [vmem:[#allocation2 + $0x13a0] ss:$16 sps:$4 sm:$0xff]   ;;  %v8019_v29 = vld [vmem:[#allocation2 + $0x13a8] ss:$16 sps:$4 sm:$0xff]  }
 0x286   :  { %5109 = vmatprep.subr.bf16.mxu0 %v7934_v30  ;;  %5601 = vmatprep.subr.bf16.mxu1 %v7937_v31  ;;  %v8024_v30 = vld [vmem:[#allocation2 + $0x13c4] ss:$16 sps:$4 sm:$0xff]   ;;  %v8027_v31 = vld [vmem:[#allocation2 + $0x13cc] ss:$16 sps:$4 sm:$0xff]  }
 0x289   :  { %5110 = vmatpush1.bf16.msra.mxu0 %v7932_v32  ;;  %5602 = vmatpush1.bf16.msra.mxu1 %v7935_v33  ;;  %v8022_v32 = vld [vmem:[#allocation2 + $0x13c0] ss:$16 sps:$4 sm:$0xff]   ;;  %v8025_v33 = vld [vmem:[#allocation2 + $0x13c8] ss:$16 sps:$4 sm:$0xff]  }
 0x28a   :  { %5120 = vmatprep.subr.bf16.mxu0 %v7940_v35  ;;  %5612 = vmatprep.subr.bf16.mxu1 %v7943_v36  ;;  %v8033_v35 = vld [vmem:[#allocation2 + $0x13ec] ss:$16 sps:$4 sm:$0xff]   ;;  %v8028_v36 = vld [vmem:[#allocation2 + $0x13e0] ss:$16 sps:$4 sm:$0xff]  }
 0x28c   :  { %5112 = vmatmul.mubr.bf16.vlgmr.msra.gmra.mrb[0].mxu0 %v113_v37  ;;  %5604 = vmatmul.mubr.bf16.vlgmr.msra.gmra.mrb[0].mxu1 %v113_v37  ;;  %v8031_v37 = vld [vmem:[#allocation2 + $0x13e8] ss:$16 sps:$4 sm:$0xff]  }
 0x28d   :  { %5121 = vmatpush1.bf16.msra.mxu0 %v7938_v39  ;;  %5613 = vmatpush1.bf16.msra.mxu1 %v7941_v40  ;;  %v8036_v39 = vld [vmem:[#allocation2 + $0x1404] ss:$16 sps:$4 sm:$0xff]   ;;  %v8039_v40 = vld [vmem:[#allocation2 + $0x140c] ss:$16 sps:$4 sm:$0xff]  }
 0x28e   :  { %5122 = vmatprep.subr.bf16.mxu0 %v7946_v41  ;;  %5614 = vmatprep.subr.bf16.mxu1 %v7949_v42  ;;  %v115_v41 = vpack.c.bf16 %v91_v38, %v91_v38  ;;  %v94_v42 = vld [vmem:[%s8570_s0 + $0xa8] sm:$0xff]  ;;  %v8126_v38 = vld [vmem:[#allocation2 + $0x15e4] ss:$16 sps:$4 sm:$0xff]  }
 0x28f   :  { %5152 = vmatprep.mubr.bf16.mxu0 %v116_v43  ;;  %5644 = vmatprep.mubr.bf16.mxu1 %v116_v43  ;;  %v8034_v43 = vld [vmem:[#allocation2 + $0x1400] ss:$16 sps:$4 sm:$0xff]  }
 0x291   :  { %5123 = vmatpush1.bf16.msra.mxu0 %v7944_v44  ;;  %5615 = vmatpush1.bf16.msra.mxu1 %v7947_v45  ;;  %v8037_v44 = vld [vmem:[#allocation2 + $0x1408] ss:$16 sps:$4 sm:$0xff]   ;;  %v8042_v45 = vld [vmem:[#allocation2 + $0x1424] ss:$16 sps:$4 sm:$0xff]  }
 0x292   :  { %5124 = vmatprep.subr.bf16.mxu0 %v7952_v46  ;;  %5616 = vmatprep.subr.bf16.mxu1 %v7955_v47  ;;  %v8045_v46 = vld [vmem:[#allocation2 + $0x142c] ss:$16 sps:$4 sm:$0xff]   ;;  %v118_v47 = vpack.c.bf16 %v94_v42, %v94_v42  ;;  %v93_v42 = vld [vmem:[%s8570_s0 + $0xa0] sm:$0xff] }
 0x295   :  { %5125 = vmatpush1.bf16.msra.mxu0 %v7950_v48  ;;  %5617 = vmatpush1.bf16.msra.mxu1 %v7953_v49  ;;  %v8040_v48 = vld [vmem:[#allocation2 + $0x1420] ss:$16 sps:$4 sm:$0xff]   ;;  %v8043_v49 = vld [vmem:[#allocation2 + $0x1428] ss:$16 sps:$4 sm:$0xff]  }
 0x296   :  { %5126 = vmatprep.subr.bf16.mxu0 %v7958_v50  ;;  %5618 = vmatprep.subr.bf16.mxu1 %v7961_v51  ;;  %v8048_v50 = vld [vmem:[#allocation2 + $0x1444] ss:$16 sps:$4 sm:$0xff]   ;;  %v8051_v51 = vld [vmem:[#allocation2 + $0x144c] ss:$16 sps:$4 sm:$0xff]  }
 0x299   :  { %5127 = vmatpush1.bf16.msra.mxu0 %v7956_v52  ;;  %5619 = vmatpush1.bf16.msra.mxu1 %v7959_v53  ;;  %v8046_v52 = vld [vmem:[#allocation2 + $0x1440] ss:$16 sps:$4 sm:$0xff]   ;;  %v8049_v53 = vld [vmem:[#allocation2 + $0x1448] ss:$16 sps:$4 sm:$0xff]  }
 0x29a   :  { %5128 = vmatprep.subr.bf16.mxu0 %v7964_v54  ;;  %5620 = vmatprep.subr.bf16.mxu1 %v7967_v55  ;;  %v8054_v54 = vld [vmem:[#allocation2 + $0x1464] ss:$16 sps:$4 sm:$0xff]   ;;  %v8057_v55 = vld [vmem:[#allocation2 + $0x146c] ss:$16 sps:$4 sm:$0xff]  }
 0x29d   :  { %5129 = vmatpush1.bf16.msra.mxu0 %v7962_v56  ;;  %5621 = vmatpush1.bf16.msra.mxu1 %v7965_v57  ;;  %v8052_v56 = vld [vmem:[#allocation2 + $0x1460] ss:$16 sps:$4 sm:$0xff]   ;;  %v8055_v57 = vld [vmem:[#allocation2 + $0x1468] ss:$16 sps:$4 sm:$0xff]  }
 0x29e   :  { %5130 = vmatprep.subr.bf16.mxu0 %v7970_v58  ;;  %5622 = vmatprep.subr.bf16.mxu1 %v7973_v59  ;;  %v8060_v58 = vld [vmem:[#allocation2 + $0x1484] ss:$16 sps:$4 sm:$0xff]   ;;  %v8063_v59 = vld [vmem:[#allocation2 + $0x148c] ss:$16 sps:$4 sm:$0xff]  }
 0x2a1   :  { %5131 = vmatpush1.bf16.msra.mxu0 %v7968_v60  ;;  %5623 = vmatpush1.bf16.msra.mxu1 %v7971_v61  ;;  %v8058_v60 = vld [vmem:[#allocation2 + $0x1480] ss:$16 sps:$4 sm:$0xff]   ;;  %v8061_v61 = vld [vmem:[#allocation2 + $0x1488] ss:$16 sps:$4 sm:$0xff]  }
 0x2a2   :  { %5132 = vmatprep.subr.bf16.mxu0 %v7976_v62  ;;  %5624 = vmatprep.subr.bf16.mxu1 %v7979_v63  ;;  %v8066_v62 = vld [vmem:[#allocation2 + $0x14a4] ss:$16 sps:$4 sm:$0xff]   ;;  %v8069_v63 = vld [vmem:[#allocation2 + $0x14ac] ss:$16 sps:$4 sm:$0xff]  }
 0x2a5   :  { %5133 = vmatpush1.bf16.msra.mxu0 %v7974_v0  ;;  %5625 = vmatpush1.bf16.msra.mxu1 %v7977_v1  ;;  %v8064_v0 = vld [vmem:[#allocation2 + $0x14a0] ss:$16 sps:$4 sm:$0xff]   ;;  %v8067_v1 = vld [vmem:[#allocation2 + $0x14a8] ss:$16 sps:$4 sm:$0xff]  }
 0x2a6   :  { %5134 = vmatprep.subr.bf16.mxu0 %v7982_v2  ;;  %5626 = vmatprep.subr.bf16.mxu1 %v7985_v3  ;;  %v8072_v2 = vld [vmem:[#allocation2 + $0x14c4] ss:$16 sps:$4 sm:$0xff]   ;;  %v8075_v3 = vld [vmem:[#allocation2 + $0x14cc] ss:$16 sps:$4 sm:$0xff]  }
 0x2a9   :  { %5135 = vmatpush1.bf16.msra.mxu0 %v7980_v4  ;;  %5627 = vmatpush1.bf16.msra.mxu1 %v7983_v5  ;;  %v8070_v4 = vld [vmem:[#allocation2 + $0x14c0] ss:$16 sps:$4 sm:$0xff]   ;;  %v8073_v5 = vld [vmem:[#allocation2 + $0x14c8] ss:$16 sps:$4 sm:$0xff]  }
 0x2aa   :  { %5136 = vmatprep.subr.bf16.mxu0 %v7988_v6  ;;  %5628 = vmatprep.subr.bf16.mxu1 %v7991_v7  ;;  %v8078_v6 = vld [vmem:[#allocation2 + $0x14e4] ss:$16 sps:$4 sm:$0xff]   ;;  %v8081_v7 = vld [vmem:[#allocation2 + $0x14ec] ss:$16 sps:$4 sm:$0xff]  }
 0x2ad   :  { %5137 = vmatpush1.bf16.msra.mxu0 %v7986_v8  ;;  %5629 = vmatpush1.bf16.msra.mxu1 %v7989_v9  ;;  %v8076_v8 = vld [vmem:[#allocation2 + $0x14e0] ss:$16 sps:$4 sm:$0xff]   ;;  %v8079_v9 = vld [vmem:[#allocation2 + $0x14e8] ss:$16 sps:$4 sm:$0xff]  }
 0x2ae   :  { %5138 = vmatprep.subr.bf16.mxu0 %v7994_v10  ;;  %5630 = vmatprep.subr.bf16.mxu1 %v7997_v11  ;;  %v8084_v10 = vld [vmem:[#allocation2 + $0x1504] ss:$16 sps:$4 sm:$0xff]   ;;  %v8087_v11 = vld [vmem:[#allocation2 + $0x150c] ss:$16 sps:$4 sm:$0xff]  }
 0x2b1   :  { %5139 = vmatpush1.bf16.msra.mxu0 %v7992_v12  ;;  %5631 = vmatpush1.bf16.msra.mxu1 %v7995_v13  ;;  %v8082_v12 = vld [vmem:[#allocation2 + $0x1500] ss:$16 sps:$4 sm:$0xff]   ;;  %v8085_v13 = vld [vmem:[#allocation2 + $0x1508] ss:$16 sps:$4 sm:$0xff]  }
 0x2b2   :  { %5140 = vmatprep.subr.bf16.mxu0 %v8000_v14  ;;  %5632 = vmatprep.subr.bf16.mxu1 %v8003_v15  ;;  %v8090_v14 = vld [vmem:[#allocation2 + $0x1524] ss:$16 sps:$4 sm:$0xff]   ;;  %v8093_v15 = vld [vmem:[#allocation2 + $0x152c] ss:$16 sps:$4 sm:$0xff]  }
 0x2b5   :  { %5141 = vmatpush1.bf16.msra.mxu0 %v7998_v16  ;;  %5633 = vmatpush1.bf16.msra.mxu1 %v8001_v17  ;;  %v8088_v16 = vld [vmem:[#allocation2 + $0x1520] ss:$16 sps:$4 sm:$0xff]   ;;  %v8091_v17 = vld [vmem:[#allocation2 + $0x1528] ss:$16 sps:$4 sm:$0xff]  }
 0x2b6   :  { %5142 = vmatprep.subr.bf16.mxu0 %v8006_v18  ;;  %5634 = vmatprep.subr.bf16.mxu1 %v8009_v19  ;;  %v8096_v18 = vld [vmem:[#allocation2 + $0x1544] ss:$16 sps:$4 sm:$0xff]   ;;  %v8099_v19 = vld [vmem:[#allocation2 + $0x154c] ss:$16 sps:$4 sm:$0xff]  }
 0x2b9   :  { %5143 = vmatpush1.bf16.msra.mxu0 %v8004_v20  ;;  %5635 = vmatpush1.bf16.msra.mxu1 %v8007_v21  ;;  %v8094_v20 = vld [vmem:[#allocation2 + $0x1540] ss:$16 sps:$4 sm:$0xff]   ;;  %v8097_v21 = vld [vmem:[#allocation2 + $0x1548] ss:$16 sps:$4 sm:$0xff]  }
 0x2ba   :  { %5144 = vmatprep.subr.bf16.mxu0 %v8012_v22  ;;  %5636 = vmatprep.subr.bf16.mxu1 %v8015_v23  ;;  %v8102_v22 = vld [vmem:[#allocation2 + $0x1564] ss:$16 sps:$4 sm:$0xff]   ;;  %v8105_v23 = vld [vmem:[#allocation2 + $0x156c] ss:$16 sps:$4 sm:$0xff]  }
 0x2bd   :  { %5145 = vmatpush1.bf16.msra.mxu0 %v8010_v24  ;;  %5637 = vmatpush1.bf16.msra.mxu1 %v8013_v25  ;;  %v8100_v24 = vld [vmem:[#allocation2 + $0x1560] ss:$16 sps:$4 sm:$0xff]   ;;  %v8103_v25 = vld [vmem:[#allocation2 + $0x1568] ss:$16 sps:$4 sm:$0xff]  }
 0x2be   :  { %5146 = vmatprep.subr.bf16.mxu0 %v8018_v26  ;;  %5638 = vmatprep.subr.bf16.mxu1 %v8021_v27  ;;  %v8108_v26 = vld [vmem:[#allocation2 + $0x1584] ss:$16 sps:$4 sm:$0xff]   ;;  %v8111_v27 = vld [vmem:[#allocation2 + $0x158c] ss:$16 sps:$4 sm:$0xff]  }
 0x2c1   :  { %5147 = vmatpush1.bf16.msra.mxu0 %v8016_v28  ;;  %5639 = vmatpush1.bf16.msra.mxu1 %v8019_v29  ;;  %v8106_v28 = vld [vmem:[#allocation2 + $0x1580] ss:$16 sps:$4 sm:$0xff]   ;;  %v8109_v29 = vld [vmem:[#allocation2 + $0x1588] ss:$16 sps:$4 sm:$0xff]  }
 0x2c2   :  { %5148 = vmatprep.subr.bf16.mxu0 %v8024_v30  ;;  %5640 = vmatprep.subr.bf16.mxu1 %v8027_v31  ;;  %v8114_v30 = vld [vmem:[#allocation2 + $0x15a4] ss:$16 sps:$4 sm:$0xff]   ;;  %v8117_v31 = vld [vmem:[#allocation2 + $0x15ac] ss:$16 sps:$4 sm:$0xff]  }
 0x2c5   :  { %5149 = vmatpush1.bf16.msra.mxu0 %v8022_v32  ;;  %5641 = vmatpush1.bf16.msra.mxu1 %v8025_v33  ;;  %v8112_v32 = vld [vmem:[#allocation2 + $0x15a0] ss:$16 sps:$4 sm:$0xff]   ;;  %v8115_v33 = vld [vmem:[#allocation2 + $0x15a8] ss:$16 sps:$4 sm:$0xff]  }
 0x2c6   :  { %5150 = vmatprep.subr.bf16.mxu0 %v8030_v34  ;;  %5642 = vmatprep.subr.bf16.mxu1 %v8033_v35  ;;  %v8120_v34 = vld [vmem:[#allocation2 + $0x15c4] ss:$16 sps:$4 sm:$0xff]   ;;  %v8123_v35 = vld [vmem:[#allocation2 + $0x15cc] ss:$16 sps:$4 sm:$0xff]  }
 0x2c9   :  { %5151 = vmatpush1.bf16.msra.mxu0 %v8028_v36  ;;  %5643 = vmatpush1.bf16.msra.mxu1 %v8031_v37  ;;  %v8118_v36 = vld [vmem:[#allocation2 + $0x15c0] ss:$16 sps:$4 sm:$0xff]   ;;  %v8121_v37 = vld [vmem:[#allocation2 + $0x15c8] ss:$16 sps:$4 sm:$0xff]  }
 0x2ca   :  { %5161 = vmatprep.subr.bf16.mxu0 %v8036_v39  ;;  %5653 = vmatprep.subr.bf16.mxu1 %v8039_v40  ;;  %v8129_v39 = vld [vmem:[#allocation2 + $0x15ec] ss:$16 sps:$4 sm:$0xff]   ;;  %v8124_v40 = vld [vmem:[#allocation2 + $0x15e0] ss:$16 sps:$4 sm:$0xff]  }
 0x2cc   :  { %5153 = vmatmul.mubr.bf16.vlgmr.msra.gmra.mrb[0].mxu0 %v115_v41  ;;  %5645 = vmatmul.mubr.bf16.vlgmr.msra.gmra.mrb[0].mxu1 %v115_v41  ;;  %v8127_v41 = vld [vmem:[#allocation2 + $0x15e8] ss:$16 sps:$4 sm:$0xff]  }
 0x2cd   :  { %5162 = vmatpush1.bf16.msra.mxu0 %v8034_v43  ;;  %5654 = vmatpush1.bf16.msra.mxu1 %v8037_v44  ;;  %v8132_v43 = vld [vmem:[#allocation2 + $0x1604] ss:$16 sps:$4 sm:$0xff]   ;;  %v8135_v44 = vld [vmem:[#allocation2 + $0x160c] ss:$16 sps:$4 sm:$0xff]  }
 0x2ce   :  { %5163 = vmatprep.subr.bf16.mxu0 %v8042_v45  ;;  %5655 = vmatprep.subr.bf16.mxu1 %v8045_v46  ;;  %v117_v45 = vpack.c.bf16 %v93_v42, %v93_v42  ;;  %v96_v46 = vld [vmem:[%s8570_s0 + $0xb8] sm:$0xff]  ;;  %v8222_v42 = vld [vmem:[#allocation2 + $0x17e4] ss:$16 sps:$4 sm:$0xff]  }
 0x2cf   :  { %5193 = vmatprep.mubr.bf16.mxu0 %v118_v47  ;;  %5685 = vmatprep.mubr.bf16.mxu1 %v118_v47  ;;  %v8130_v47 = vld [vmem:[#allocation2 + $0x1600] ss:$16 sps:$4 sm:$0xff]  }
 0x2d1   :  { %5164 = vmatpush1.bf16.msra.mxu0 %v8040_v48  ;;  %5656 = vmatpush1.bf16.msra.mxu1 %v8043_v49  ;;  %v8133_v48 = vld [vmem:[#allocation2 + $0x1608] ss:$16 sps:$4 sm:$0xff]   ;;  %v8138_v49 = vld [vmem:[#allocation2 + $0x1624] ss:$16 sps:$4 sm:$0xff]  }
 0x2d2   :  { %5165 = vmatprep.subr.bf16.mxu0 %v8048_v50  ;;  %5657 = vmatprep.subr.bf16.mxu1 %v8051_v51  ;;  %v8141_v50 = vld [vmem:[#allocation2 + $0x162c] ss:$16 sps:$4 sm:$0xff]   ;;  %v120_v51 = vpack.c.bf16 %v96_v46, %v96_v46  ;;  %v95_v46 = vld [vmem:[%s8570_s0 + $0xb0] sm:$0xff]  ;;  %s8400_s0 = smov [#allocation10]  }
 0x2d3   :  { %s6113_s9 = sshll.u32 %s8400_s0, 4  ;;  %s6114_s9 = int_to_ptr.vmem [resolvable:$true] %s6113_s9 }
 0x2d4   :  { %s8362_s10 = scalar_lea.vmem %s6114_s9, 128  ;;  %p8367_p5 = scmp.lt.s32.totalorder %s6114_s9, %s6114_s9 }
 0x2d5   :  { %5166 = vmatpush1.bf16.msra.mxu0 %v8046_v52  ;;  %5658 = vmatpush1.bf16.msra.mxu1 %v8049_v53  ;;  %v8136_v52 = vld [vmem:[#allocation2 + $0x1620] ss:$16 sps:$4 sm:$0xff]   ;;  %v8139_v53 = vld [vmem:[#allocation2 + $0x1628] ss:$16 sps:$4 sm:$0xff]   ;;  %p8363_p4 = scmp.ne.s32.totalorder %s6114_s9, %s8362_s10  ;;  %p8368_p6 = scmp.lt.s32.totalorder %s8362_s10, %s8362_s10 }
 0x2d6   :  { %5167 = vmatprep.subr.bf16.mxu0 %v8054_v54  ;;  %5659 = vmatprep.subr.bf16.mxu1 %v8057_v55  ;;  %v8144_v54 = vld [vmem:[#allocation2 + $0x1644] ss:$16 sps:$4 sm:$0xff]   ;;  %v8147_v55 = vld [vmem:[#allocation2 + $0x164c] ss:$16 sps:$4 sm:$0xff]  }
 0x2d7   :  { %p8369_p7 = por %p8368_p6, %p8367_p5 }
 0x2d9   :  { %5168 = vmatpush1.bf16.msra.mxu0 %v8052_v56  ;;  %5660 = vmatpush1.bf16.msra.mxu1 %v8055_v57  ;;  %v8142_v56 = vld [vmem:[#allocation2 + $0x1640] ss:$16 sps:$4 sm:$0xff]   ;;  %v8145_v57 = vld [vmem:[#allocation2 + $0x1648] ss:$16 sps:$4 sm:$0xff]   ;;  %p8370_p8 = pnand %p8369_p7, %p8363_p4 }
 0x2da   :  { %5169 = vmatprep.subr.bf16.mxu0 %v8060_v58  ;;  %5661 = vmatprep.subr.bf16.mxu1 %v8063_v59  ;;  %v8150_v58 = vld [vmem:[#allocation2 + $0x1664] ss:$16 sps:$4 sm:$0xff]   ;;  %v8153_v59 = vld [vmem:[#allocation2 + $0x166c] ss:$16 sps:$4 sm:$0xff]  }
 0x2dd   :  { %5170 = vmatpush1.bf16.msra.mxu0 %v8058_v60  ;;  %5662 = vmatpush1.bf16.msra.mxu1 %v8061_v61  ;;  %v8148_v60 = vld [vmem:[#allocation2 + $0x1660] ss:$16 sps:$4 sm:$0xff]   ;;  %v8151_v61 = vld [vmem:[#allocation2 + $0x1668] ss:$16 sps:$4 sm:$0xff]  }
 0x2de   :  { %5171 = vmatprep.subr.bf16.mxu0 %v8066_v62  ;;  %5663 = vmatprep.subr.bf16.mxu1 %v8069_v63  ;;  %v8156_v62 = vld [vmem:[#allocation2 + $0x1684] ss:$16 sps:$4 sm:$0xff]   ;;  %v8159_v63 = vld [vmem:[#allocation2 + $0x168c] ss:$16 sps:$4 sm:$0xff]  }
 0x2e1   :  { %5172 = vmatpush1.bf16.msra.mxu0 %v8064_v0  ;;  %5664 = vmatpush1.bf16.msra.mxu1 %v8067_v1  ;;  %v8154_v0 = vld [vmem:[#allocation2 + $0x1680] ss:$16 sps:$4 sm:$0xff]   ;;  %v8157_v1 = vld [vmem:[#allocation2 + $0x1688] ss:$16 sps:$4 sm:$0xff]  }
 0x2e2   :  { %5173 = vmatprep.subr.bf16.mxu0 %v8072_v2  ;;  %5665 = vmatprep.subr.bf16.mxu1 %v8075_v3  ;;  %v8162_v2 = vld [vmem:[#allocation2 + $0x16a4] ss:$16 sps:$4 sm:$0xff]   ;;  %v8165_v3 = vld [vmem:[#allocation2 + $0x16ac] ss:$16 sps:$4 sm:$0xff]  }
 0x2e5   :  { %5174 = vmatpush1.bf16.msra.mxu0 %v8070_v4  ;;  %5666 = vmatpush1.bf16.msra.mxu1 %v8073_v5  ;;  %v8160_v4 = vld [vmem:[#allocation2 + $0x16a0] ss:$16 sps:$4 sm:$0xff]   ;;  %v8163_v5 = vld [vmem:[#allocation2 + $0x16a8] ss:$16 sps:$4 sm:$0xff]  }
 0x2e6   :  { %5175 = vmatprep.subr.bf16.mxu0 %v8078_v6  ;;  %5667 = vmatprep.subr.bf16.mxu1 %v8081_v7  ;;  %v8168_v6 = vld [vmem:[#allocation2 + $0x16c4] ss:$16 sps:$4 sm:$0xff]   ;;  %v8171_v7 = vld [vmem:[#allocation2 + $0x16cc] ss:$16 sps:$4 sm:$0xff]  }
 0x2e9   :  { %5176 = vmatpush1.bf16.msra.mxu0 %v8076_v8  ;;  %5668 = vmatpush1.bf16.msra.mxu1 %v8079_v9  ;;  %v8166_v8 = vld [vmem:[#allocation2 + $0x16c0] ss:$16 sps:$4 sm:$0xff]   ;;  %v8169_v9 = vld [vmem:[#allocation2 + $0x16c8] ss:$16 sps:$4 sm:$0xff]  }
 0x2ea   :  { %5177 = vmatprep.subr.bf16.mxu0 %v8084_v10  ;;  %5669 = vmatprep.subr.bf16.mxu1 %v8087_v11  ;;  %v8174_v10 = vld [vmem:[#allocation2 + $0x16e4] ss:$16 sps:$4 sm:$0xff]   ;;  %v8177_v11 = vld [vmem:[#allocation2 + $0x16ec] ss:$16 sps:$4 sm:$0xff]  }
 0x2ed   :  { %5178 = vmatpush1.bf16.msra.mxu0 %v8082_v12  ;;  %5670 = vmatpush1.bf16.msra.mxu1 %v8085_v13  ;;  %v8172_v12 = vld [vmem:[#allocation2 + $0x16e0] ss:$16 sps:$4 sm:$0xff]   ;;  %v8175_v13 = vld [vmem:[#allocation2 + $0x16e8] ss:$16 sps:$4 sm:$0xff]  }
 0x2ee   :  { %5179 = vmatprep.subr.bf16.mxu0 %v8090_v14  ;;  %5671 = vmatprep.subr.bf16.mxu1 %v8093_v15  ;;  %v8180_v14 = vld [vmem:[#allocation2 + $0x1704] ss:$16 sps:$4 sm:$0xff]   ;;  %v8183_v15 = vld [vmem:[#allocation2 + $0x170c] ss:$16 sps:$4 sm:$0xff]  }
 0x2f1   :  { %5180 = vmatpush1.bf16.msra.mxu0 %v8088_v16  ;;  %5672 = vmatpush1.bf16.msra.mxu1 %v8091_v17  ;;  %v8178_v16 = vld [vmem:[#allocation2 + $0x1700] ss:$16 sps:$4 sm:$0xff]   ;;  %v8181_v17 = vld [vmem:[#allocation2 + $0x1708] ss:$16 sps:$4 sm:$0xff]  }
 0x2f2   :  { %5181 = vmatprep.subr.bf16.mxu0 %v8096_v18  ;;  %5673 = vmatprep.subr.bf16.mxu1 %v8099_v19  ;;  %v8186_v18 = vld [vmem:[#allocation2 + $0x1724] ss:$16 sps:$4 sm:$0xff]   ;;  %v8189_v19 = vld [vmem:[#allocation2 + $0x172c] ss:$16 sps:$4 sm:$0xff]  }
 0x2f5   :  { %5182 = vmatpush1.bf16.msra.mxu0 %v8094_v20  ;;  %5674 = vmatpush1.bf16.msra.mxu1 %v8097_v21  ;;  %v8184_v20 = vld [vmem:[#allocation2 + $0x1720] ss:$16 sps:$4 sm:$0xff]   ;;  %v8187_v21 = vld [vmem:[#allocation2 + $0x1728] ss:$16 sps:$4 sm:$0xff]  }
 0x2f6   :  { %5183 = vmatprep.subr.bf16.mxu0 %v8102_v22  ;;  %5675 = vmatprep.subr.bf16.mxu1 %v8105_v23  ;;  %v8192_v22 = vld [vmem:[#allocation2 + $0x1744] ss:$16 sps:$4 sm:$0xff]   ;;  %v8195_v23 = vld [vmem:[#allocation2 + $0x174c] ss:$16 sps:$4 sm:$0xff]  }
 0x2f9   :  { %5184 = vmatpush1.bf16.msra.mxu0 %v8100_v24  ;;  %5676 = vmatpush1.bf16.msra.mxu1 %v8103_v25  ;;  %v8190_v24 = vld [vmem:[#allocation2 + $0x1740] ss:$16 sps:$4 sm:$0xff]   ;;  %v8193_v25 = vld [vmem:[#allocation2 + $0x1748] ss:$16 sps:$4 sm:$0xff]  }
 0x2fa   :  { %5185 = vmatprep.subr.bf16.mxu0 %v8108_v26  ;;  %5677 = vmatprep.subr.bf16.mxu1 %v8111_v27  ;;  %v8198_v26 = vld [vmem:[#allocation2 + $0x1764] ss:$16 sps:$4 sm:$0xff]   ;;  %v8201_v27 = vld [vmem:[#allocation2 + $0x176c] ss:$16 sps:$4 sm:$0xff]  }
 0x2fd   :  { %5186 = vmatpush1.bf16.msra.mxu0 %v8106_v28  ;;  %5678 = vmatpush1.bf16.msra.mxu1 %v8109_v29  ;;  %v8196_v28 = vld [vmem:[#allocation2 + $0x1760] ss:$16 sps:$4 sm:$0xff]   ;;  %v8199_v29 = vld [vmem:[#allocation2 + $0x1768] ss:$16 sps:$4 sm:$0xff]  }
 0x2fe   :  { %5187 = vmatprep.subr.bf16.mxu0 %v8114_v30  ;;  %5679 = vmatprep.subr.bf16.mxu1 %v8117_v31  ;;  %v8204_v30 = vld [vmem:[#allocation2 + $0x1784] ss:$16 sps:$4 sm:$0xff]   ;;  %v8207_v31 = vld [vmem:[#allocation2 + $0x178c] ss:$16 sps:$4 sm:$0xff]  }
 0x301   :  { %5188 = vmatpush1.bf16.msra.mxu0 %v8112_v32  ;;  %5680 = vmatpush1.bf16.msra.mxu1 %v8115_v33  ;;  %v8202_v32 = vld [vmem:[#allocation2 + $0x1780] ss:$16 sps:$4 sm:$0xff]   ;;  %v8205_v33 = vld [vmem:[#allocation2 + $0x1788] ss:$16 sps:$4 sm:$0xff]  }
 0x302   :  { %5189 = vmatprep.subr.bf16.mxu0 %v8120_v34  ;;  %5681 = vmatprep.subr.bf16.mxu1 %v8123_v35  ;;  %v8210_v34 = vld [vmem:[#allocation2 + $0x17a4] ss:$16 sps:$4 sm:$0xff]   ;;  %v8213_v35 = vld [vmem:[#allocation2 + $0x17ac] ss:$16 sps:$4 sm:$0xff]  }
 0x305   :  { %5190 = vmatpush1.bf16.msra.mxu0 %v8118_v36  ;;  %5682 = vmatpush1.bf16.msra.mxu1 %v8121_v37  ;;  %v8208_v36 = vld [vmem:[#allocation2 + $0x17a0] ss:$16 sps:$4 sm:$0xff]   ;;  %v8211_v37 = vld [vmem:[#allocation2 + $0x17a8] ss:$16 sps:$4 sm:$0xff]  }
 0x306   :  { %5191 = vmatprep.subr.bf16.mxu0 %v8126_v38  ;;  %5683 = vmatprep.subr.bf16.mxu1 %v8129_v39  ;;  %v8216_v38 = vld [vmem:[#allocation2 + $0x17c4] ss:$16 sps:$4 sm:$0xff]   ;;  %v8219_v39 = vld [vmem:[#allocation2 + $0x17cc] ss:$16 sps:$4 sm:$0xff]  }
 0x309   :  { %5192 = vmatpush1.bf16.msra.mxu0 %v8124_v40  ;;  %5684 = vmatpush1.bf16.msra.mxu1 %v8127_v41  ;;  %v8214_v40 = vld [vmem:[#allocation2 + $0x17c0] ss:$16 sps:$4 sm:$0xff]   ;;  %v8217_v41 = vld [vmem:[#allocation2 + $0x17c8] ss:$16 sps:$4 sm:$0xff]  }
 0x30a   :  { %5202 = vmatprep.subr.bf16.mxu0 %v8132_v43  ;;  %5694 = vmatprep.subr.bf16.mxu1 %v8135_v44  ;;  %v8225_v43 = vld [vmem:[#allocation2 + $0x17ec] ss:$16 sps:$4 sm:$0xff]   ;;  %v8220_v44 = vld [vmem:[#allocation2 + $0x17e0] ss:$16 sps:$4 sm:$0xff]  }
 0x30c   :  { %5194 = vmatmul.mubr.bf16.vlgmr.msra.gmra.mrb[0].mxu0 %v117_v45  ;;  %5686 = vmatmul.mubr.bf16.vlgmr.msra.gmra.mrb[0].mxu1 %v117_v45  ;;  %v8223_v45 = vld [vmem:[#allocation2 + $0x17e8] ss:$16 sps:$4 sm:$0xff]  }
 0x30d   :  { %5203 = vmatpush1.bf16.msra.mxu0 %v8130_v47  ;;  %5695 = vmatpush1.bf16.msra.mxu1 %v8133_v48  ;;  %v119_v47 = vpack.c.bf16 %v95_v46, %v95_v46  ;;  %v8226_v48 = vld [vmem:[#allocation7 + $0x40] sm:$0xff]  }
 0x30e   :  { %5204 = vmatprep.subr.bf16.mxu0 %v8138_v49  ;;  %5696 = vmatprep.subr.bf16.mxu1 %v8141_v50  ;;  %v8227_v49 = vld [vmem:[#allocation7 + $0xc0] sm:$0xff]  }
 0x30f   :  { %5234 = vmatprep.mubr.bf16.mxu0 %v120_v51  ;;  %5726 = vmatprep.mubr.bf16.mxu1 %v120_v51  ;;  %v8228_v50 = vld [vmem:[#allocation7] sm:$0xff]  }
 0x310   :  { %v8229_v51 = vld [vmem:[#allocation7 + $0x80] sm:$0xff]  }
 0x311   :  { %5205 = vmatpush1.bf16.msra.mxu0 %v8136_v52  ;;  %5697 = vmatpush1.bf16.msra.mxu1 %v8139_v53  ;;  %v8230_v52 = vld [vmem:[#allocation7 + $0x48] sm:$0xff]  }
 0x312   :  { %5206 = vmatprep.subr.bf16.mxu0 %v8144_v54  ;;  %5698 = vmatprep.subr.bf16.mxu1 %v8147_v55  ;;  %v8231_v53 = vld [vmem:[#allocation7 + $0xc8] sm:$0xff]  }
 0x313   :  { %v8232_v54 = vld [vmem:[#allocation7 + $0x8] sm:$0xff]  }
 0x314   :  { %v8233_v55 = vld [vmem:[#allocation7 + $0x88] sm:$0xff]  }
 0x315   :  { %5207 = vmatpush1.bf16.msra.mxu0 %v8142_v56  ;;  %5699 = vmatpush1.bf16.msra.mxu1 %v8145_v57  ;;  %v8234_v56 = vld [vmem:[#allocation7 + $0x50] sm:$0xff]  }
 0x316   :  { %5208 = vmatprep.subr.bf16.mxu0 %v8150_v58  ;;  %5700 = vmatprep.subr.bf16.mxu1 %v8153_v59  ;;  %v8235_v57 = vld [vmem:[#allocation7 + $0xd0] sm:$0xff]  }
 0x317   :  { %v8236_v58 = vld [vmem:[#allocation7 + $0x10] sm:$0xff]  }
 0x318   :  { %v8237_v59 = vld [vmem:[#allocation7 + $0x90] sm:$0xff]  }
 0x319   :  { %5209 = vmatpush1.bf16.msra.mxu0 %v8148_v60  ;;  %5701 = vmatpush1.bf16.msra.mxu1 %v8151_v61  ;;  %v8238_v60 = vld [vmem:[#allocation7 + $0x58] sm:$0xff]  }
 0x31a   :  { %5210 = vmatprep.subr.bf16.mxu0 %v8156_v62  ;;  %5702 = vmatprep.subr.bf16.mxu1 %v8159_v63  ;;  %v8239_v61 = vld [vmem:[#allocation7 + $0xd8] sm:$0xff]  }
 0x31b   :  { %v8240_v62 = vld [vmem:[#allocation7 + $0x18] sm:$0xff]  }
 0x31c   :  { %v8241_v63 = vld [vmem:[#allocation7 + $0x98] sm:$0xff]  }
 0x31d   :  { %5211 = vmatpush1.bf16.msra.mxu0 %v8154_v0  ;;  %5703 = vmatpush1.bf16.msra.mxu1 %v8157_v1  ;;  %v8242_v0 = vld [vmem:[#allocation7 + $0x60] sm:$0xff]  }
 0x31e   :  { %5212 = vmatprep.subr.bf16.mxu0 %v8162_v2  ;;  %5704 = vmatprep.subr.bf16.mxu1 %v8165_v3  ;;  %v8243_v1 = vld [vmem:[#allocation7 + $0xe0] sm:$0xff]  }
 0x31f   :  { %v8244_v2 = vld [vmem:[#allocation7 + $0x20] sm:$0xff]  }
 0x320   :  { %v8245_v3 = vld [vmem:[#allocation7 + $0xa0] sm:$0xff]  }
 0x321   :  { %5213 = vmatpush1.bf16.msra.mxu0 %v8160_v4  ;;  %5705 = vmatpush1.bf16.msra.mxu1 %v8163_v5  ;;  %v8246_v4 = vld [vmem:[#allocation7 + $0x68] sm:$0xff]  }
 0x322   :  { %5214 = vmatprep.subr.bf16.mxu0 %v8168_v6  ;;  %5706 = vmatprep.subr.bf16.mxu1 %v8171_v7  ;;  %v8247_v5 = vld [vmem:[#allocation7 + $0xe8] sm:$0xff]  }
 0x323   :  { %v8248_v6 = vld [vmem:[#allocation7 + $0x28] sm:$0xff]  }
 0x324   :  { %v8249_v7 = vld [vmem:[#allocation7 + $0xa8] sm:$0xff]  }
 0x325   :  { %5215 = vmatpush1.bf16.msra.mxu0 %v8166_v8  ;;  %5707 = vmatpush1.bf16.msra.mxu1 %v8169_v9  ;;  %v8250_v8 = vld [vmem:[#allocation7 + $0x70] sm:$0xff]  }
 0x326   :  { %5216 = vmatprep.subr.bf16.mxu0 %v8174_v10  ;;  %5708 = vmatprep.subr.bf16.mxu1 %v8177_v11  ;;  %v8251_v9 = vld [vmem:[#allocation7 + $0xf0] sm:$0xff]  }
 0x327   :  { %v8252_v10 = vld [vmem:[#allocation7 + $0x30] sm:$0xff]  }
 0x328   :  { %v8253_v11 = vld [vmem:[#allocation7 + $0xb0] sm:$0xff]  }
 0x329   :  { %5217 = vmatpush1.bf16.msra.mxu0 %v8172_v12  ;;  %5709 = vmatpush1.bf16.msra.mxu1 %v8175_v13  ;;  %v8254_v12 = vld [vmem:[#allocation7 + $0x78] sm:$0xff]  }
 0x32a   :  { %5218 = vmatprep.subr.bf16.mxu0 %v8180_v14  ;;  %5710 = vmatprep.subr.bf16.mxu1 %v8183_v15  ;;  %v8255_v13 = vld [vmem:[#allocation7 + $0xf8] sm:$0xff]  }
 0x32b   :  { %v8256_v14 = vld [vmem:[#allocation7 + $0x38] sm:$0xff]  }
 0x32c   :  { %v8257_v15 = vld [vmem:[#allocation7 + $0xb8] sm:$0xff]  }
 0x32d   :  { %5219 = vmatpush1.bf16.msra.mxu0 %v8178_v16  ;;  %5711 = vmatpush1.bf16.msra.mxu1 %v8181_v17  ;;  %v891_v16 = vlaneseq }
 0x32e   :  { %5220 = vmatprep.subr.bf16.mxu0 %v8186_v18  ;;  %5712 = vmatprep.subr.bf16.mxu1 %v8189_v19 }
 0x32f   :  { %v892_v17 = vshrl.u32 %v891_v16, 7 }
 0x331   :  { %5221 = vmatpush1.bf16.msra.mxu0 %v8184_v20  ;;  %5713 = vmatpush1.bf16.msra.mxu1 %v8187_v21  ;;  %v893_v18 = vsub.s32 0, %v892_v17  ;;  %v901_v19 = vsub.s32 2, %v892_v17  ;;  %v889_v20 = vld [vmem:[#allocation5] sm:$0xf]  ;;  %v897_v21 = vsub.s32 1, %v892_v17 }
 0x332   :  { %5222 = vmatprep.subr.bf16.mxu0 %v8192_v22  ;;  %5714 = vmatprep.subr.bf16.mxu1 %v8195_v23  ;;  %v905_v22 = vsub.s32 3, %v892_v17 }
 0x333   :  { %v894_v23 = vrot.slane %v889_v20, %v893_v18 }
 0x335   :  { %5223 = vmatpush1.bf16.msra.mxu0 %v8190_v24  ;;  %5715 = vmatpush1.bf16.msra.mxu1 %v8193_v25  ;;  %v902_v24 = vrot.slane %v889_v20, %v901_v19  ;;  %v898_v25 = vrot.slane %v889_v20, %v897_v21 }
 0x336   :  { %5224 = vmatprep.subr.bf16.mxu0 %v8198_v26  ;;  %5716 = vmatprep.subr.bf16.mxu1 %v8201_v27  ;;  %v906_v26 = vrot.slane %v889_v20, %v905_v22 }
 0x339   :  { %5225 = vmatpush1.bf16.msra.mxu0 %v8196_v28  ;;  %5717 = vmatpush1.bf16.msra.mxu1 %v8199_v29 }
 0x33a   :  { %5226 = vmatprep.subr.bf16.mxu0 %v8204_v30  ;;  %5718 = vmatprep.subr.bf16.mxu1 %v8207_v31 }
 0x33d   :  { %5227 = vmatpush1.bf16.msra.mxu0 %v8202_v32  ;;  %5719 = vmatpush1.bf16.msra.mxu1 %v8205_v33 }
 0x33e   :  { %5228 = vmatprep.subr.bf16.mxu0 %v8210_v34  ;;  %5720 = vmatprep.subr.bf16.mxu1 %v8213_v35 }
 0x341   :  { %5229 = vmatpush1.bf16.msra.mxu0 %v8208_v36  ;;  %5721 = vmatpush1.bf16.msra.mxu1 %v8211_v37 }
 0x342   :  { %5230 = vmatprep.subr.bf16.mxu0 %v8216_v38  ;;  %5722 = vmatprep.subr.bf16.mxu1 %v8219_v39 }
 0x345   :  { %5231 = vmatpush1.bf16.msra.mxu0 %v8214_v40  ;;  %5723 = vmatpush1.bf16.msra.mxu1 %v8217_v41 }
 0x346   :  { %5232 = vmatprep.subr.bf16.mxu0 %v8222_v42  ;;  %5724 = vmatprep.subr.bf16.mxu1 %v8225_v43 }
 0x349   :  { %5233 = vmatpush1.bf16.msra.mxu0 %v8220_v44  ;;  %5725 = vmatpush1.bf16.msra.mxu1 %v8223_v45 }
 0x34a   :  { %6929 = vmatprep.subr.bf16.mxu0 %v8226_v48  ;;  %6951 = vmatprep.subr.bf16.mxu1 %v8227_v49 }
 0x34c   :  { %5235 = vmatmul.mubr.bf16.vlgmr.msra.gmra.mrb[0].mxu0 %v119_v47  ;;  %5727 = vmatmul.mubr.bf16.vlgmr.msra.gmra.mrb[0].mxu1 %v119_v47 }
 0x34d   :  { %6930 = vmatpush3.bf16.msra.mxu0 %v8228_v50  ;;  %6952 = vmatpush3.bf16.msra.mxu1 %v8229_v51 }
 0x34e   :  { %6931 = vmatprep.subr.bf16.mxu0 %v8230_v52  ;;  %6953 = vmatprep.subr.bf16.mxu1 %v8231_v53 }
 0x351   :  { %6932 = vmatpush3.bf16.msra.mxu0 %v8232_v54  ;;  %6954 = vmatpush3.bf16.msra.mxu1 %v8233_v55 }
 0x352   :  { %6933 = vmatprep.subr.bf16.mxu0 %v8234_v56  ;;  %6955 = vmatprep.subr.bf16.mxu1 %v8235_v57 }
 0x355   :  { %6934 = vmatpush3.bf16.msra.mxu0 %v8236_v58  ;;  %6956 = vmatpush3.bf16.msra.mxu1 %v8237_v59 }
 0x356   :  { %6935 = vmatprep.subr.bf16.mxu0 %v8238_v60  ;;  %6957 = vmatprep.subr.bf16.mxu1 %v8239_v61  ;;  %v6896_v61 = vld [vmem:[#allocation8] ss:$0 sm:$0xff] }
 0x359   :  { %6936 = vmatpush3.bf16.msra.mxu0 %v8240_v62  ;;  %6958 = vmatpush3.bf16.msra.mxu1 %v8241_v63 }
 0x35a   :  { %6937 = vmatprep.subr.bf16.mxu0 %v8242_v0  ;;  %6959 = vmatprep.subr.bf16.mxu1 %v8243_v1 }
 0x35d   :  { %6938 = vmatpush3.bf16.msra.mxu0 %v8244_v2  ;;  %6960 = vmatpush3.bf16.msra.mxu1 %v8245_v3 }
 0x35e   :  { %6939 = vmatprep.subr.bf16.mxu0 %v8246_v4  ;;  %6961 = vmatprep.subr.bf16.mxu1 %v8247_v5 }
 0x361   :  { %6940 = vmatpush3.bf16.msra.mxu0 %v8248_v6  ;;  %6962 = vmatpush3.bf16.msra.mxu1 %v8249_v7 }
 0x362   :  { %6941 = vmatprep.subr.bf16.mxu0 %v8250_v8  ;;  %6963 = vmatprep.subr.bf16.mxu1 %v8251_v9 }
 0x365   :  { %6942 = vmatpush3.bf16.msra.mxu0 %v8252_v10  ;;  %6964 = vmatpush3.bf16.msra.mxu1 %v8253_v11 }
 0x366   :  { %6943 = vmatprep.subr.bf16.mxu0 %v8254_v12  ;;  %6965 = vmatprep.subr.bf16.mxu1 %v8255_v13 }
 0x369   :  { %6944 = vmatpush3.bf16.msra.mxu0 %v8256_v14  ;;  %6966 = vmatpush3.bf16.msra.mxu1 %v8257_v15 }
 0x41f   :  { %v5236_v27 = vpop.f32.mrb[0].mxu0  ;;  %v5728_v28 = vpop.f32.mrb[0].mxu1 }
 0x420   :  { %v6973_v29 = vadd.f32 %v5236_v27, %v894_v23  ;;  %v6975_v30 = vadd.f32 %v5728_v28, %v902_v24  ;;  %v5238_v31 = vpop.f32.mrb[1].mxu0  ;;  %v5730_v32 = vpop.f32.mrb[1].mxu1 }
 0x421   :  { %v6974_v33 = vadd.f32 %v5238_v31, %v898_v25  ;;  %v6976_v34 = vadd.f32 %v5730_v32, %v906_v26  ;;  %v5240_v35 = vpop.f32.mrb[2].mxu0  ;;  %v5732_v36 = vpop.f32.mrb[2].mxu1 }
 0x422   :  { %v6892_v37 = vmul.f32 -1.442695, %v6973_v29  ;;  %v6894_v38 = vmul.f32 -1.442695, %v6975_v30  ;;  %v5241_v39 = vpop.f32.mrb[3].mxu0  ;;  %v5733_v40 = vpop.f32.mrb[3].mxu1 }
 0x423   :  { %v6893_v41 = vmul.f32 -1.442695, %v6974_v33  ;;  %v6895_v42 = vmul.f32 -1.442695, %v6976_v34 }
 0x424   :  { %8258 = vpow2.f32 %v6892_v37 }
 0x425   :  { %8260 = vpow2.f32 %v6894_v38 }
 0x426   :  { %8262 = vpow2.f32 %v6893_v41 }
 0x427   :  { %8264 = vpow2.f32 %v6895_v42 }
 0x42e   :  { %v8259_v43 = vpop.eup %8258 }
 0x42f   :  { %v8261_v44 = vpop.eup %8260  ;;  %v5747_v45 = vadd.f32 1.0, %v8259_v43 }
 0x430   :  { %v8263_v46 = vpop.eup %8262  ;;  %v5749_v47 = vadd.f32 1.0, %v8261_v44 }
 0x431   :  { %v8265_v48 = vpop.eup %8264  ;;  %8266 = vrcp.f32 %v5747_v45  ;;  %v5748_v49 = vadd.f32 1.0, %v8263_v46 }
 0x432   :  { %8268 = vrcp.f32 %v5749_v47  ;;  %v5750_v50 = vadd.f32 1.0, %v8265_v48 }
 0x433   :  { %8270 = vrcp.f32 %v5748_v49 }
 0x434   :  { %8272 = vrcp.f32 %v5750_v50 }
 0x43b   :  { %v8267_v51 = vpop.eup %8266 }
 0x43c   :  { %v8269_v52 = vpop.eup %8268  ;;  %v5759_v57 = vpack.c.bf16 %v8267_v51, %v8267_v51 }
 0x43d   :  { %v8271_v53 = vpop.eup %8270  ;;  %v5761_v58 = vpack.c.bf16 %v8269_v52, %v8269_v52 }
 0x43e   :  { %v8273_v54 = vpop.eup %8272  ;;  %v5760_v55 = vpack.c.bf16 %v8271_v53, %v8271_v53 }
 0x43f   :  { %v5762_v56 = vpack.c.bf16 %v8273_v54, %v8273_v54 }
 0x440   :  { %6058 = vmatprep.mubr.bf16.mxu0 %v5760_v55 }
 0x441   :  { %6098 = vmatprep.mubr.bf16.mxu1 %v5762_v56  ;;  %6059 = vmatmul.mubr.bf16.vlgmr.msra.gmra.mrb[4].mxu0 %v5759_v57 }
 0x442   :  { %6099 = vmatmul.mubr.bf16.vlgmr.msra.gmra.mrb[4].mxu1 %v5761_v58 }
 0x514   :  { %v6945_v59 = vpop.f32.mrb[4].mxu0 }
 0x515   :  { %v6967_v60 = vpop.f32.mrb[4].mxu1  ;;  %v6946_v62 = vpop.f32.mrb[5].mxu0 }
 0x516   :  { %v6947_v63 = vadd.f32 %v6946_v62, %v6945_v59  ;;  %v6968_v0 = vpop.f32.mrb[5].mxu1  ;;  %v6948_v1 = vpop.f32.mrb[6].mxu0 }
 0x517   :  { %v6969_v2 = vadd.f32 %v6968_v0, %v6967_v60  ;;  %v6970_v3 = vpop.f32.mrb[6].mxu1  ;;  %v6949_v4 = vpop.f32.mrb[7].mxu0 }
 0x518   :  { %v6061_v5 = vadd.f32 %v6947_v63, %v6896_v61  ;;  %v6971_v6 = vpop.f32.mrb[7].mxu1 }
 0x51a   :  { %v6101_v7 = vadd.f32 %v6969_v2, %v6061_v5 }
 0x51c   :  { %6106 = vst [vmem:[#allocation10] sm:$0xff] %v6101_v7 }
 0x51d   :  { %8373 = shalt.err (!%p8370_p8)
}
 0x51e   :  { %s8374_s13 = scalar_lea.hbm %s8575_s5, 128 }
 0x51f   :  { %p8375_p9 = scmp.ne.s32.totalorder %s8575_s5, %s8374_s13  ;;  %p8378_p10 = scmp.lt.u32.totalorder %s8374_s13, %s8575_s5 }
 0x521   :  { %p8380_p11 = pnand %p8378_p10, %p8375_p9 }
 0x523   :  { %8383 = shalt.err (!%p8380_p11)
}
 0x524   :  { %6116 = dma.vmem_to_hbm [thread:$0]  %s6114_s9, 128, %s8575_s5, [#allocation4]  }
 0x525   :  { %8390 = dma.done.wait [#allocation4], 128  }
 0x526   :  { %8391 = vsyncadd [#allocation4], 4294967168 }
 0x527   :  { %6120 = vsyncpa [#allocation3], 1 }
 0x528   :  { %6121 = vsyncpa [#allocation6], 1 }
 0x529   :  { %6122 = vsyncpa [#allocation9], 1 }
 0x52a   :  { %6123 = vsyncpa [#allocation4], 1 }

</bundles_post_ra>
